<compile_context>
chip_gen: v5e
topology: v5e:2x2
jax: 0.10.0
libtpu: 0.0.40
codegen_flags: <defaults>
</compile_context>

<pallas_src>
import functools

import jax
import jax.numpy as jnp
from jax.experimental import pallas as pl
from jax.experimental.pallas import tpu as pltpu


def ffn_kernel(x_ref, w1_ref, b1_ref, w2_ref, b2_ref, o_ref):
    # First linear (bf16 operands, f32 accumulation on the MXU).
    h = jnp.dot(x_ref[...], w1_ref[...], preferred_element_type=jnp.float32)
    # Bias + ReLU in f32 on the VPU.
    h = jnp.maximum(h + b1_ref[...], 0.0)          # (tm, 4C) + (1, 4C) broadcast
    # Second linear (cast the activation back to bf16 for the MXU).
    y = jnp.dot(h.astype(w2_ref.dtype), w2_ref[...],
                preferred_element_type=jnp.float32)
    o_ref[...] = (y + b2_ref[...]).astype(o_ref.dtype)   # (tm, C) + (1, C)


def _round_up(x, m):
    return (x + m - 1) // m * m


@functools.partial(jax.jit, static_argnames=("tm",))
def feed_forward(x, w1, b1, w2, b2, *, tm=256):
    """x: (B, T, C) float32.  w1: (C, 4C), w2: (4C, C).  Returns (B, T, C) float32."""
    B, T, C = x.shape
    H = w1.shape[1]                       # 4 * C
    M = B * T

    # Pick the M-tile: big (256) for large M, otherwise a single padded tile.
    tile_m = min(tm, _round_up(M, 8))
    Mp = _round_up(M, tile_m)

    # bf16 operands for the MXU; f32 accumulation happens inside the kernel.
    x2d = x.reshape(M, C)
    if Mp != M:
        x2d = jnp.pad(x2d, ((0, Mp - M), (0, 0)))
    x2d = x2d.astype(jnp.bfloat16)
    w1b = w1.astype(jnp.bfloat16)
    w2b = w2.astype(jnp.bfloat16)

    resident = pl.Buffered(1)             # constant blocks: no double-buffering needed

    out2d = pl.pallas_call(
        ffn_kernel,
        out_shape=jax.ShapeDtypeStruct((Mp, C), x.dtype),
        grid_spec=pltpu.PrefetchScalarGridSpec(
            num_scalar_prefetch=0,
            grid=(Mp // tile_m,),
            in_specs=[
                pl.BlockSpec((tile_m, C), lambda i: (i, 0)),                        # x tile
                pl.BlockSpec((C, H), lambda i: (0, 0), pipeline_mode=resident),     # W1
                pl.BlockSpec((1, H), lambda i: (0, 0), pipeline_mode=resident),     # b1
                pl.BlockSpec((H, C), lambda i: (0, 0), pipeline_mode=resident),     # W2
                pl.BlockSpec((1, C), lambda i: (0, 0), pipeline_mode=resident),     # b2
            ],
            out_specs=pl.BlockSpec((tile_m, C), lambda i: (i, 0)),
        ),
        compiler_params=pltpu.CompilerParams(
            dimension_semantics=("parallel",),   # lets v7x shard M-steps across its 2 TCs
        ),
    )(x2d, w1b, b1, w2b, b2)

    return out2d[:M].reshape(B, T, C)


def init_params(key, n_embd):
    """Deterministic PyTorch-style (uniform +-1/sqrt(fan_in)) init."""
    hidden = 4 * n_embd
    k1, k2, k3, k4 = jax.random.split(key, 4)
    bound1 = 1.0 / (n_embd ** 0.5)
    bound2 = 1.0 / (hidden ** 0.5)
    w1 = jax.random.uniform(k1, (n_embd, hidden), jnp.float32, -bound1, bound1)
    b1 = jax.random.uniform(k2, (1, hidden), jnp.float32, -bound1, bound1)
    w2 = jax.random.uniform(k3, (hidden, n_embd), jnp.float32, -bound2, bound2)
    b2 = jax.random.uniform(k4, (1, n_embd), jnp.float32, -bound2, bound2)
    return w1, b1, w2, b2


if __name__ == "__main__":
    n_embd = 384           # matches module's n_embd
    B, T = 2, 8            # small batch / sequence (M = 16 -> single padded tile)

    key = jax.random.PRNGKey(0)
    kx, kp = jax.random.split(key)
    x = jax.random.normal(kx, (B, T, n_embd), jnp.float32)
    w1, b1, w2, b2 = init_params(kp, n_embd)

    out = feed_forward(x, w1, b1, w2, b2)
    out = jax.block_until_ready(out)
    assert out.shape == (B, T, n_embd)
    assert out.dtype == jnp.float32

    # Reference in plain JAX using the same bf16 operand / f32 accumulate recipe.
    xb = x.reshape(-1, n_embd).astype(jnp.bfloat16)
    h_ref = jnp.maximum(
        jnp.dot(xb, w1.astype(jnp.bfloat16), preferred_element_type=jnp.float32) + b1,
        0.0)
    ref = jnp.dot(h_ref.astype(jnp.bfloat16), w2.astype(jnp.bfloat16),
                  preferred_element_type=jnp.float32) + b2
    ref = ref.reshape(B, T, n_embd)

    assert jnp.allclose(out, ref, atol=1e-2, rtol=1e-2), float(
        jnp.max(jnp.abs(out - ref)))

    print("KERNEL_OK")
</pallas_src>

<mosaic_0001>
module attributes {stable_mosaic.version = 11 : i64} {
  func.func @ffn_kernel(%arg0: i32, %arg1: memref<16x384xbf16, #tpu.memory_space<vmem>>, %arg2: memref<384x1536xbf16, #tpu.memory_space<vmem>>, %arg3: memref<1x1536xf32, #tpu.memory_space<vmem>>, %arg4: memref<1536x384xbf16, #tpu.memory_space<vmem>>, %arg5: memref<1x384xf32, #tpu.memory_space<vmem>>, %arg6: memref<16x384xf32, #tpu.memory_space<vmem>>) attributes {dimension_semantics = [#tpu.dimension_semantics<parallel>], iteration_bounds = array<i64: 1>, scalar_prefetch = 0 : i64, scratch_operands = 0 : i64, tpu.core_type = #tpu.core_type<tc>, window_params = [{transform_indices = @transform_0, window_bounds = array<i64: 16, 384>}, {pipeline_mode = #tpu.pipeline_mode<synchronous>, transform_indices = @transform_1, window_bounds = array<i64: 384, 1536>}, {pipeline_mode = #tpu.pipeline_mode<synchronous>, transform_indices = @transform_2, window_bounds = array<i64: 1, 1536>}, {pipeline_mode = #tpu.pipeline_mode<synchronous>, transform_indices = @transform_3, window_bounds = array<i64: 1536, 384>}, {pipeline_mode = #tpu.pipeline_mode<synchronous>, transform_indices = @transform_4, window_bounds = array<i64: 1, 384>}, {transform_indices = @transform_5, window_bounds = array<i64: 16, 384>}]} {
    %c0 = arith.constant 0 : index
    %c0_0 = arith.constant 0 : index
    %0 = vector.load %arg1[%c0, %c0_0] : memref<16x384xbf16, #tpu.memory_space<vmem>>, vector<16x384xbf16>
    %c0_1 = arith.constant 0 : index
    %c0_2 = arith.constant 0 : index
    %1 = vector.load %arg2[%c0_1, %c0_2] : memref<384x1536xbf16, #tpu.memory_space<vmem>>, vector<384x1536xbf16>
    %cst = arith.constant dense<0.000000e+00> : vector<16x1536xf32>
    %2 = tpu.matmul %0, %1, %cst {dimension_numbers = #tpu.dot_dimension_numbers<[1], [0], [0], [1], [0, 0, 1, 1], [], []>} : vector<16x384xbf16>, vector<384x1536xbf16>, vector<16x1536xf32> -> vector<16x1536xf32>
    %c0_3 = arith.constant 0 : index
    %c0_4 = arith.constant 0 : index
    %3 = vector.load %arg3[%c0_3, %c0_4] : memref<1x1536xf32, #tpu.memory_space<vmem>>, vector<1x1536xf32>
    %4 = vector.broadcast %3 : vector<1x1536xf32> to vector<16x1536xf32>
    %5 = arith.addf %2, %4 : vector<16x1536xf32>
    %cst_5 = arith.constant 0.000000e+00 : f32
    %6 = vector.broadcast %cst_5 : f32 to vector<16x1536xf32>
    %7 = arith.maximumf %5, %6 : vector<16x1536xf32>
    %8 = arith.truncf %7 : vector<16x1536xf32> to vector<16x1536xbf16>
    %c0_6 = arith.constant 0 : index
    %c0_7 = arith.constant 0 : index
    %9 = vector.load %arg4[%c0_6, %c0_7] : memref<1536x384xbf16, #tpu.memory_space<vmem>>, vector<1536x384xbf16>
    %cst_8 = arith.constant dense<0.000000e+00> : vector<16x384xf32>
    %10 = tpu.matmul %8, %9, %cst_8 {dimension_numbers = #tpu.dot_dimension_numbers<[1], [0], [0], [1], [0, 0, 1, 1], [], []>} : vector<16x1536xbf16>, vector<1536x384xbf16>, vector<16x384xf32> -> vector<16x384xf32>
    %c0_9 = arith.constant 0 : index
    %c0_10 = arith.constant 0 : index
    %11 = vector.load %arg5[%c0_9, %c0_10] : memref<1x384xf32, #tpu.memory_space<vmem>>, vector<1x384xf32>
    %12 = vector.broadcast %11 : vector<1x384xf32> to vector<16x384xf32>
    %13 = arith.addf %10, %12 : vector<16x384xf32>
    %c0_11 = arith.constant 0 : index
    %c0_12 = arith.constant 0 : index
    %14 = vector.load %arg6[%c0_11, %c0_12] : memref<16x384xf32, #tpu.memory_space<vmem>>, vector<16x384xf32>
    tpu.vector_store %arg6[%c0_11, %c0_12], %13 {strides = array<i32>} : memref<16x384xf32, #tpu.memory_space<vmem>>, vector<16x384xf32>,
    return
  }
  func.func @transform_0(%arg0: i32) -> (i32, i32) {
    %c0_i32 = arith.constant 0 : i32
    %c0_i32_0 = arith.constant 0 : i32
    return %arg0, %c0_i32 : i32, i32
  }
  func.func @transform_1(%arg0: i32) -> (i32, i32) {
    %c0_i32 = arith.constant 0 : i32
    %c0_i32_0 = arith.constant 0 : i32
    %c0_i32_1 = arith.constant 0 : i32
    return %c0_i32, %c0_i32_0 : i32, i32
  }
  func.func @transform_2(%arg0: i32) -> (i32, i32) {
    %c0_i32 = arith.constant 0 : i32
    %c0_i32_0 = arith.constant 0 : i32
    %c0_i32_1 = arith.constant 0 : i32
    return %c0_i32, %c0_i32_0 : i32, i32
  }
  func.func @transform_3(%arg0: i32) -> (i32, i32) {
    %c0_i32 = arith.constant 0 : i32
    %c0_i32_0 = arith.constant 0 : i32
    %c0_i32_1 = arith.constant 0 : i32
    return %c0_i32, %c0_i32_0 : i32, i32
  }
  func.func @transform_4(%arg0: i32) -> (i32, i32) {
    %c0_i32 = arith.constant 0 : i32
    %c0_i32_0 = arith.constant 0 : i32
    %c0_i32_1 = arith.constant 0 : i32
    return %c0_i32, %c0_i32_0 : i32, i32
  }
  func.func @transform_5(%arg0: i32) -> (i32, i32) {
    %c0_i32 = arith.constant 0 : i32
    %c0_i32_0 = arith.constant 0 : i32
    return %arg0, %c0_i32 : i32, i32
  }
}

</mosaic_0001>

<bundles_post_ra>
// kernel: feed_forward.1
= control target key start
LH: loop header
LB: loop body
LE: loop exit
PB: predicated region body
PF: predicated region fallthrough
CT: control target
= control target key end

     0   :  { %s11527_s0 = inlined_call_operand.vmem [shape: bf16[16,384], index: 0, kind: input, shape index: {}]   ;;  %s11528_s1 = inlined_call_operand.vmem [shape: bf16[384,1536], index: 1, kind: input, shape index: {}]   ;;  %s11529_s2 = inlined_call_operand.vmem [shape: f32[1,1536], index: 2, kind: input, shape index: {}]   ;;  %s11530_s3 = inlined_call_operand.vmem [shape: bf16[1536,384], index: 3, kind: input, shape index: {}]   ;;  %s11531_s4 = inlined_call_operand.vmem [shape: f32[1,384], index: 4, kind: input, shape index: {}]   ;;  %s11532_s5 = inlined_call_operand.hbm [shape: f32[16,384], index: 5, kind: output, shape index: {}]  }
   0x1   :  { %v5143_v0 = vld [vmem:[%s11528_s1 + $0x2a0] sm:$0xf]  ;;  %v7202_v1 = vld [vmem:[%s11528_s1 + $0x2cc] sm:$0xf0]  ;;  %v7196_v9 = vld [vmem:[%s11528_s1 + $0x2a4] sm:$0xf] }
   0x2   :  { %v5527_v2 = vld [vmem:[%s11528_s1 + $0x5a0] sm:$0xf]  ;;  %v5144_v3 = vor.u32 %v7202_v1, %v5143_v0  ;;  %v7298_v4 = vld [vmem:[%s11528_s1 + $0x5cc] sm:$0xf0]  ;;  %v5145_v10 = vld [vmem:[%s11528_s1 + $0x2d0] sm:$0xf0] }
   0x3   :  { %v5911_v5 = vld [vmem:[%s11528_s1 + $0x8a0] sm:$0xf]  ;;  %v7394_v6 = vld [vmem:[%s11528_s1 + $0x8cc] sm:$0xf0]  ;;  %v5528_v7 = vor.u32 %v7298_v4, %v5527_v2  ;;  %v5148_v12 = vor.u32 %v7196_v9, %v5145_v10  ;;  %v7184_v20 = vld [vmem:[%s11528_s1 + $0x244] sm:$0xf] }
   0x4   :  { %v5912_v8 = vor.u32 %v7394_v6, %v5911_v5  ;;  %v5095_v11 = vld [vmem:[%s11528_s1 + $0x240] sm:$0xf]  ;;  %1797 = vmatpush.bf16.msra.mxu0 %v5144_v3  ;;  %v7190_v13 = vld [vmem:[%s11528_s1 + $0x26c] sm:$0xf0]  ;;  %v5097_v22 = vld [vmem:[%s11528_s1 + $0x270] sm:$0xf0] }
   0x5   :  { %v5479_v14 = vld [vmem:[%s11528_s1 + $0x540] sm:$0xf]  ;;  %v7286_v15 = vld [vmem:[%s11528_s1 + $0x56c] sm:$0xf0]  ;;  %1811 = vmatpush.bf16.msra.mxu1 %v5528_v7  ;;  %v5096_v16 = vor.u32 %v7190_v13, %v5095_v11  ;;  %1839 = vmatpush.bf16.msra.mxu3 %v5148_v12  ;;  %v5100_v25 = vor.u32 %v7184_v20, %v5097_v22  ;;  %v7172_v31 = vld [vmem:[%s11528_s1 + $0x1e4] sm:$0xf] }
   0x6   :  { %1825 = vmatpush.bf16.msra.mxu2 %v5912_v8  ;;  %v5480_v17 = vor.u32 %v7286_v15, %v5479_v14  ;;  %v5863_v18 = vld [vmem:[%s11528_s1 + $0x840] sm:$0xf]  ;;  %v7382_v19 = vld [vmem:[%s11528_s1 + $0x86c] sm:$0xf0]  ;;  %v5049_v32 = vld [vmem:[%s11528_s1 + $0x210] sm:$0xf0] }
   0x7   :  { %v5864_v21 = vor.u32 %v7382_v19, %v5863_v18  ;;  %v5047_v23 = vld [vmem:[%s11528_s1 + $0x1e0] sm:$0xf]  ;;  %v7178_v24 = vld [vmem:[%s11528_s1 + $0x20c] sm:$0xf0]  ;;  %v5052_v38 = vor.u32 %v7172_v31, %v5049_v32  ;;  %v7160_v42 = vld [vmem:[%s11528_s1 + $0x184] sm:$0xf] }
   0x8   :  { %v5431_v26 = vld [vmem:[%s11528_s1 + $0x4e0] sm:$0xf]  ;;  %v7274_v27 = vld [vmem:[%s11528_s1 + $0x50c] sm:$0xf0]  ;;  %1798 = vmatpush.bf16.msra.mxu0 %v5096_v16  ;;  %v5048_v29 = vor.u32 %v7178_v24, %v5047_v23  ;;  %v5001_v43 = vld [vmem:[%s11528_s1 + $0x1b0] sm:$0xf0] }
   0x9   :  { %v5815_v28 = vld [vmem:[%s11528_s1 + $0x7e0] sm:$0xf]  ;;  %v7370_v30 = vld [vmem:[%s11528_s1 + $0x80c] sm:$0xf0]  ;;  %1812 = vmatpush.bf16.msra.mxu1 %v5480_v17  ;;  %v5432_v33 = vor.u32 %v7274_v27, %v5431_v26  ;;  %1840 = vmatpush.bf16.msra.mxu3 %v5100_v25  ;;  %v5004_v50 = vor.u32 %v7160_v42, %v5001_v43  ;;  %v7148_v54 = vld [vmem:[%s11528_s1 + $0x124] sm:$0xf] }
   0xa   :  { %1826 = vmatpush.bf16.msra.mxu2 %v5864_v21  ;;  %v5816_v34 = vor.u32 %v7370_v30, %v5815_v28  ;;  %v4999_v35 = vld [vmem:[%s11528_s1 + $0x180] sm:$0xf]  ;;  %v7166_v36 = vld [vmem:[%s11528_s1 + $0x1ac] sm:$0xf0]  ;;  %v4953_v55 = vld [vmem:[%s11528_s1 + $0x150] sm:$0xf0] }
   0xb   :  { %v5383_v37 = vld [vmem:[%s11528_s1 + $0x480] sm:$0xf]  ;;  %v7262_v39 = vld [vmem:[%s11528_s1 + $0x4ac] sm:$0xf0]  ;;  %v5000_v44 = vor.u32 %v7166_v36, %v4999_v35  ;;  %v4956_v62 = vor.u32 %v7148_v54, %v4953_v55  ;;  %v7136_v2 = vld [vmem:[%s11528_s1 + $0xc4] sm:$0xf] }
   0xc   :  { %v5767_v40 = vld [vmem:[%s11528_s1 + $0x780] sm:$0xf]  ;;  %v7358_v41 = vld [vmem:[%s11528_s1 + $0x7ac] sm:$0xf0]  ;;  %1799 = vmatpush.bf16.msra.mxu0 %v5048_v29  ;;  %v5384_v45 = vor.u32 %v7262_v39, %v5383_v37  ;;  %v4905_v3 = vld [vmem:[%s11528_s1 + $0xf0] sm:$0xf0] }
   0xd   :  { %1813 = vmatpush.bf16.msra.mxu1 %v5432_v33  ;;  %v5768_v46 = vor.u32 %v7358_v41, %v5767_v40  ;;  %v4951_v47 = vld [vmem:[%s11528_s1 + $0x120] sm:$0xf]  ;;  %v7154_v48 = vld [vmem:[%s11528_s1 + $0x14c] sm:$0xf0]  ;;  %1841 = vmatpush.bf16.msra.mxu3 %v5052_v38  ;;  %v4908_v10 = vor.u32 %v7136_v2, %v4905_v3  ;;  %v7124_v14 = vld [vmem:[%s11528_s1 + $0x64] sm:$0xf] }
   0xe   :  { %1827 = vmatpush.bf16.msra.mxu2 %v5816_v34  ;;  %v5335_v49 = vld [vmem:[%s11528_s1 + $0x420] sm:$0xf]  ;;  %v7250_v51 = vld [vmem:[%s11528_s1 + $0x44c] sm:$0xf0]  ;;  %v4952_v56 = vor.u32 %v7154_v48, %v4951_v47  ;;  %v4857_v15 = vld [vmem:[%s11528_s1 + $0x90] sm:$0xf0] }
   0xf   :  { %v5719_v52 = vld [vmem:[%s11528_s1 + $0x720] sm:$0xf]  ;;  %v7346_v53 = vld [vmem:[%s11528_s1 + $0x74c] sm:$0xf0]  ;;  %v5336_v57 = vor.u32 %v7250_v51, %v5335_v49  ;;  %v4860_v24 = vor.u32 %v7124_v14, %v4857_v15  ;;  %v7112_v26 = vld [vmem:[%s11528_s1 + $0x4] sm:$0xf] }
  0x10   :  { %1800 = vmatpush.bf16.msra.mxu0 %v5000_v44  ;;  %v5720_v58 = vor.u32 %v7346_v53, %v5719_v52  ;;  %v4903_v59 = vld [vmem:[%s11528_s1 + $0xc0] sm:$0xf]  ;;  %v7142_v60 = vld [vmem:[%s11528_s1 + $0xec] sm:$0xf0]  ;;  %v4809_v27 = vld [vmem:[%s11528_s1 + $0x30] sm:$0xf0] }
  0x11   :  { %1814 = vmatpush.bf16.msra.mxu1 %v5384_v45  ;;  %v5287_v61 = vld [vmem:[%s11528_s1 + $0x3c0] sm:$0xf]  ;;  %1842 = vmatpush.bf16.msra.mxu3 %v5004_v50  ;;  %v7238_v63 = vld [vmem:[%s11528_s1 + $0x3ec] sm:$0xf0]  ;;  %v4904_v4 = vor.u32 %v7142_v60, %v4903_v59  ;;  %v7292_v28 = vld [vmem:[%s11528_s1 + $0x5a4] sm:$0xf]  ;;  %v4812_v39 = vor.u32 %v7112_v26, %v4809_v27 }
  0x12   :  { %1828 = vmatpush.bf16.msra.mxu2 %v5768_v46  ;;  %v5671_v0 = vld [vmem:[%s11528_s1 + $0x6c0] sm:$0xf]  ;;  %v7334_v1 = vld [vmem:[%s11528_s1 + $0x6ec] sm:$0xf0]  ;;  %v5288_v5 = vor.u32 %v7238_v63, %v5287_v61  ;;  %v5529_v29 = vld [vmem:[%s11528_s1 + $0x5d0] sm:$0xf0] }
  0x13   :  { %v5672_v6 = vor.u32 %v7334_v1, %v5671_v0  ;;  %v4855_v7 = vld [vmem:[%s11528_s1 + $0x60] sm:$0xf]  ;;  %v7130_v8 = vld [vmem:[%s11528_s1 + $0x8c] sm:$0xf0]  ;;  %v7388_v30 = vld [vmem:[%s11528_s1 + $0x8a4] sm:$0xf]  ;;  %v5532_v40 = vor.u32 %v7292_v28, %v5529_v29 }
  0x14   :  { %1801 = vmatpush.bf16.msra.mxu0 %v4952_v56  ;;  %v5239_v9 = vld [vmem:[%s11528_s1 + $0x360] sm:$0xf]  ;;  %v7226_v11 = vld [vmem:[%s11528_s1 + $0x38c] sm:$0xf0]  ;;  %v4856_v16 = vor.u32 %v7130_v8, %v4855_v7  ;;  %v5913_v32 = vld [vmem:[%s11528_s1 + $0x8d0] sm:$0xf0] }
  0x15   :  { %1815 = vmatpush.bf16.msra.mxu1 %v5336_v57  ;;  %1843 = vmatpush.bf16.msra.mxu3 %v4956_v62  ;;  %v5623_v12 = vld [vmem:[%s11528_s1 + $0x660] sm:$0xf]  ;;  %v7322_v13 = vld [vmem:[%s11528_s1 + $0x68c] sm:$0xf0]  ;;  %v5240_v19 = vor.u32 %v7226_v11, %v5239_v9  ;;  %v5151_v33 = vld [vmem:[%s11528_s1 + $0x2a8] sm:$0xf]  ;;  %v5916_v42 = vor.u32 %v7388_v30, %v5913_v32 }
  0x16   :  { %1829 = vmatpush.bf16.msra.mxu2 %v5720_v58  ;;  %v4807_v17 = vld [vmem:[%s11528_s1] sm:$0xf]  ;;  %v7118_v18 = vld [vmem:[%s11528_s1 + $0x2c] sm:$0xf0]  ;;  %v5624_v20 = vor.u32 %v7322_v13, %v5623_v12  ;;  %v7203_v34 = vld [vmem:[%s11528_s1 + $0x2d4] sm:$0xf0] }
  0x17   :  { %v5191_v21 = vld [vmem:[%s11528_s1 + $0x300] sm:$0xf]  ;;  %v7214_v22 = vld [vmem:[%s11528_s1 + $0x32c] sm:$0xf0]  ;;  %v4808_v31 = vor.u32 %v7118_v18, %v4807_v17  ;;  %v5535_v37 = vld [vmem:[%s11528_s1 + $0x5a8] sm:$0xf]  ;;  %v5152_v43 = vor.u32 %v7203_v34, %v5151_v33 }
  0x18   :  { %1802 = vmatpush.bf16.msra.mxu0 %v4904_v4  ;;  %v5575_v23 = vld [vmem:[%s11528_s1 + $0x600] sm:$0xf]  ;;  %v7310_v25 = vld [vmem:[%s11528_s1 + $0x62c] sm:$0xf0]  ;;  %v5192_v35 = vor.u32 %v7214_v22, %v5191_v21  ;;  %v7299_v38 = vld [vmem:[%s11528_s1 + $0x5d4] sm:$0xf0] }
  0x19   :  { %1816 = vmatpush.bf16.msra.mxu1 %v5288_v5  ;;  %1844 = vmatpush.bf16.msra.mxu3 %v4908_v10  ;;  %v5576_v36 = vor.u32 %v7310_v25, %v5575_v23  ;;  %v7280_v41 = vld [vmem:[%s11528_s1 + $0x544] sm:$0xf]  ;;  %v5481_v44 = vld [vmem:[%s11528_s1 + $0x570] sm:$0xf0]  ;;  %v5536_v47 = vor.u32 %v7299_v38, %v5535_v37  ;;  %v5103_v48 = vld [vmem:[%s11528_s1 + $0x248] sm:$0xf] }
  0x1a   :  { %1830 = vmatpush.bf16.msra.mxu2 %v5672_v6  ;;  %v7376_v45 = vld [vmem:[%s11528_s1 + $0x844] sm:$0xf]  ;;  %v5865_v46 = vld [vmem:[%s11528_s1 + $0x870] sm:$0xf0]  ;;  %v7191_v49 = vld [vmem:[%s11528_s1 + $0x274] sm:$0xf0]  ;;  %v5484_v54 = vor.u32 %v7280_v41, %v5481_v44 }
  0x1b   :  { %v5487_v50 = vld [vmem:[%s11528_s1 + $0x548] sm:$0xf]  ;;  %v7287_v51 = vld [vmem:[%s11528_s1 + $0x574] sm:$0xf0]  ;;  %v4795_v52 = vld [vmem:[%s11527_s0] sm:$0xf]  ;;  %v5868_v58 = vor.u32 %v7376_v45, %v5865_v46  ;;  %v5104_v59 = vor.u32 %v7191_v49, %v5103_v48 }
  0x1c   :  { %1803 = vmatpush.bf16.msra.mxu0 %v4856_v16  ;;  %v7110_v53 = vld [vmem:[%s11527_s0 + $0x8] sm:$0xf0]  ;;  %v7268_v55 = vld [vmem:[%s11528_s1 + $0x4e4] sm:$0xf]  ;;  %v5433_v56 = vld [vmem:[%s11528_s1 + $0x510] sm:$0xf0]  ;;  %v5488_v63 = vor.u32 %v7287_v51, %v5487_v50 }
  0x1d   :  { %1817 = vmatpush.bf16.msra.mxu1 %v5240_v19  ;;  %1845 = vmatpush.bf16.msra.mxu3 %v4860_v24  ;;  %v8002_v57 = vor.u32 %v7110_v53, %v4795_v52  ;;  %v7364_v60 = vld [vmem:[%s11528_s1 + $0x7e4] sm:$0xf]  ;;  %v5817_v61 = vld [vmem:[%s11528_s1 + $0x810] sm:$0xf0]  ;;  %v5055_v62 = vld [vmem:[%s11528_s1 + $0x1e8] sm:$0xf]  ;;  %v5436_v6 = vor.u32 %v7268_v55, %v5433_v56 }
  0x1e   :  { %1831 = vmatpush.bf16.msra.mxu2 %v5624_v20  ;;  %v7179_v0 = vld [vmem:[%s11528_s1 + $0x214] sm:$0xf0]  ;;  %v7109_v1 = vld [vmem:[%s11527_s0 + $0x4] sm:$0xf]  ;;  %v4797_v2 = vld [vmem:[%s11527_s0 + $0xc] sm:$0xf0]  ;;  %v5820_v9 = vor.u32 %v7364_v60, %v5817_v61 }
  0x1f   :  { %v5439_v3 = vld [vmem:[%s11528_s1 + $0x4e8] sm:$0xf]  ;;  %v7275_v4 = vld [vmem:[%s11528_s1 + $0x514] sm:$0xf0]  ;;  %v8029_v5 = vor.u32 %v7109_v1, %v4797_v2  ;;  %v7256_v7 = vld [vmem:[%s11528_s1 + $0x484] sm:$0xf]  ;;  %v5056_v10 = vor.u32 %v7179_v0, %v5055_v62 }
  0x20   :  { %1804 = vmatpush.bf16.msra.mxu0 %v4808_v31  ;;  %v5385_v8 = vld [vmem:[%s11528_s1 + $0x4b0] sm:$0xf0]  ;;  %v7352_v11 = vld [vmem:[%s11528_s1 + $0x784] sm:$0xf]  ;;  %v4803_v13 = vld [vmem:[%s11527_s0 + $0x8] sm:$0xf]  ;;  %v5440_v14 = vor.u32 %v7275_v4, %v5439_v3 }
  0x21   :  { %1818 = vmatpush.bf16.msra.mxu1 %v5192_v35  ;;  %1846 = vmatpush.bf16.msra.mxu3 %v4812_v39  ;;  %v5769_v12 = vld [vmem:[%s11528_s1 + $0x7b0] sm:$0xf0]  ;;  %v5007_v15 = vld [vmem:[%s11528_s1 + $0x188] sm:$0xf]  ;;  %v7167_v16 = vld [vmem:[%s11528_s1 + $0x1b4] sm:$0xf0]  ;;  %v5388_v21 = vor.u32 %v7256_v7, %v5385_v8 }
  0x22   :  { %1832 = vmatpush.bf16.msra.mxu2 %v5576_v36  ;;  %v7111_v17 = vld [vmem:[%s11527_s0 + $0x10] sm:$0xf0]  ;;  %v5391_v18 = vld [vmem:[%s11528_s1 + $0x488] sm:$0xf]  ;;  %v7263_v19 = vld [vmem:[%s11528_s1 + $0x4b4] sm:$0xf0]  ;;  %v5772_v22 = vor.u32 %v7352_v11, %v5769_v12  ;;  %v5008_v23 = vor.u32 %v7167_v16, %v5007_v15 }
  0x23   :  { %1805 = vmatmul.bf16.vlgmr.msra.gmra.mxu0 %v8002_v57  ;;  %v8063_v20 = vor.u32 %v7111_v17, %v4803_v13  ;;  %v7244_v24 = vld [vmem:[%s11528_s1 + $0x424] sm:$0xf]  ;;  %v5337_v25 = vld [vmem:[%s11528_s1 + $0x450] sm:$0xf0]  ;;  %v5392_v27 = vor.u32 %v7263_v19, %v5391_v18  ;;  %v4959_v29 = vld [vmem:[%s11528_s1 + $0x128] sm:$0xf] }
  0x24   :  { %1853 = vmatpush.bf16.msrb.mxu0 %v5532_v40  ;;  %1847 = vmatmul.bf16.vlgmr.msra.gmra.mxu3 %v8002_v57  ;;  %v7340_v26 = vld [vmem:[%s11528_s1 + $0x724] sm:$0xf]  ;;  %v5721_v28 = vld [vmem:[%s11528_s1 + $0x750] sm:$0xf0]  ;;  %v7155_v30 = vld [vmem:[%s11528_s1 + $0x154] sm:$0xf0]  ;;  %v5340_v33 = vor.u32 %v7244_v24, %v5337_v25 }
  0x25   :  { %1867 = vmatpush.bf16.msrb.mxu1 %v5916_v42  ;;  %1895 = vmatpush.bf16.msrb.mxu3 %v5536_v47  ;;  %v5343_v31 = vld [vmem:[%s11528_s1 + $0x428] sm:$0xf]  ;;  %v7251_v32 = vld [vmem:[%s11528_s1 + $0x454] sm:$0xf0]  ;;  %v5724_v34 = vor.u32 %v7340_v26, %v5721_v28  ;;  %v4960_v35 = vor.u32 %v7155_v30, %v4959_v29  ;;  %v7232_v36 = vld [vmem:[%s11528_s1 + $0x3c4] sm:$0xf] }
  0x26   :  { %1881 = vmatpush.bf16.msrb.mxu2 %v5152_v43  ;;  %1819 = vmatmul.bf16.vlgmr.msra.gmra.mxu1 %v8029_v5  ;;  %v5289_v37 = vld [vmem:[%s11528_s1 + $0x3f0] sm:$0xf0]  ;;  %v7328_v38 = vld [vmem:[%s11528_s1 + $0x6c4] sm:$0xf]  ;;  %v5344_v39 = vor.u32 %v7251_v32, %v5343_v31  ;;  %v4911_v41 = vld [vmem:[%s11528_s1 + $0xc8] sm:$0xf] }
  0x27   :  { %1833 = vmatmul.bf16.vlgmr.msra.gmra.mxu2 %v8063_v20  ;;  %v5673_v40 = vld [vmem:[%s11528_s1 + $0x6f0] sm:$0xf0]  ;;  %v7143_v42 = vld [vmem:[%s11528_s1 + $0xf4] sm:$0xf0]  ;;  %v5295_v43 = vld [vmem:[%s11528_s1 + $0x3c8] sm:$0xf]  ;;  %v5292_v45 = vor.u32 %v7232_v36, %v5289_v37 }
  0x28   :  { %1854 = vmatpush.bf16.msrb.mxu0 %v5484_v54  ;;  %v7239_v44 = vld [vmem:[%s11528_s1 + $0x3f4] sm:$0xf0]  ;;  %v5676_v46 = vor.u32 %v7328_v38, %v5673_v40  ;;  %v4912_v47 = vor.u32 %v7143_v42, %v4911_v41  ;;  %v7220_v48 = vld [vmem:[%s11528_s1 + $0x364] sm:$0xf]  ;;  %v5241_v49 = vld [vmem:[%s11528_s1 + $0x390] sm:$0xf0] }
  0x29   :  { %1868 = vmatpush.bf16.msrb.mxu1 %v5868_v58  ;;  %1896 = vmatpush.bf16.msrb.mxu3 %v5488_v63  ;;  %v7316_v50 = vld [vmem:[%s11528_s1 + $0x664] sm:$0xf]  ;;  %v5296_v51 = vor.u32 %v7239_v44, %v5295_v43  ;;  %v5625_v52 = vld [vmem:[%s11528_s1 + $0x690] sm:$0xf0]  ;;  %v4863_v53 = vld [vmem:[%s11528_s1 + $0x68] sm:$0xf]  ;;  %v5244_v58 = vor.u32 %v7220_v48, %v5241_v49 }
  0x2a   :  { %1882 = vmatpush.bf16.msrb.mxu2 %v5104_v59  ;;  %v7131_v54 = vld [vmem:[%s11528_s1 + $0x94] sm:$0xf0]  ;;  %v5247_v55 = vld [vmem:[%s11528_s1 + $0x368] sm:$0xf]  ;;  %v7208_v59 = vld [vmem:[%s11528_s1 + $0x304] sm:$0xf]  ;;  %v5628_v61 = vor.u32 %v7316_v50, %v5625_v52 }
  0x2b   :  { %v7227_v56 = vld [vmem:[%s11528_s1 + $0x394] sm:$0xf0]  ;;  %v5193_v60 = vld [vmem:[%s11528_s1 + $0x330] sm:$0xf0]  ;;  %v4864_v62 = vor.u32 %v7131_v54, %v4863_v53  ;;  %v7304_v63 = vld [vmem:[%s11528_s1 + $0x604] sm:$0xf] }
  0x2c   :  { %1855 = vmatpush.bf16.msrb.mxu0 %v5436_v6  ;;  %v5577_v0 = vld [vmem:[%s11528_s1 + $0x630] sm:$0xf0]  ;;  %v4815_v1 = vld [vmem:[%s11528_s1 + $0x8] sm:$0xf]  ;;  %v5248_v2 = vor.u32 %v7227_v56, %v5247_v55  ;;  %v7119_v3 = vld [vmem:[%s11528_s1 + $0x34] sm:$0xf0] }
  0x2d   :  { %1869 = vmatpush.bf16.msrb.mxu1 %v5820_v9  ;;  %1897 = vmatpush.bf16.msrb.mxu3 %v5440_v14  ;;  %v5199_v4 = vld [vmem:[%s11528_s1 + $0x308] sm:$0xf]  ;;  %v7215_v6 = vld [vmem:[%s11528_s1 + $0x334] sm:$0xf0]  ;;  %v7197_v9 = vld [vmem:[%s11528_s1 + $0x2ac] sm:$0xf]  ;;  %v5580_v14 = vor.u32 %v7304_v63, %v5577_v0  ;;  %v4816_v15 = vor.u32 %v7119_v3, %v4815_v1 }
  0x2e   :  { %1883 = vmatpush.bf16.msrb.mxu2 %v5056_v10  ;;  %v5919_v7 = vld [vmem:[%s11528_s1 + $0x8a8] sm:$0xf]  ;;  %v7395_v8 = vld [vmem:[%s11528_s1 + $0x8d4] sm:$0xf0]  ;;  %v5196_v10 = vor.u32 %v7208_v59, %v5193_v60  ;;  %v5153_v11 = vld [vmem:[%s11528_s1 + $0x2d8] sm:$0xf0]  ;;  %v5200_v18 = vor.u32 %v7215_v6, %v5199_v4 }
  0x2f   :  { %v7293_v12 = vld [vmem:[%s11528_s1 + $0x5ac] sm:$0xf]  ;;  %v5537_v13 = vld [vmem:[%s11528_s1 + $0x5d8] sm:$0xf0]  ;;  %v5920_v19 = vor.u32 %v7395_v8, %v5919_v7  ;;  %v7383_v24 = vld [vmem:[%s11528_s1 + $0x874] sm:$0xf0] }
  0x30   :  { %1856 = vmatpush.bf16.msrb.mxu0 %v5388_v21  ;;  %v7389_v16 = vld [vmem:[%s11528_s1 + $0x8ac] sm:$0xf]  ;;  %v5921_v17 = vld [vmem:[%s11528_s1 + $0x8d8] sm:$0xf0]  ;;  %v5156_v21 = vor.u32 %v7197_v9, %v5153_v11  ;;  %v7371_v36 = vld [vmem:[%s11528_s1 + $0x814] sm:$0xf0] }
  0x31   :  { %1870 = vmatpush.bf16.msrb.mxu1 %v5772_v22  ;;  %1898 = vmatpush.bf16.msrb.mxu3 %v5392_v27  ;;  %v5540_v22 = vor.u32 %v7293_v12, %v5537_v13  ;;  %v7185_v25 = vld [vmem:[%s11528_s1 + $0x24c] sm:$0xf]  ;;  %v5924_v26 = vor.u32 %v7389_v16, %v5921_v17  ;;  %v5105_v27 = vld [vmem:[%s11528_s1 + $0x278] sm:$0xf0]  ;;  %v7359_v48 = vld [vmem:[%s11528_s1 + $0x7b4] sm:$0xf0] }
  0x32   :  { %1884 = vmatpush.bf16.msrb.mxu2 %v5008_v23  ;;  %v5871_v23 = vld [vmem:[%s11528_s1 + $0x848] sm:$0xf]  ;;  %v7281_v28 = vld [vmem:[%s11528_s1 + $0x54c] sm:$0xf]  ;;  %v5489_v29 = vld [vmem:[%s11528_s1 + $0x578] sm:$0xf0] }
  0x33   :  { %v7377_v30 = vld [vmem:[%s11528_s1 + $0x84c] sm:$0xf]  ;;  %v5873_v31 = vld [vmem:[%s11528_s1 + $0x878] sm:$0xf0]  ;;  %v5872_v32 = vor.u32 %v7383_v24, %v5871_v23  ;;  %v5727_v60 = vld [vmem:[%s11528_s1 + $0x728] sm:$0xf] }
  0x34   :  { %1857 = vmatpush.bf16.msrb.mxu0 %v5340_v33  ;;  %v5108_v33 = vor.u32 %v7185_v25, %v5105_v27  ;;  %v7173_v37 = vld [vmem:[%s11528_s1 + $0x1ec] sm:$0xf]  ;;  %v5876_v38 = vor.u32 %v7377_v30, %v5873_v31  ;;  %v5441_v41 = vld [vmem:[%s11528_s1 + $0x518] sm:$0xf0]  ;;  %v5679_v9 = vld [vmem:[%s11528_s1 + $0x6c8] sm:$0xf] }
  0x35   :  { %1871 = vmatpush.bf16.msrb.mxu1 %v5724_v34  ;;  %1899 = vmatpush.bf16.msrb.mxu3 %v5344_v39  ;;  %v5492_v34 = vor.u32 %v7281_v28, %v5489_v29  ;;  %v5057_v39 = vld [vmem:[%s11528_s1 + $0x218] sm:$0xf0]  ;;  %v7269_v40 = vld [vmem:[%s11528_s1 + $0x4ec] sm:$0xf]  ;;  %v7323_v23 = vld [vmem:[%s11528_s1 + $0x694] sm:$0xf0] }
  0x36   :  { %1885 = vmatpush.bf16.msrb.mxu2 %v4960_v35  ;;  %v5823_v35 = vld [vmem:[%s11528_s1 + $0x7e8] sm:$0xf]  ;;  %v7365_v42 = vld [vmem:[%s11528_s1 + $0x7ec] sm:$0xf]  ;;  %v5825_v43 = vld [vmem:[%s11528_s1 + $0x818] sm:$0xf0] }
  0x37   :  { %v5824_v44 = vor.u32 %v7371_v36, %v5823_v35  ;;  %v7161_v49 = vld [vmem:[%s11528_s1 + $0x18c] sm:$0xf]  ;;  %v5828_v50 = vor.u32 %v7365_v42, %v5825_v43  ;;  %v5393_v53 = vld [vmem:[%s11528_s1 + $0x4b8] sm:$0xf0] }
  0x38   :  { %1858 = vmatpush.bf16.msrb.mxu0 %v5292_v45  ;;  %v5060_v45 = vor.u32 %v7173_v37, %v5057_v39  ;;  %v7257_v52 = vld [vmem:[%s11528_s1 + $0x48c] sm:$0xf]  ;;  %v5777_v55 = vld [vmem:[%s11528_s1 + $0x7b8] sm:$0xf0] }
  0x39   :  { %1872 = vmatpush.bf16.msrb.mxu1 %v5676_v46  ;;  %1900 = vmatpush.bf16.msrb.mxu3 %v5296_v51  ;;  %v5444_v46 = vor.u32 %v7269_v40, %v5441_v41  ;;  %v5009_v51 = vld [vmem:[%s11528_s1 + $0x1b8] sm:$0xf0]  ;;  %v7353_v54 = vld [vmem:[%s11528_s1 + $0x78c] sm:$0xf]  ;;  %v5396_v59 = vor.u32 %v7257_v52, %v5393_v53 }
  0x3a   :  { %1886 = vmatpush.bf16.msrb.mxu2 %v4912_v47  ;;  %v5775_v47 = vld [vmem:[%s11528_s1 + $0x788] sm:$0xf]  ;;  %v5780_v63 = vor.u32 %v7353_v54, %v5777_v55  ;;  %v4961_v0 = vld [vmem:[%s11528_s1 + $0x158] sm:$0xf0]  ;;  %v7245_v1 = vld [vmem:[%s11528_s1 + $0x42c] sm:$0xf] }
  0x3b   :  { %v5776_v56 = vor.u32 %v7359_v48, %v5775_v47  ;;  %v7341_v3 = vld [vmem:[%s11528_s1 + $0x72c] sm:$0xf]  ;;  %v5729_v4 = vld [vmem:[%s11528_s1 + $0x758] sm:$0xf0] }
  0x3c   :  { %1859 = vmatpush.bf16.msrb.mxu0 %v5244_v58  ;;  %v5012_v58 = vor.u32 %v7161_v49, %v5009_v51  ;;  %v7137_v11 = vld [vmem:[%s11528_s1 + $0xcc] sm:$0xf]  ;;  %v5732_v12 = vor.u32 %v7341_v3, %v5729_v4  ;;  %v4913_v13 = vld [vmem:[%s11528_s1 + $0xf8] sm:$0xf0] }
  0x3d   :  { %1873 = vmatpush.bf16.msrb.mxu1 %v5628_v61  ;;  %1901 = vmatpush.bf16.msrb.mxu3 %v5248_v2  ;;  %v7347_v61 = vld [vmem:[%s11528_s1 + $0x754] sm:$0xf0]  ;;  %v5345_v2 = vld [vmem:[%s11528_s1 + $0x458] sm:$0xf0]  ;;  %v7329_v16 = vld [vmem:[%s11528_s1 + $0x6cc] sm:$0xf] }
  0x3e   :  { %1887 = vmatpush.bf16.msrb.mxu2 %v4864_v62  ;;  %v7149_v62 = vld [vmem:[%s11528_s1 + $0x12c] sm:$0xf]  ;;  %v5728_v6 = vor.u32 %v7347_v61, %v5727_v60  ;;  %v5348_v8 = vor.u32 %v7245_v1, %v5345_v2  ;;  %v5681_v17 = vld [vmem:[%s11528_s1 + $0x6f8] sm:$0xf0] }
  0x3f   :  { %v4964_v7 = vor.u32 %v7149_v62, %v4961_v0  ;;  %v7125_v24 = vld [vmem:[%s11528_s1 + $0x6c] sm:$0xf]  ;;  %v5684_v25 = vor.u32 %v7329_v16, %v5681_v17  ;;  %v5249_v28 = vld [vmem:[%s11528_s1 + $0x398] sm:$0xf0] }
  0x40   :  { %1860 = vmatpush.bf16.msrb.mxu0 %v5196_v10  ;;  %v7335_v10 = vld [vmem:[%s11528_s1 + $0x6f4] sm:$0xf0]  ;;  %v7221_v27 = vld [vmem:[%s11528_s1 + $0x36c] sm:$0xf]  ;;  %v5633_v30 = vld [vmem:[%s11528_s1 + $0x698] sm:$0xf0] }
  0x41   :  { %1874 = vmatpush.bf16.msrb.mxu1 %v5580_v14  ;;  %1902 = vmatpush.bf16.msrb.mxu3 %v5200_v18  ;;  %v7233_v14 = vld [vmem:[%s11528_s1 + $0x3cc] sm:$0xf]  ;;  %v5680_v18 = vor.u32 %v7335_v10, %v5679_v9 }
  0x42   :  { %1888 = vmatpush.bf16.msrb.mxu2 %v4816_v15  ;;  %v5297_v15 = vld [vmem:[%s11528_s1 + $0x3f8] sm:$0xf0]  ;;  %v7317_v29 = vld [vmem:[%s11528_s1 + $0x66c] sm:$0xf] }
  0x43   :  { %1861 = vmatmul.bf16.vlgmr.msrb.gmra.mxu0 %v8029_v5 }
  0x44   :  { %1909 = vmatpush.bf16.msra.mxu0 %v5920_v19  ;;  %1875 = vmatmul.bf16.vlgmr.msrb.gmra.mxu1 %v8063_v20  ;;  %v4916_v19 = vor.u32 %v7137_v11, %v4913_v13 }
  0x45   :  { %1923 = vmatpush.bf16.msra.mxu1 %v5156_v21  ;;  %1951 = vmatpush.bf16.msra.mxu3 %v5924_v26  ;;  %v5300_v21 = vor.u32 %v7233_v14, %v5297_v15  ;;  %v4865_v26 = vld [vmem:[%s11528_s1 + $0x98] sm:$0xf0] }
  0x46   :  { %1937 = vmatpush.bf16.msra.mxu2 %v5540_v22  ;;  %1903 = vmatmul.bf16.vlgmr.msrb.gmra.mxu3 %v8029_v5  ;;  %v5631_v22 = vld [vmem:[%s11528_s1 + $0x668] sm:$0xf] }
  0x47   :  { %1889 = vmatmul.bf16.vlgmr.msrb.gmra.mxu2 %v8002_v57 }
  0x48   :  { %1910 = vmatpush.bf16.msra.mxu0 %v5872_v32 }
  0x49   :  { %1924 = vmatpush.bf16.msra.mxu1 %v5108_v33  ;;  %1952 = vmatpush.bf16.msra.mxu3 %v5876_v38 }
  0x4a   :  { %1938 = vmatpush.bf16.msra.mxu2 %v5492_v34 }
  0x4c   :  { %1911 = vmatpush.bf16.msra.mxu0 %v5824_v44 }
  0x4d   :  { %1925 = vmatpush.bf16.msra.mxu1 %v5060_v45  ;;  %1953 = vmatpush.bf16.msra.mxu3 %v5828_v50 }
  0x4e   :  { %1939 = vmatpush.bf16.msra.mxu2 %v5444_v46 }
  0x50   :  { %1912 = vmatpush.bf16.msra.mxu0 %v5776_v56 }
  0x51   :  { %1926 = vmatpush.bf16.msra.mxu1 %v5012_v58  ;;  %1954 = vmatpush.bf16.msra.mxu3 %v5780_v63 }
  0x52   :  { %1940 = vmatpush.bf16.msra.mxu2 %v5396_v59 }
  0x54   :  { %1913 = vmatpush.bf16.msra.mxu0 %v5728_v6 }
  0x55   :  { %1927 = vmatpush.bf16.msra.mxu1 %v4964_v7  ;;  %1955 = vmatpush.bf16.msra.mxu3 %v5732_v12 }
  0x56   :  { %1941 = vmatpush.bf16.msra.mxu2 %v5348_v8 }
  0x57   :  { %10 = vsyncpa [#allocation3], 0  ;;  %v5632_v31 = vor.u32 %v7323_v23, %v5631_v22  ;;  %v5583_v32 = vld [vmem:[%s11528_s1 + $0x608] sm:$0xf]  ;;  %v7311_v33 = vld [vmem:[%s11528_s1 + $0x634] sm:$0xf0]  ;;  %v4868_v34 = vor.u32 %v7125_v24, %v4865_v26  ;;  %v5252_v35 = vor.u32 %v7221_v27, %v5249_v28  ;;  %v5636_v39 = vor.u32 %v7317_v29, %v5633_v30 }
  0x58   :  { %1914 = vmatpush.bf16.msra.mxu0 %v5680_v18  ;;  %v7113_v36 = vld [vmem:[%s11528_s1 + $0xc] sm:$0xf]  ;;  %v4817_v37 = vld [vmem:[%s11528_s1 + $0x38] sm:$0xf0]  ;;  %v5159_v43 = vld [vmem:[%s11528_s1 + $0x2b0] sm:$0xf]  ;;  %v5584_v46 = vor.u32 %v7311_v33, %v5583_v32 }
  0x59   :  { %1928 = vmatpush.bf16.msra.mxu1 %v4916_v19  ;;  %v7209_v38 = vld [vmem:[%s11528_s1 + $0x30c] sm:$0xf]  ;;  %1956 = vmatpush.bf16.msra.mxu3 %v5684_v25  ;;  %v5201_v40 = vld [vmem:[%s11528_s1 + $0x338] sm:$0xf0]  ;;  %v7204_v44 = vld [vmem:[%s11528_s1 + $0x2dc] sm:$0xf0]  ;;  %v4820_v50 = vor.u32 %v7113_v36, %v4817_v37 }
  0x5a   :  { %1942 = vmatpush.bf16.msra.mxu2 %v5300_v21  ;;  %v7305_v41 = vld [vmem:[%s11528_s1 + $0x60c] sm:$0xf]  ;;  %v5585_v42 = vld [vmem:[%s11528_s1 + $0x638] sm:$0xf0]  ;;  %v5543_v45 = vld [vmem:[%s11528_s1 + $0x5b0] sm:$0xf]  ;;  %v5204_v51 = vor.u32 %v7209_v38, %v5201_v40  ;;  %v5160_v55 = vor.u32 %v7204_v44, %v5159_v43 }
  0x5b   :  { %v7300_v47 = vld [vmem:[%s11528_s1 + $0x5dc] sm:$0xf0]  ;;  %v5927_v48 = vld [vmem:[%s11528_s1 + $0x8b0] sm:$0xf]  ;;  %v7198_v52 = vld [vmem:[%s11528_s1 + $0x2b4] sm:$0xf]  ;;  %v5588_v54 = vor.u32 %v7305_v41, %v5585_v42 }
  0x5c   :  { %1915 = vmatpush.bf16.msra.mxu0 %v5632_v31  ;;  %v7396_v49 = vld [vmem:[%s11528_s1 + $0x8dc] sm:$0xf0]  ;;  %v5161_v53 = vld [vmem:[%s11528_s1 + $0x2e0] sm:$0xf0]  ;;  %v5544_v56 = vor.u32 %v7300_v47, %v5543_v45  ;;  %v5111_v59 = vld [vmem:[%s11528_s1 + $0x250] sm:$0xf] }
  0x5d   :  { %1929 = vmatpush.bf16.msra.mxu1 %v4868_v34  ;;  %1957 = vmatpush.bf16.msra.mxu3 %v5636_v39  ;;  %v5928_v58 = vor.u32 %v7396_v49, %v5927_v48  ;;  %v7192_v60 = vld [vmem:[%s11528_s1 + $0x27c] sm:$0xf0]  ;;  %v5495_v61 = vld [vmem:[%s11528_s1 + $0x550] sm:$0xf]  ;;  %v5164_v62 = vor.u32 %v7198_v52, %v5161_v53  ;;  %v7186_v2 = vld [vmem:[%s11528_s1 + $0x254] sm:$0xf] }
  0x5e   :  { %1943 = vmatpush.bf16.msra.mxu2 %v5252_v35  ;;  %v7288_v63 = vld [vmem:[%s11528_s1 + $0x57c] sm:$0xf0]  ;;  %v5879_v0 = vld [vmem:[%s11528_s1 + $0x850] sm:$0xf]  ;;  %v5113_v3 = vld [vmem:[%s11528_s1 + $0x280] sm:$0xf0]  ;;  %v5112_v4 = vor.u32 %v7192_v60, %v5111_v59 }
  0x5f   :  { %v7384_v1 = vld [vmem:[%s11528_s1 + $0x87c] sm:$0xf0]  ;;  %v5496_v6 = vor.u32 %v7288_v63, %v5495_v61  ;;  %v5063_v8 = vld [vmem:[%s11528_s1 + $0x1f0] sm:$0xf]  ;;  %v5116_v11 = vor.u32 %v7186_v2, %v5113_v3  ;;  %v7174_v15 = vld [vmem:[%s11528_s1 + $0x1f4] sm:$0xf] }
  0x60   :  { %1916 = vmatpush.bf16.msra.mxu0 %v5584_v46  ;;  %v5880_v7 = vor.u32 %v7384_v1, %v5879_v0  ;;  %v7180_v9 = vld [vmem:[%s11528_s1 + $0x21c] sm:$0xf0]  ;;  %v5447_v10 = vld [vmem:[%s11528_s1 + $0x4f0] sm:$0xf]  ;;  %v5065_v16 = vld [vmem:[%s11528_s1 + $0x220] sm:$0xf0] }
  0x61   :  { %1930 = vmatpush.bf16.msra.mxu1 %v4820_v50  ;;  %1958 = vmatpush.bf16.msra.mxu3 %v5588_v54  ;;  %v7276_v12 = vld [vmem:[%s11528_s1 + $0x51c] sm:$0xf0]  ;;  %v5831_v13 = vld [vmem:[%s11528_s1 + $0x7f0] sm:$0xf]  ;;  %v5064_v17 = vor.u32 %v7180_v9, %v5063_v8  ;;  %v5068_v24 = vor.u32 %v7174_v15, %v5065_v16  ;;  %v7162_v28 = vld [vmem:[%s11528_s1 + $0x194] sm:$0xf] }
  0x62   :  { %1944 = vmatpush.bf16.msra.mxu2 %v5204_v51  ;;  %v7372_v14 = vld [vmem:[%s11528_s1 + $0x81c] sm:$0xf0]  ;;  %v5448_v18 = vor.u32 %v7276_v12, %v5447_v10  ;;  %v5015_v21 = vld [vmem:[%s11528_s1 + $0x190] sm:$0xf]  ;;  %v5017_v29 = vld [vmem:[%s11528_s1 + $0x1c0] sm:$0xf0] }
  0x63   :  { %1917 = vmatmul.bf16.vlgmr.msra.gmra.mxu0 %v8063_v20  ;;  %v5832_v19 = vor.u32 %v7372_v14, %v5831_v13  ;;  %v7168_v22 = vld [vmem:[%s11528_s1 + $0x1bc] sm:$0xf0]  ;;  %v5399_v23 = vld [vmem:[%s11528_s1 + $0x490] sm:$0xf]  ;;  %v5020_v36 = vor.u32 %v7162_v28, %v5017_v29  ;;  %v7150_v40 = vld [vmem:[%s11528_s1 + $0x134] sm:$0xf] }
  0x64   :  { %1965 = vmatpush.bf16.msrb.mxu0 %v5160_v55  ;;  %1959 = vmatmul.bf16.vlgmr.msra.gmra.mxu3 %v8063_v20  ;;  %v7264_v25 = vld [vmem:[%s11528_s1 + $0x4bc] sm:$0xf0]  ;;  %v5783_v26 = vld [vmem:[%s11528_s1 + $0x790] sm:$0xf]  ;;  %v5016_v30 = vor.u32 %v7168_v22, %v5015_v21  ;;  %v4969_v41 = vld [vmem:[%s11528_s1 + $0x160] sm:$0xf0] }
  0x65   :  { %1979 = vmatpush.bf16.msrb.mxu1 %v5544_v56  ;;  %2007 = vmatpush.bf16.msrb.mxu3 %v5164_v62  ;;  %v7360_v27 = vld [vmem:[%s11528_s1 + $0x7bc] sm:$0xf0]  ;;  %v5400_v31 = vor.u32 %v7264_v25, %v5399_v23  ;;  %v4967_v33 = vld [vmem:[%s11528_s1 + $0x130] sm:$0xf]  ;;  %v4972_v48 = vor.u32 %v7150_v40, %v4969_v41  ;;  %v7138_v52 = vld [vmem:[%s11528_s1 + $0xd4] sm:$0xf] }
  0x66   :  { %1993 = vmatpush.bf16.msrb.mxu2 %v5928_v58  ;;  %1931 = vmatmul.bf16.vlgmr.msra.gmra.mxu1 %v8002_v57  ;;  %v5784_v32 = vor.u32 %v7360_v27, %v5783_v26  ;;  %v7156_v34 = vld [vmem:[%s11528_s1 + $0x15c] sm:$0xf0]  ;;  %v5351_v35 = vld [vmem:[%s11528_s1 + $0x430] sm:$0xf]  ;;  %v4921_v53 = vld [vmem:[%s11528_s1 + $0x100] sm:$0xf0] }
  0x67   :  { %1945 = vmatmul.bf16.vlgmr.msra.gmra.mxu2 %v8029_v5  ;;  %v7252_v37 = vld [vmem:[%s11528_s1 + $0x45c] sm:$0xf0]  ;;  %v5735_v38 = vld [vmem:[%s11528_s1 + $0x730] sm:$0xf]  ;;  %v4968_v42 = vor.u32 %v7156_v34, %v4967_v33  ;;  %v4924_v61 = vor.u32 %v7138_v52, %v4921_v53  ;;  %v7126_v1 = vld [vmem:[%s11528_s1 + $0x74] sm:$0xf] }
  0x68   :  { %1966 = vmatpush.bf16.msrb.mxu0 %v5112_v4  ;;  %v7348_v39 = vld [vmem:[%s11528_s1 + $0x75c] sm:$0xf0]  ;;  %v5352_v43 = vor.u32 %v7252_v37, %v5351_v35  ;;  %v4919_v45 = vld [vmem:[%s11528_s1 + $0xd0] sm:$0xf]  ;;  %v4873_v2 = vld [vmem:[%s11528_s1 + $0xa0] sm:$0xf0] }
  0x69   :  { %1980 = vmatpush.bf16.msrb.mxu1 %v5496_v6  ;;  %2008 = vmatpush.bf16.msrb.mxu3 %v5116_v11  ;;  %v5736_v44 = vor.u32 %v7348_v39, %v5735_v38  ;;  %v7144_v46 = vld [vmem:[%s11528_s1 + $0xfc] sm:$0xf0]  ;;  %v5303_v47 = vld [vmem:[%s11528_s1 + $0x3d0] sm:$0xf]  ;;  %v4876_v12 = vor.u32 %v7126_v1, %v4873_v2  ;;  %v7114_v14 = vld [vmem:[%s11528_s1 + $0x14] sm:$0xf] }
  0x6a   :  { %1994 = vmatpush.bf16.msrb.mxu2 %v5880_v7  ;;  %v7240_v49 = vld [vmem:[%s11528_s1 + $0x3fc] sm:$0xf0]  ;;  %v5687_v50 = vld [vmem:[%s11528_s1 + $0x6d0] sm:$0xf]  ;;  %v4920_v54 = vor.u32 %v7144_v46, %v4919_v45  ;;  %v4825_v15 = vld [vmem:[%s11528_s1 + $0x40] sm:$0xf0] }
  0x6b   :  { %v7336_v51 = vld [vmem:[%s11528_s1 + $0x6fc] sm:$0xf0]  ;;  %v5304_v55 = vor.u32 %v7240_v49, %v5303_v47  ;;  %v4871_v58 = vld [vmem:[%s11528_s1 + $0x70] sm:$0xf]  ;;  %v7294_v16 = vld [vmem:[%s11528_s1 + $0x5b4] sm:$0xf]  ;;  %v4828_v28 = vor.u32 %v7114_v14, %v4825_v15 }
  0x6c   :  { %1967 = vmatpush.bf16.msrb.mxu0 %v5064_v17  ;;  %v5688_v56 = vor.u32 %v7336_v51, %v5687_v50  ;;  %v7132_v59 = vld [vmem:[%s11528_s1 + $0x9c] sm:$0xf0]  ;;  %v5255_v60 = vld [vmem:[%s11528_s1 + $0x370] sm:$0xf]  ;;  %v5545_v17 = vld [vmem:[%s11528_s1 + $0x5e0] sm:$0xf0] }
  0x6d   :  { %1981 = vmatpush.bf16.msrb.mxu1 %v5448_v18  ;;  %2009 = vmatpush.bf16.msrb.mxu3 %v5068_v24  ;;  %v7228_v62 = vld [vmem:[%s11528_s1 + $0x39c] sm:$0xf0]  ;;  %v5639_v63 = vld [vmem:[%s11528_s1 + $0x670] sm:$0xf]  ;;  %v4872_v3 = vor.u32 %v7132_v59, %v4871_v58  ;;  %v7390_v18 = vld [vmem:[%s11528_s1 + $0x8b4] sm:$0xf]  ;;  %v5548_v29 = vor.u32 %v7294_v16, %v5545_v17 }
  0x6e   :  { %1995 = vmatpush.bf16.msrb.mxu2 %v5832_v19  ;;  %v7324_v0 = vld [vmem:[%s11528_s1 + $0x69c] sm:$0xf0]  ;;  %v4823_v4 = vld [vmem:[%s11528_s1 + $0x10] sm:$0xf]  ;;  %v5256_v7 = vor.u32 %v7228_v62, %v5255_v60  ;;  %v5929_v21 = vld [vmem:[%s11528_s1 + $0x8e0] sm:$0xf0] }
  0x6f   :  { %v7120_v6 = vld [vmem:[%s11528_s1 + $0x3c] sm:$0xf0]  ;;  %v5640_v8 = vor.u32 %v7324_v0, %v5639_v63  ;;  %v5207_v9 = vld [vmem:[%s11528_s1 + $0x310] sm:$0xf]  ;;  %v5167_v22 = vld [vmem:[%s11528_s1 + $0x2b8] sm:$0xf] }
  0x70   :  { %1968 = vmatpush.bf16.msrb.mxu0 %v5016_v30  ;;  %v7216_v10 = vld [vmem:[%s11528_s1 + $0x33c] sm:$0xf0]  ;;  %v5591_v11 = vld [vmem:[%s11528_s1 + $0x610] sm:$0xf]  ;;  %v4824_v19 = vor.u32 %v7120_v6, %v4823_v4  ;;  %v7205_v23 = vld [vmem:[%s11528_s1 + $0x2e4] sm:$0xf0]  ;;  %v5932_v30 = vor.u32 %v7390_v18, %v5929_v21 }
  0x71   :  { %1982 = vmatpush.bf16.msrb.mxu1 %v5400_v31  ;;  %2010 = vmatpush.bf16.msrb.mxu3 %v5020_v36  ;;  %v7312_v13 = vld [vmem:[%s11528_s1 + $0x63c] sm:$0xf0]  ;;  %v5208_v24 = vor.u32 %v7216_v10, %v5207_v9  ;;  %v5551_v26 = vld [vmem:[%s11528_s1 + $0x5b8] sm:$0xf]  ;;  %v7301_v27 = vld [vmem:[%s11528_s1 + $0x5e4] sm:$0xf0]  ;;  %v5168_v31 = vor.u32 %v7205_v23, %v5167_v22 }
  0x72   :  { %1996 = vmatpush.bf16.msrb.mxu2 %v5784_v32  ;;  %v5592_v25 = vor.u32 %v7312_v13, %v5591_v11  ;;  %v7282_v32 = vld [vmem:[%s11528_s1 + $0x554] sm:$0xf]  ;;  %v5497_v33 = vld [vmem:[%s11528_s1 + $0x580] sm:$0xf0]  ;;  %v5552_v35 = vor.u32 %v7301_v27, %v5551_v26  ;;  %v5119_v37 = vld [vmem:[%s11528_s1 + $0x258] sm:$0xf] }
  0x73   :  { %v7378_v34 = vld [vmem:[%s11528_s1 + $0x854] sm:$0xf]  ;;  %v5881_v36 = vld [vmem:[%s11528_s1 + $0x880] sm:$0xf0]  ;;  %v7193_v38 = vld [vmem:[%s11528_s1 + $0x284] sm:$0xf0]  ;;  %v5500_v41 = vor.u32 %v7282_v32, %v5497_v33 }
  0x74   :  { %1969 = vmatpush.bf16.msrb.mxu0 %v4968_v42  ;;  %v5503_v39 = vld [vmem:[%s11528_s1 + $0x558] sm:$0xf]  ;;  %v7289_v40 = vld [vmem:[%s11528_s1 + $0x584] sm:$0xf0]  ;;  %v5884_v42 = vor.u32 %v7378_v34, %v5881_v36  ;;  %v5449_v45 = vld [vmem:[%s11528_s1 + $0x520] sm:$0xf0] }
  0x75   :  { %1983 = vmatpush.bf16.msrb.mxu1 %v5352_v43  ;;  %2011 = vmatpush.bf16.msrb.mxu3 %v4972_v48  ;;  %v5120_v43 = vor.u32 %v7193_v38, %v5119_v37  ;;  %v7366_v46 = vld [vmem:[%s11528_s1 + $0x7f4] sm:$0xf]  ;;  %v5504_v47 = vor.u32 %v7289_v40, %v5503_v39  ;;  %v5833_v48 = vld [vmem:[%s11528_s1 + $0x820] sm:$0xf0]  ;;  %v5071_v49 = vld [vmem:[%s11528_s1 + $0x1f8] sm:$0xf] }
  0x76   :  { %1997 = vmatpush.bf16.msrb.mxu2 %v5736_v44  ;;  %v7270_v44 = vld [vmem:[%s11528_s1 + $0x4f4] sm:$0xf]  ;;  %v7181_v50 = vld [vmem:[%s11528_s1 + $0x224] sm:$0xf0]  ;;  %v5455_v51 = vld [vmem:[%s11528_s1 + $0x4f8] sm:$0xf] }
  0x77   :  { %v7277_v52 = vld [vmem:[%s11528_s1 + $0x524] sm:$0xf0]  ;;  %v5452_v53 = vor.u32 %v7270_v44, %v5449_v45  ;;  %v5401_v58 = vld [vmem:[%s11528_s1 + $0x4c0] sm:$0xf0]  ;;  %v7354_v59 = vld [vmem:[%s11528_s1 + $0x794] sm:$0xf] }
  0x78   :  { %1970 = vmatpush.bf16.msrb.mxu0 %v4920_v54  ;;  %v5836_v54 = vor.u32 %v7366_v46, %v5833_v48  ;;  %v5456_v60 = vor.u32 %v7277_v52, %v5455_v51  ;;  %v5023_v62 = vld [vmem:[%s11528_s1 + $0x198] sm:$0xf]  ;;  %v7169_v63 = vld [vmem:[%s11528_s1 + $0x1c4] sm:$0xf0]  ;;  %v7246_v6 = vld [vmem:[%s11528_s1 + $0x434] sm:$0xf] }
  0x79   :  { %1984 = vmatpush.bf16.msrb.mxu1 %v5304_v55  ;;  %2012 = vmatpush.bf16.msrb.mxu3 %v4924_v61  ;;  %v5072_v55 = vor.u32 %v7181_v50, %v5071_v49  ;;  %v5785_v61 = vld [vmem:[%s11528_s1 + $0x7c0] sm:$0xf0]  ;;  %v5407_v0 = vld [vmem:[%s11528_s1 + $0x498] sm:$0xf]  ;;  %v7265_v1 = vld [vmem:[%s11528_s1 + $0x4c4] sm:$0xf0]  ;;  %v5024_v4 = vor.u32 %v7169_v63, %v5023_v62 }
  0x7a   :  { %1998 = vmatpush.bf16.msrb.mxu2 %v5688_v56  ;;  %v7258_v56 = vld [vmem:[%s11528_s1 + $0x494] sm:$0xf]  ;;  %v5408_v9 = vor.u32 %v7265_v1, %v5407_v0  ;;  %v5737_v10 = vld [vmem:[%s11528_s1 + $0x760] sm:$0xf0]  ;;  %v4975_v11 = vld [vmem:[%s11528_s1 + $0x138] sm:$0xf] }
  0x7b   :  { %v5404_v2 = vor.u32 %v7258_v56, %v5401_v58  ;;  %v5359_v13 = vld [vmem:[%s11528_s1 + $0x438] sm:$0xf]  ;;  %v7253_v14 = vld [vmem:[%s11528_s1 + $0x464] sm:$0xf0]  ;;  %v7234_v18 = vld [vmem:[%s11528_s1 + $0x3d4] sm:$0xf] }
  0x7c   :  { %1971 = vmatpush.bf16.msrb.mxu0 %v4872_v3  ;;  %v5788_v3 = vor.u32 %v7354_v59, %v5785_v61  ;;  %v7330_v21 = vld [vmem:[%s11528_s1 + $0x6d4] sm:$0xf]  ;;  %v5360_v22 = vor.u32 %v7253_v14, %v5359_v13  ;;  %v5689_v23 = vld [vmem:[%s11528_s1 + $0x700] sm:$0xf0]  ;;  %v5311_v26 = vld [vmem:[%s11528_s1 + $0x3d8] sm:$0xf] }
  0x7d   :  { %1985 = vmatpush.bf16.msrb.mxu1 %v5256_v7  ;;  %2013 = vmatpush.bf16.msrb.mxu3 %v4876_v12  ;;  %v5353_v7 = vld [vmem:[%s11528_s1 + $0x460] sm:$0xf0]  ;;  %v7157_v12 = vld [vmem:[%s11528_s1 + $0x164] sm:$0xf0]  ;;  %v7318_v33 = vld [vmem:[%s11528_s1 + $0x674] sm:$0xf] }
  0x7e   :  { %1999 = vmatpush.bf16.msrb.mxu2 %v5640_v8  ;;  %v7342_v8 = vld [vmem:[%s11528_s1 + $0x734] sm:$0xf]  ;;  %v5356_v15 = vor.u32 %v7246_v6, %v5353_v7  ;;  %v4976_v17 = vor.u32 %v7157_v12, %v4975_v11  ;;  %v7241_v27 = vld [vmem:[%s11528_s1 + $0x404] sm:$0xf0]  ;;  %v5257_v32 = vld [vmem:[%s11528_s1 + $0x3a0] sm:$0xf0] }
  0x7f   :  { %v5740_v16 = vor.u32 %v7342_v8, %v5737_v10  ;;  %v5312_v34 = vor.u32 %v7241_v27, %v5311_v26  ;;  %v4879_v36 = vld [vmem:[%s11528_s1 + $0x78] sm:$0xf]  ;;  %v7133_v37 = vld [vmem:[%s11528_s1 + $0xa4] sm:$0xf0]  ;;  %v7306_v45 = vld [vmem:[%s11528_s1 + $0x614] sm:$0xf] }
  0x80   :  { %1972 = vmatpush.bf16.msrb.mxu0 %v4824_v19  ;;  %v5305_v19 = vld [vmem:[%s11528_s1 + $0x400] sm:$0xf0]  ;;  %v5263_v38 = vld [vmem:[%s11528_s1 + $0x378] sm:$0xf]  ;;  %v7229_v39 = vld [vmem:[%s11528_s1 + $0x3a4] sm:$0xf0]  ;;  %v4880_v44 = vor.u32 %v7133_v37, %v4879_v36 }
  0x81   :  { %1986 = vmatpush.bf16.msrb.mxu1 %v5208_v24  ;;  %2014 = vmatpush.bf16.msrb.mxu3 %v4828_v28  ;;  %v4927_v24 = vld [vmem:[%s11528_s1 + $0xd8] sm:$0xf]  ;;  %v5308_v28 = vor.u32 %v7234_v18, %v5305_v19  ;;  %v5593_v46 = vld [vmem:[%s11528_s1 + $0x640] sm:$0xf0]  ;;  %v5264_v48 = vor.u32 %v7229_v39, %v5263_v38  ;;  %v7121_v49 = vld [vmem:[%s11528_s1 + $0x44] sm:$0xf0] }
  0x82   :  { %2000 = vmatpush.bf16.msrb.mxu2 %v5592_v25  ;;  %v7145_v25 = vld [vmem:[%s11528_s1 + $0x104] sm:$0xf0]  ;;  %v5215_v50 = vld [vmem:[%s11528_s1 + $0x318] sm:$0xf]  ;;  %v5169_v56 = vld [vmem:[%s11528_s1 + $0x2e8] sm:$0xf0] }
  0x83   :  { %1973 = vmatmul.bf16.vlgmr.msrb.gmra.mxu0 %v8002_v57  ;;  %v7217_v51 = vld [vmem:[%s11528_s1 + $0x344] sm:$0xf0]  ;;  %v5935_v52 = vld [vmem:[%s11528_s1 + $0x8b8] sm:$0xf]  ;;  %v7295_v58 = vld [vmem:[%s11528_s1 + $0x5bc] sm:$0xf] }
  0x84   :  { %2021 = vmatpush.bf16.msra.mxu0 %v5548_v29  ;;  %1987 = vmatmul.bf16.vlgmr.msrb.gmra.mxu1 %v8029_v5  ;;  %v5692_v29 = vor.u32 %v7330_v21, %v5689_v23  ;;  %v5553_v59 = vld [vmem:[%s11528_s1 + $0x5e8] sm:$0xf0]  ;;  %v7391_v62 = vld [vmem:[%s11528_s1 + $0x8bc] sm:$0xf]  ;;  %v5216_v0 = vor.u32 %v7217_v51, %v5215_v50  ;;  %v7385_v6 = vld [vmem:[%s11528_s1 + $0x884] sm:$0xf0] }
  0x85   :  { %2035 = vmatpush.bf16.msra.mxu1 %v5932_v30  ;;  %2063 = vmatpush.bf16.msra.mxu3 %v5552_v35  ;;  %v4928_v30 = vor.u32 %v7145_v25, %v4927_v24  ;;  %v5641_v35 = vld [vmem:[%s11528_s1 + $0x6a0] sm:$0xf0]  ;;  %v5937_v63 = vld [vmem:[%s11528_s1 + $0x8e8] sm:$0xf0]  ;;  %v7187_v7 = vld [vmem:[%s11528_s1 + $0x25c] sm:$0xf] }
  0x86   :  { %2049 = vmatpush.bf16.msra.mxu2 %v5168_v31  ;;  %2015 = vmatmul.bf16.vlgmr.msrb.gmra.mxu3 %v8002_v57  ;;  %v7222_v31 = vld [vmem:[%s11528_s1 + $0x374] sm:$0xf]  ;;  %v5940_v8 = vor.u32 %v7391_v62, %v5937_v63  ;;  %v7283_v10 = vld [vmem:[%s11528_s1 + $0x55c] sm:$0xf]  ;;  %v5505_v11 = vld [vmem:[%s11528_s1 + $0x588] sm:$0xf0] }
  0x87   :  { %2001 = vmatmul.bf16.vlgmr.msrb.gmra.mxu2 %v8063_v20  ;;  %v5260_v40 = vor.u32 %v7222_v31, %v5257_v32  ;;  %v7379_v12 = vld [vmem:[%s11528_s1 + $0x85c] sm:$0xf]  ;;  %v5889_v13 = vld [vmem:[%s11528_s1 + $0x888] sm:$0xf0]  ;;  %v7373_v18 = vld [vmem:[%s11528_s1 + $0x824] sm:$0xf0] }
  0x88   :  { %2022 = vmatpush.bf16.msra.mxu0 %v5500_v41  ;;  %v7210_v41 = vld [vmem:[%s11528_s1 + $0x314] sm:$0xf]  ;;  %v7175_v19 = vld [vmem:[%s11528_s1 + $0x1fc] sm:$0xf]  ;;  %v5892_v21 = vor.u32 %v7379_v12, %v5889_v13  ;;  %v5457_v24 = vld [vmem:[%s11528_s1 + $0x528] sm:$0xf0] }
  0x89   :  { %2036 = vmatpush.bf16.msra.mxu1 %v5884_v42  ;;  %2064 = vmatpush.bf16.msra.mxu3 %v5504_v47  ;;  %v5209_v42 = vld [vmem:[%s11528_s1 + $0x340] sm:$0xf0]  ;;  %v4831_v47 = vld [vmem:[%s11528_s1 + $0x18] sm:$0xf]  ;;  %v7271_v23 = vld [vmem:[%s11528_s1 + $0x4fc] sm:$0xf] }
  0x8a   :  { %2050 = vmatpush.bf16.msra.mxu2 %v5120_v43  ;;  %v5644_v43 = vor.u32 %v7318_v33, %v5641_v35  ;;  %v4832_v61 = vor.u32 %v7121_v49, %v4831_v47  ;;  %v7367_v25 = vld [vmem:[%s11528_s1 + $0x7fc] sm:$0xf]  ;;  %v5841_v26 = vld [vmem:[%s11528_s1 + $0x828] sm:$0xf0]  ;;  %v7361_v31 = vld [vmem:[%s11528_s1 + $0x7c4] sm:$0xf0] }
  0x8b   :  { %v7163_v32 = vld [vmem:[%s11528_s1 + $0x19c] sm:$0xf]  ;;  %v5844_v33 = vor.u32 %v7367_v25, %v5841_v26  ;;  %v5409_v36 = vld [vmem:[%s11528_s1 + $0x4c8] sm:$0xf0]  ;;  %v5175_v26 = vld [vmem:[%s11528_s1 + $0x2c0] sm:$0xf] }
  0x8c   :  { %2023 = vmatpush.bf16.msra.mxu0 %v5452_v53  ;;  %v7397_v53 = vld [vmem:[%s11528_s1 + $0x8e4] sm:$0xf0]  ;;  %v7259_v35 = vld [vmem:[%s11528_s1 + $0x49c] sm:$0xf]  ;;  %v5793_v38 = vld [vmem:[%s11528_s1 + $0x7c8] sm:$0xf0] }
  0x8d   :  { %2037 = vmatpush.bf16.msra.mxu1 %v5836_v54  ;;  %2065 = vmatpush.bf16.msra.mxu3 %v5456_v60  ;;  %v7199_v54 = vld [vmem:[%s11528_s1 + $0x2bc] sm:$0xf]  ;;  %v5596_v60 = vor.u32 %v7306_v45, %v5593_v46  ;;  %v5936_v1 = vor.u32 %v7397_v53, %v5935_v52  ;;  %v4977_v46 = vld [vmem:[%s11528_s1 + $0x168] sm:$0xf0]  ;;  %s4781_s11 = sshll.u32 %s11532_s5, 4  ;;  %s7718_s12 = smov 384   ;;  %s4782_s11 = int_to_ptr.hbm [resolvable:$true] %s4781_s11 }
  0x8e   :  { %2051 = vmatpush.bf16.msra.mxu2 %v5072_v55  ;;  %v5212_v55 = vor.u32 %v7210_v41, %v5209_v42  ;;  %v7355_v37 = vld [vmem:[%s11528_s1 + $0x79c] sm:$0xf]  ;;  %v5412_v41 = vor.u32 %v7259_v35, %v5409_v36  ;;  %v5743_v42 = vld [vmem:[%s11528_s1 + $0x738] sm:$0xf]  ;;  %v5745_v50 = vld [vmem:[%s11528_s1 + $0x768] sm:$0xf0] }
  0x8f   :  { %v5796_v45 = vor.u32 %v7355_v37, %v5793_v38  ;;  %v7247_v47 = vld [vmem:[%s11528_s1 + $0x43c] sm:$0xf]  ;;  %v5697_v63 = vld [vmem:[%s11528_s1 + $0x708] sm:$0xf0]  ;;  %v7200_v35 = vld [vmem:[%s11528_s1 + $0x2c4] sm:$0xf] }
  0x90   :  { %2024 = vmatpush.bf16.msra.mxu0 %v5404_v2  ;;  %v5172_v2 = vor.u32 %v7199_v54, %v5169_v56  ;;  %v7343_v49 = vld [vmem:[%s11528_s1 + $0x73c] sm:$0xf]  ;;  %v5695_v54 = vld [vmem:[%s11528_s1 + $0x6d8] sm:$0xf]  ;;  %v5649_v12 = vld [vmem:[%s11528_s1 + $0x6a8] sm:$0xf0] }
  0x91   :  { %2038 = vmatpush.bf16.msra.mxu1 %v5788_v3  ;;  %2066 = vmatpush.bf16.msra.mxu3 %v5408_v9  ;;  %v5556_v3 = vor.u32 %v7295_v58, %v5553_v59  ;;  %v5121_v9 = vld [vmem:[%s11528_s1 + $0x288] sm:$0xf0]  ;;  %v7139_v56 = vld [vmem:[%s11528_s1 + $0xdc] sm:$0xf]  ;;  %v5748_v58 = vor.u32 %v7343_v49, %v5745_v50  ;;  %v5177_v36 = vld [vmem:[%s11528_s1 + $0x2f0] sm:$0xf0] }
  0x92   :  { %2052 = vmatpush.bf16.msra.mxu2 %v5024_v4  ;;  %v5887_v4 = vld [vmem:[%s11528_s1 + $0x858] sm:$0xf]  ;;  %v4929_v59 = vld [vmem:[%s11528_s1 + $0x108] sm:$0xf0]  ;;  %v7331_v62 = vld [vmem:[%s11528_s1 + $0x6dc] sm:$0xf] }
  0x93   :  { %v5888_v14 = vor.u32 %v7385_v6, %v5887_v4  ;;  %v7325_v4 = vld [vmem:[%s11528_s1 + $0x6a4] sm:$0xf0]  ;;  %v7127_v6 = vld [vmem:[%s11528_s1 + $0x7c] sm:$0xf]  ;;  %v5601_v25 = vld [vmem:[%s11528_s1 + $0x648] sm:$0xf0] }
  0x94   :  { %2025 = vmatpush.bf16.msra.mxu0 %v5356_v15  ;;  %v5124_v15 = vor.u32 %v7187_v7, %v5121_v9  ;;  %v5700_v7 = vor.u32 %v7331_v62, %v5697_v63  ;;  %v7223_v9 = vld [vmem:[%s11528_s1 + $0x37c] sm:$0xf]  ;;  %v5129_v49 = vld [vmem:[%s11528_s1 + $0x290] sm:$0xf0]  ;;  %s7719_s13 = smov 24  }
  0x95   :  { %2039 = vmatpush.bf16.msra.mxu1 %v5740_v16  ;;  %2067 = vmatpush.bf16.msra.mxu3 %v5360_v22  ;;  %v5508_v16 = vor.u32 %v7283_v10, %v5505_v11  ;;  %v5073_v22 = vld [vmem:[%s11528_s1 + $0x228] sm:$0xf0]  ;;  %v7319_v11 = vld [vmem:[%s11528_s1 + $0x67c] sm:$0xf]  ;;  %v5081_v62 = vld [vmem:[%s11528_s1 + $0x230] sm:$0xf0] }
  0x96   :  { %2053 = vmatpush.bf16.msra.mxu2 %v4976_v17  ;;  %v5839_v17 = vld [vmem:[%s11528_s1 + $0x7f8] sm:$0xf]  ;;  %v5265_v10 = vld [vmem:[%s11528_s1 + $0x3a8] sm:$0xf0] }
  0x97   :  { %v5840_v27 = vor.u32 %v7373_v18, %v5839_v17  ;;  %v5268_v17 = vor.u32 %v7223_v9, %v5265_v10  ;;  %v7115_v18 = vld [vmem:[%s11528_s1 + $0x1c] sm:$0xf]  ;;  %v7362_v9 = vld [vmem:[%s11528_s1 + $0x7cc] sm:$0xf0]  ;;  %v7164_v10 = vld [vmem:[%s11528_s1 + $0x1a4] sm:$0xf] }
  0x98   :  { %2026 = vmatpush.bf16.msra.mxu0 %v5308_v28  ;;  %v5076_v28 = vor.u32 %v7175_v19, %v5073_v22  ;;  %v4833_v19 = vld [vmem:[%s11528_s1 + $0x48] sm:$0xf0]  ;;  %v5652_v22 = vor.u32 %v7319_v11, %v5649_v12  ;;  %v5033_v11 = vld [vmem:[%s11528_s1 + $0x1d0] sm:$0xf0] }
  0x99   :  { %2040 = vmatpush.bf16.msra.mxu1 %v5692_v29  ;;  %2068 = vmatpush.bf16.msra.mxu3 %v5312_v34  ;;  %v5460_v29 = vor.u32 %v7271_v23, %v5457_v24  ;;  %v5025_v34 = vld [vmem:[%s11528_s1 + $0x1c8] sm:$0xf0]  ;;  %v7307_v24 = vld [vmem:[%s11528_s1 + $0x61c] sm:$0xf] }
  0x9a   :  { %2054 = vmatpush.bf16.msra.mxu2 %v4928_v30  ;;  %v5791_v30 = vld [vmem:[%s11528_s1 + $0x798] sm:$0xf]  ;;  %v5217_v23 = vld [vmem:[%s11528_s1 + $0x348] sm:$0xf0]  ;;  %v5604_v37 = vor.u32 %v7307_v24, %v5601_v25  ;;  %v4985_v24 = vld [vmem:[%s11528_s1 + $0x170] sm:$0xf0] }
  0x9b   :  { %v5792_v39 = vor.u32 %v7361_v31, %v5791_v30  ;;  %v7302_v30 = vld [vmem:[%s11528_s1 + $0x5ec] sm:$0xf0]  ;;  %v5943_v31 = vld [vmem:[%s11528_s1 + $0x8c0] sm:$0xf] }
  0x9c   :  { %2027 = vmatpush.bf16.msra.mxu0 %v5260_v40  ;;  %v5028_v40 = vor.u32 %v7163_v32, %v5025_v34  ;;  %v7398_v32 = vld [vmem:[%s11528_s1 + $0x8ec] sm:$0xf0] }
  0x9d   :  { %2041 = vmatpush.bf16.msra.mxu1 %v5644_v43  ;;  %2069 = vmatpush.bf16.msra.mxu3 %v5264_v48  ;;  %v7349_v43 = vld [vmem:[%s11528_s1 + $0x764] sm:$0xf0]  ;;  %v5361_v48 = vld [vmem:[%s11528_s1 + $0x468] sm:$0xf0] }
  0x9e   :  { %2055 = vmatpush.bf16.msra.mxu2 %v4880_v44  ;;  %v7151_v44 = vld [vmem:[%s11528_s1 + $0x13c] sm:$0xf]  ;;  %v5744_v51 = vor.u32 %v7349_v43, %v5743_v42  ;;  %v5364_v53 = vor.u32 %v7247_v47, %v5361_v48  ;;  %v7194_v42 = vld [vmem:[%s11528_s1 + $0x28c] sm:$0xf0]  ;;  %v5511_v43 = vld [vmem:[%s11528_s1 + $0x560] sm:$0xf] }
  0x9f   :  { %v4980_v52 = vor.u32 %v7151_v44, %v4977_v46  ;;  %v5180_v44 = vor.u32 %v7200_v35, %v5177_v36  ;;  %v5895_v46 = vld [vmem:[%s11528_s1 + $0x860] sm:$0xf]  ;;  %v7386_v47 = vld [vmem:[%s11528_s1 + $0x88c] sm:$0xf0]  ;;  %v7188_v48 = vld [vmem:[%s11528_s1 + $0x264] sm:$0xf] }
  0xa0   :  { %2028 = vmatpush.bf16.msra.mxu0 %v5212_v55  ;;  %v7337_v55 = vld [vmem:[%s11528_s1 + $0x704] sm:$0xf0]  ;;  %v7140_v35 = vld [vmem:[%s11528_s1 + $0xe4] sm:$0xf]  ;;  %v4937_v36 = vld [vmem:[%s11528_s1 + $0x110] sm:$0xf0] }
  0xa1   :  { %2042 = vmatpush.bf16.msra.mxu1 %v5596_v60  ;;  %2070 = vmatpush.bf16.msra.mxu3 %v5216_v0  ;;  %v7235_v60 = vld [vmem:[%s11528_s1 + $0x3dc] sm:$0xf]  ;;  %v5696_v0 = vor.u32 %v7337_v55, %v5695_v54  ;;  %v7182_v54 = vld [vmem:[%s11528_s1 + $0x22c] sm:$0xf0]  ;;  %v5463_v55 = vld [vmem:[%s11528_s1 + $0x500] sm:$0xf] }
  0xa2   :  { %2056 = vmatpush.bf16.msra.mxu2 %v4832_v61  ;;  %v5313_v61 = vld [vmem:[%s11528_s1 + $0x408] sm:$0xf0] }
  0xa3   :  { %2029 = vmatmul.bf16.vlgmr.msra.gmra.mxu0 %v8029_v5 }
  0xa4   :  { %2077 = vmatpush.bf16.msrb.mxu0 %v5936_v1  ;;  %2043 = vmatmul.bf16.vlgmr.msra.gmra.mxu1 %v8063_v20  ;;  %v4932_v1 = vor.u32 %v7139_v56, %v4929_v59  ;;  %v5132_v56 = vor.u32 %v7188_v48, %v5129_v49  ;;  %v5847_v59 = vld [vmem:[%s11528_s1 + $0x800] sm:$0xf]  ;;  %v4889_v48 = vld [vmem:[%s11528_s1 + $0xb0] sm:$0xf0] }
  0xa5   :  { %2091 = vmatpush.bf16.msrb.mxu1 %v5172_v2  ;;  %2119 = vmatpush.bf16.msrb.mxu3 %v5940_v8  ;;  %v5316_v2 = vor.u32 %v7235_v60, %v5313_v61  ;;  %v4881_v8 = vld [vmem:[%s11528_s1 + $0xa8] sm:$0xf0]  ;;  %v7374_v60 = vld [vmem:[%s11528_s1 + $0x82c] sm:$0xf0]  ;;  %v7176_v61 = vld [vmem:[%s11528_s1 + $0x204] sm:$0xf] }
  0xa6   :  { %2105 = vmatpush.bf16.msrb.mxu2 %v5556_v3  ;;  %2071 = vmatmul.bf16.vlgmr.msra.gmra.mxu3 %v8029_v5  ;;  %v5647_v3 = vld [vmem:[%s11528_s1 + $0x678] sm:$0xf] }
  0xa7   :  { %2057 = vmatmul.bf16.vlgmr.msra.gmra.mxu2 %v8002_v57  ;;  %v5648_v13 = vor.u32 %v7325_v4, %v5647_v3  ;;  %v7170_v3 = vld [vmem:[%s11528_s1 + $0x1cc] sm:$0xf0]  ;;  %v5415_v4 = vld [vmem:[%s11528_s1 + $0x4a0] sm:$0xf] }
  0xa8   :  { %2078 = vmatpush.bf16.msrb.mxu0 %v5888_v14  ;;  %v5599_v14 = vld [vmem:[%s11528_s1 + $0x618] sm:$0xf] }
  0xa9   :  { %2092 = vmatpush.bf16.msrb.mxu1 %v5124_v15  ;;  %2120 = vmatpush.bf16.msrb.mxu3 %v5892_v21  ;;  %v7313_v15 = vld [vmem:[%s11528_s1 + $0x644] sm:$0xf0]  ;;  %v7211_v21 = vld [vmem:[%s11528_s1 + $0x31c] sm:$0xf] }
  0xaa   :  { %2106 = vmatpush.bf16.msrb.mxu2 %v5508_v16  ;;  %v4884_v16 = vor.u32 %v7127_v6, %v4881_v8  ;;  %v5220_v34 = vor.u32 %v7211_v21, %v5217_v23  ;;  %v5084_v6 = vor.u32 %v7176_v61, %v5081_v62  ;;  %v5799_v8 = vld [vmem:[%s11528_s1 + $0x7a0] sm:$0xf]  ;;  %v7152_v23 = vld [vmem:[%s11528_s1 + $0x144] sm:$0xf]  ;;  %v4841_v61 = vld [vmem:[%s11528_s1 + $0x50] sm:$0xf0] }
  0xab   :  { %v5751_v21 = vld [vmem:[%s11528_s1 + $0x740] sm:$0xf]  ;;  %v7296_v62 = vld [vmem:[%s11528_s1 + $0x5c4] sm:$0xf] }
  0xac   :  { %2079 = vmatpush.bf16.msrb.mxu0 %v5840_v27  ;;  %v7206_v27 = vld [vmem:[%s11528_s1 + $0x2ec] sm:$0xf0] }
  0xad   :  { %2093 = vmatpush.bf16.msrb.mxu1 %v5076_v28  ;;  %2121 = vmatpush.bf16.msrb.mxu3 %v5844_v33  ;;  %v5559_v28 = vld [vmem:[%s11528_s1 + $0x5c0] sm:$0xf]  ;;  %v4836_v33 = vor.u32 %v7115_v18, %v4833_v19  ;;  %v5176_v38 = vor.u32 %v7206_v27, %v5175_v26  ;;  %v5036_v18 = vor.u32 %v7164_v10, %v5033_v11  ;;  %v7254_v19 = vld [vmem:[%s11528_s1 + $0x46c] sm:$0xf0] }
  0xae   :  { %2107 = vmatpush.bf16.msrb.mxu2 %v5460_v29  ;;  %v5600_v29 = vor.u32 %v7313_v15, %v5599_v14  ;;  %v5800_v14 = vor.u32 %v7362_v9, %v5799_v8  ;;  %v4983_v15 = vld [vmem:[%s11528_s1 + $0x140] sm:$0xf]  ;;  %v5567_v8 = vld [vmem:[%s11528_s1 + $0x5c8] sm:$0xf]  ;;  %v7303_v9 = vld [vmem:[%s11528_s1 + $0x5f4] sm:$0xf0] }
  0xb0   :  { %2080 = vmatpush.bf16.msrb.mxu0 %v5792_v39  ;;  %v5560_v39 = vor.u32 %v7302_v30, %v5559_v28  ;;  %v4935_v28 = vld [vmem:[%s11528_s1 + $0xe0] sm:$0xf] }
  0xb1   :  { %2094 = vmatpush.bf16.msrb.mxu1 %v5028_v40  ;;  %2122 = vmatpush.bf16.msrb.mxu3 %v5796_v45  ;;  %v5944_v40 = vor.u32 %v7398_v32, %v5943_v31  ;;  %v7290_v45 = vld [vmem:[%s11528_s1 + $0x58c] sm:$0xf0]  ;;  %v5319_v30 = vld [vmem:[%s11528_s1 + $0x3e0] sm:$0xf]  ;;  %v4988_v31 = vor.u32 %v7152_v23, %v4985_v24  ;;  %v7291_v23 = vld [vmem:[%s11528_s1 + $0x594] sm:$0xf0] }
  0xb2   :  { %2108 = vmatpush.bf16.msrb.mxu2 %v5412_v41  ;;  %v5127_v41 = vld [vmem:[%s11528_s1 + $0x260] sm:$0xf]  ;;  %v7242_v32 = vld [vmem:[%s11528_s1 + $0x40c] sm:$0xf0] }
  0xb3   :  { %v5128_v50 = vor.u32 %v7194_v42, %v5127_v41  ;;  %v7134_v41 = vld [vmem:[%s11528_s1 + $0xac] sm:$0xf0]  ;;  %v5271_v42 = vld [vmem:[%s11528_s1 + $0x380] sm:$0xf] }
  0xb4   :  { %2081 = vmatpush.bf16.msrb.mxu0 %v5744_v51  ;;  %v5512_v51 = vor.u32 %v7290_v45, %v5511_v43  ;;  %v4940_v43 = vor.u32 %v7140_v35, %v4937_v36  ;;  %v5655_v45 = vld [vmem:[%s11528_s1 + $0x680] sm:$0xf]  ;;  %v7279_v35 = vld [vmem:[%s11528_s1 + $0x534] sm:$0xf0] }
  0xb5   :  { %2095 = vmatpush.bf16.msrb.mxu1 %v4980_v52  ;;  %2123 = vmatpush.bf16.msrb.mxu3 %v5748_v58  ;;  %v5896_v52 = vor.u32 %v7386_v47, %v5895_v46  ;;  %v7278_v58 = vld [vmem:[%s11528_s1 + $0x52c] sm:$0xf0]  ;;  %v7128_v47 = vld [vmem:[%s11528_s1 + $0x84] sm:$0xf] }
  0xb6   :  { %2109 = vmatpush.bf16.msrb.mxu2 %v5364_v53  ;;  %v5079_v53 = vld [vmem:[%s11528_s1 + $0x200] sm:$0xf]  ;;  %v7326_v46 = vld [vmem:[%s11528_s1 + $0x6ac] sm:$0xf0] }
  0xb7   :  { %v5080_v63 = vor.u32 %v7182_v54, %v5079_v53  ;;  %v5656_v53 = vor.u32 %v7326_v46, %v5655_v45  ;;  %v5223_v54 = vld [vmem:[%s11528_s1 + $0x320] sm:$0xf]  ;;  %v5801_v45 = vld [vmem:[%s11528_s1 + $0x7d0] sm:$0xf0]  ;;  %v5039_v46 = vld [vmem:[%s11528_s1 + $0x1a8] sm:$0xf] }
  0xb8   :  { %2082 = vmatpush.bf16.msrb.mxu0 %v5696_v0  ;;  %v5464_v0 = vor.u32 %v7278_v58, %v5463_v55  ;;  %v7218_v55 = vld [vmem:[%s11528_s1 + $0x34c] sm:$0xf0]  ;;  %v4892_v58 = vor.u32 %v7128_v47, %v4889_v48  ;;  %v7171_v47 = vld [vmem:[%s11528_s1 + $0x1d4] sm:$0xf0]  ;;  %v5423_v48 = vld [vmem:[%s11528_s1 + $0x4a8] sm:$0xf] }
  0xb9   :  { %2096 = vmatpush.bf16.msrb.mxu1 %v4932_v1  ;;  %2124 = vmatpush.bf16.msrb.mxu3 %v5700_v7  ;;  %v5848_v1 = vor.u32 %v7374_v60, %v5847_v59  ;;  %v7266_v7 = vld [vmem:[%s11528_s1 + $0x4cc] sm:$0xf0]  ;;  %v7116_v60 = vld [vmem:[%s11528_s1 + $0x24] sm:$0xf] }
  0xba   :  { %2110 = vmatpush.bf16.msrb.mxu2 %v5316_v2  ;;  %v5031_v2 = vld [vmem:[%s11528_s1 + $0x1a0] sm:$0xf]  ;;  %v7314_v59 = vld [vmem:[%s11528_s1 + $0x64c] sm:$0xf0]  ;;  %v4844_v10 = vor.u32 %v7116_v60, %v4841_v61  ;;  %v7159_v60 = vld [vmem:[%s11528_s1 + $0x174] sm:$0xf0] }
  0xbb   :  { %v5032_v12 = vor.u32 %v7170_v3, %v5031_v2  ;;  %v5945_v2 = vld [vmem:[%s11528_s1 + $0x8f0] sm:$0xf0]  ;;  %v5183_v3 = vld [vmem:[%s11528_s1 + $0x2c8] sm:$0xf] }
  0xbc   :  { %2083 = vmatpush.bf16.msrb.mxu0 %v5648_v13  ;;  %v5416_v13 = vor.u32 %v7266_v7, %v5415_v4  ;;  %v7207_v4 = vld [vmem:[%s11528_s1 + $0x2f4] sm:$0xf0]  ;;  %v5375_v61 = vld [vmem:[%s11528_s1 + $0x448] sm:$0xf] }
  0xbd   :  { %2097 = vmatpush.bf16.msrb.mxu1 %v4884_v16  ;;  %2125 = vmatpush.bf16.msrb.mxu3 %v5652_v22  ;;  %v7158_v16 = vld [vmem:[%s11528_s1 + $0x16c] sm:$0xf0] }
  0xbe   :  { %2111 = vmatpush.bf16.msrb.mxu2 %v5268_v17  ;;  %v5367_v17 = vld [vmem:[%s11528_s1 + $0x440] sm:$0xf]  ;;  %v7350_v22 = vld [vmem:[%s11528_s1 + $0x76c] sm:$0xf0]  ;;  %v4984_v25 = vor.u32 %v7158_v16, %v4983_v15  ;;  %v5513_v15 = vld [vmem:[%s11528_s1 + $0x590] sm:$0xf0] }
  0xbf   :  { %v5368_v26 = vor.u32 %v7254_v19, %v5367_v17  ;;  %v5752_v27 = vor.u32 %v7350_v22, %v5751_v21  ;;  %v7380_v16 = vld [vmem:[%s11528_s1 + $0x864] sm:$0xf]  ;;  %v5568_v17 = vor.u32 %v7303_v9, %v5567_v8  ;;  %v5135_v19 = vld [vmem:[%s11528_s1 + $0x268] sm:$0xf]  ;;  %v7195_v21 = vld [vmem:[%s11528_s1 + $0x294] sm:$0xf0] }
  0xc0   :  { %2084 = vmatpush.bf16.msrb.mxu0 %v5600_v29  ;;  %v7146_v29 = vld [vmem:[%s11528_s1 + $0x10c] sm:$0xf0]  ;;  %v5519_v22 = vld [vmem:[%s11528_s1 + $0x568] sm:$0xf]  ;;  %v5705_v9 = vld [vmem:[%s11528_s1 + $0x710] sm:$0xf0] }
  0xc1   :  { %2098 = vmatpush.bf16.msrb.mxu1 %v4836_v33  ;;  %2126 = vmatpush.bf16.msrb.mxu3 %v5604_v37  ;;  %v5703_v33 = vld [vmem:[%s11528_s1 + $0x6e0] sm:$0xf]  ;;  %v4936_v37 = vor.u32 %v7146_v29, %v4935_v28  ;;  %v5465_v28 = vld [vmem:[%s11528_s1 + $0x530] sm:$0xf0]  ;;  %v7368_v29 = vld [vmem:[%s11528_s1 + $0x804] sm:$0xf] }
  0xc2   :  { %2112 = vmatpush.bf16.msrb.mxu2 %v5220_v34  ;;  %v7338_v34 = vld [vmem:[%s11528_s1 + $0x70c] sm:$0xf0] }
  0xc3   :  { %2085 = vmatmul.bf16.vlgmr.msrb.gmra.mxu0 %v8063_v20 }
  0xc4   :  { %2133 = vmatpush.bf16.msra.mxu0 %v5176_v38  ;;  %2127 = vmatmul.bf16.vlgmr.msrb.gmra.mxu3 %v8063_v20  ;;  %v5320_v38 = vor.u32 %v7242_v32, %v5319_v30  ;;  %v5520_v30 = vor.u32 %v7291_v23, %v5519_v22  ;;  %v5087_v32 = vld [vmem:[%s11528_s1 + $0x208] sm:$0xf]  ;;  %v7320_v22 = vld [vmem:[%s11528_s1 + $0x684] sm:$0xf] }
  0xc5   :  { %2147 = vmatpush.bf16.msra.mxu1 %v5560_v39  ;;  %2175 = vmatpush.bf16.msra.mxu3 %v5180_v44  ;;  %v5704_v39 = vor.u32 %v7338_v34, %v5703_v33  ;;  %v7230_v44 = vld [vmem:[%s11528_s1 + $0x3ac] sm:$0xf0]  ;;  %v7183_v33 = vld [vmem:[%s11528_s1 + $0x234] sm:$0xf0]  ;;  %v5471_v34 = vld [vmem:[%s11528_s1 + $0x508] sm:$0xf] }
  0xc6   :  { %2161 = vmatpush.bf16.msra.mxu2 %v5944_v40  ;;  %2099 = vmatmul.bf16.vlgmr.msrb.gmra.mxu1 %v8002_v57  ;;  %v4887_v40 = vld [vmem:[%s11528_s1 + $0x80] sm:$0xf] }
  0xc7   :  { %2113 = vmatmul.bf16.vlgmr.msrb.gmra.mxu2 %v8029_v5  ;;  %v4888_v49 = vor.u32 %v7134_v41, %v4887_v40  ;;  %v5088_v40 = vor.u32 %v7183_v33, %v5087_v32  ;;  %v7260_v41 = vld [vmem:[%s11528_s1 + $0x4a4] sm:$0xf] }
  0xc8   :  { %2134 = vmatpush.bf16.msra.mxu0 %v5128_v50  ;;  %v4839_v50 = vld [vmem:[%s11528_s1 + $0x20] sm:$0xf] }
  0xc9   :  { %2148 = vmatpush.bf16.msra.mxu1 %v5512_v51  ;;  %2176 = vmatpush.bf16.msra.mxu3 %v5132_v56  ;;  %v7122_v51 = vld [vmem:[%s11528_s1 + $0x4c] sm:$0xf0]  ;;  %v5607_v56 = vld [vmem:[%s11528_s1 + $0x620] sm:$0xf] }
  0xca   :  { %2162 = vmatpush.bf16.msra.mxu2 %v5896_v52  ;;  %v5272_v52 = vor.u32 %v7230_v44, %v5271_v42  ;;  %v5608_v7 = vor.u32 %v7314_v59, %v5607_v56  ;;  %v5417_v42 = vld [vmem:[%s11528_s1 + $0x4d0] sm:$0xf0]  ;;  %v5472_v44 = vor.u32 %v7279_v35, %v5471_v34  ;;  %v4991_v59 = vld [vmem:[%s11528_s1 + $0x148] sm:$0xf]  ;;  %v7308_v34 = vld [vmem:[%s11528_s1 + $0x624] sm:$0xf] }
  0xcb   :  { %v5609_v35 = vld [vmem:[%s11528_s1 + $0x650] sm:$0xf0] }
  0xcc   :  { %2135 = vmatpush.bf16.msra.mxu0 %v5080_v63  ;;  %v5561_v63 = vld [vmem:[%s11528_s1 + $0x5f0] sm:$0xf0] }
  0xcd   :  { %2149 = vmatpush.bf16.msra.mxu1 %v5464_v0  ;;  %2177 = vmatpush.bf16.msra.mxu3 %v5084_v6  ;;  %v7392_v0 = vld [vmem:[%s11528_s1 + $0x8c4] sm:$0xf]  ;;  %v5224_v6 = vor.u32 %v7218_v55, %v5223_v54  ;;  %v5564_v11 = vor.u32 %v7296_v62, %v5561_v63  ;;  %v5369_v54 = vld [vmem:[%s11528_s1 + $0x470] sm:$0xf0]  ;;  %v7255_v62 = vld [vmem:[%s11528_s1 + $0x474] sm:$0xf0]  ;;  %v9270_v63 = vpop.f32.mrf.mxu2 }
  0xce   :  { %2163 = vmatpush.bf16.msra.mxu2 %v5848_v1  ;;  %v4840_v1 = vor.u32 %v7122_v51, %v4839_v50  ;;  %v5420_v50 = vor.u32 %v7260_v41, %v5417_v42  ;;  %v7344_v55 = vld [vmem:[%s11528_s1 + $0x744] sm:$0xf]  ;;  %v5376_v8 = vor.u32 %v7255_v62, %v5375_v61  ;;  %v7123_v42 = vld [vmem:[%s11528_s1 + $0x54] sm:$0xf0] }
  0xd0   :  { %2136 = vmatpush.bf16.msra.mxu0 %v5032_v12  ;;  %v5948_v12 = vor.u32 %v7392_v0, %v5945_v2  ;;  %v9272_v0 = vpop.f32.mrf.mxu3 }
  0xd1   :  { %2150 = vmatpush.bf16.msra.mxu1 %v5416_v13  ;;  %2178 = vmatpush.bf16.msra.mxu3 %v5036_v18  ;;  %v5184_v13 = vor.u32 %v7207_v4, %v5183_v3  ;;  %v5897_v18 = vld [vmem:[%s11528_s1 + $0x890] sm:$0xf0]  ;;  %v4992_v3 = vor.u32 %v7159_v60, %v4991_v59  ;;  %v7236_v4 = vld [vmem:[%s11528_s1 + $0x3e4] sm:$0xf] }
  0xd2   :  { %2164 = vmatpush.bf16.msra.mxu2 %v5800_v14  ;;  %v7284_v14 = vld [vmem:[%s11528_s1 + $0x564] sm:$0xf] }
  0xd3   :  { %v5516_v24 = vor.u32 %v7284_v14, %v5513_v15  ;;  %v5327_v14 = vld [vmem:[%s11528_s1 + $0x3e8] sm:$0xf]  ;;  %v7243_v15 = vld [vmem:[%s11528_s1 + $0x414] sm:$0xf0] }
  0xd4   :  { %2137 = vmatpush.bf16.msra.mxu0 %v4984_v25  ;;  %v5900_v25 = vor.u32 %v7380_v16, %v5897_v18  ;;  %v5328_v23 = vor.u32 %v7243_v15, %v5327_v14 }
  0xd5   :  { %2151 = vmatpush.bf16.msra.mxu1 %v5368_v26  ;;  %2179 = vmatpush.bf16.msra.mxu3 %v4988_v31  ;;  %v5136_v26 = vor.u32 %v7195_v21, %v5135_v19  ;;  %v5849_v31 = vld [vmem:[%s11528_s1 + $0x830] sm:$0xf0]  ;;  %v7224_v19 = vld [vmem:[%s11528_s1 + $0x384] sm:$0xf] }
  0xd6   :  { %2165 = vmatpush.bf16.msra.mxu2 %v5752_v27  ;;  %v7272_v27 = vld [vmem:[%s11528_s1 + $0x504] sm:$0xf]  ;;  %v5273_v21 = vld [vmem:[%s11528_s1 + $0x3b0] sm:$0xf0] }
  0xd7   :  { %v5468_v36 = vor.u32 %v7272_v27, %v5465_v28  ;;  %v5279_v27 = vld [vmem:[%s11528_s1 + $0x388] sm:$0xf]  ;;  %v7231_v28 = vld [vmem:[%s11528_s1 + $0x3b4] sm:$0xf0] }
  0xd8   :  { %2138 = vmatpush.bf16.msra.mxu0 %v4936_v37  ;;  %v9218_v37 = vpop.f32.mrf.mxu0  ;;  %v5280_v41 = vor.u32 %v7231_v28, %v5279_v27  ;;  %v5857_v27 = vld [vmem:[%s11528_s1 + $0x838] sm:$0xf0] }
  0xd9   :  { %2152 = vmatpush.bf16.msra.mxu1 %v5320_v38  ;;  %2180 = vmatpush.bf16.msra.mxu3 %v4940_v43  ;;  %v9220_v38 = vpop.f32.mrf.mxu1  ;;  %v7356_v43 = vld [vmem:[%s11528_s1 + $0x7a4] sm:$0xf] }
  0xda   :  { %2166 = vmatpush.bf16.msra.mxu2 %v5704_v39  ;;  %v5852_v39 = vor.u32 %v7368_v29, %v5849_v31  ;;  %v5804_v51 = vor.u32 %v7356_v43, %v5801_v45  ;;  %v5276_v29 = vor.u32 %v7224_v19, %v5273_v21  ;;  %v5225_v31 = vld [vmem:[%s11528_s1 + $0x350] sm:$0xf0]  ;;  %v5231_v43 = vld [vmem:[%s11528_s1 + $0x328] sm:$0xf]  ;;  %v7375_v19 = vld [vmem:[%s11528_s1 + $0x834] sm:$0xf0] }
  0xdb   :  { %v5951_v45 = vld [vmem:[%s11528_s1 + $0x8c8] sm:$0xf]  ;;  %v7177_v21 = vld [vmem:[%s11528_s1 + $0x20c] sm:$0xf] }
  0xdc   :  { %2139 = vmatpush.bf16.msra.mxu0 %v4888_v49  ;;  %v7267_v49 = vld [vmem:[%s11528_s1 + $0x4d4] sm:$0xf0] }
  0xdd   :  { %2153 = vmatpush.bf16.msra.mxu1 %v5272_v52  ;;  %2181 = vmatpush.bf16.msra.mxu3 %v4892_v58  ;;  %v5040_v52 = vor.u32 %v7171_v47, %v5039_v46  ;;  %v5424_v56 = vor.u32 %v7267_v49, %v5423_v48  ;;  %v5753_v58 = vld [vmem:[%s11528_s1 + $0x770] sm:$0xf0]  ;;  %v7399_v46 = vld [vmem:[%s11528_s1 + $0x8f4] sm:$0xf0]  ;;  %v7201_v47 = vld [vmem:[%s11528_s1 + $0x2cc] sm:$0xf] }
  0xde   :  { %2167 = vmatpush.bf16.msra.mxu2 %v5656_v53  ;;  %v7248_v53 = vld [vmem:[%s11528_s1 + $0x444] sm:$0xf]  ;;  %v5756_v2 = vor.u32 %v7344_v55, %v5753_v58  ;;  %v5185_v49 = vld [vmem:[%s11528_s1 + $0x2f8] sm:$0xf0]  ;;  %v5952_v60 = vor.u32 %v7399_v46, %v5951_v45 }
  0xdf   :  { %v5953_v58 = vld [vmem:[%s11528_s1 + $0x8f8] sm:$0xf0]  ;;  %v5188_v61 = vor.u32 %v7201_v47, %v5185_v49  ;;  %v5759_v49 = vld [vmem:[%s11528_s1 + $0x748] sm:$0xf] }
  0xe0   :  { %2140 = vmatpush.bf16.msra.mxu0 %v4840_v1  ;;  %v5372_v1 = vor.u32 %v7248_v53, %v5369_v54  ;;  %v5612_v54 = vor.u32 %v7308_v34, %v5609_v35  ;;  %v7363_v34 = vld [vmem:[%s11528_s1 + $0x7d4] sm:$0xf0]  ;;  %v7165_v35 = vld [vmem:[%s11528_s1 + $0x1ac] sm:$0xf]  ;;  %v5809_v45 = vld [vmem:[%s11528_s1 + $0x7d8] sm:$0xf0] }
  0xe1   :  { %2154 = vmatpush.bf16.msra.mxu1 %v5224_v6  ;;  %2182 = vmatpush.bf16.msra.mxu3 %v4844_v10  ;;  %v5321_v6 = vld [vmem:[%s11528_s1 + $0x410] sm:$0xf0]  ;;  %v4943_v10 = vld [vmem:[%s11528_s1 + $0xe8] sm:$0xf] }
  0xe2   :  { %2168 = vmatpush.bf16.msra.mxu2 %v5608_v7  ;;  %v7332_v7 = vld [vmem:[%s11528_s1 + $0x6e4] sm:$0xf]  ;;  %v5324_v16 = vor.u32 %v7236_v4, %v5321_v6  ;;  %v5137_v6 = vld [vmem:[%s11528_s1 + $0x298] sm:$0xf0] }
  0xe3   :  { %2141 = vmatmul.bf16.vlgmr.msra.gmra.mxu0 %v8002_v57 }
  0xe4   :  { %2189 = vmatpush.bf16.msrb.mxu0 %v5564_v11  ;;  %2155 = vmatmul.bf16.vlgmr.msra.gmra.mxu1 %v8029_v5  ;;  %v7147_v11 = vld [vmem:[%s11528_s1 + $0x114] sm:$0xf0] }
  0xe5   :  { %2203 = vmatpush.bf16.msrb.mxu1 %v5948_v12  ;;  %2231 = vmatpush.bf16.msrb.mxu3 %v5568_v17  ;;  %v9292_v12 = vpop.f32.mrf.mxu0  ;;  %v5708_v17 = vor.u32 %v7332_v7, %v5705_v9  ;;  %v4944_v18 = vor.u32 %v7147_v11, %v4943_v10  ;;  %v7285_v7 = vld [vmem:[%s11528_s1 + $0x56c] sm:$0xf]  ;;  %v5905_v10 = vld [vmem:[%s11528_s1 + $0x898] sm:$0xf0] }
  0xe6   :  { %2217 = vmatpush.bf16.msrb.mxu2 %v5184_v13  ;;  %2183 = vmatmul.bf16.vlgmr.msra.gmra.mxu3 %v8002_v57  ;;  %v9294_v13 = vpop.f32.mrf.mxu1  ;;  %v7381_v9 = vld [vmem:[%s11528_s1 + $0x86c] sm:$0xf] }
  0xe7   :  { %2169 = vmatmul.bf16.vlgmr.msra.gmra.mxu2 %v8063_v20 }
  0xe8   :  { %2190 = vmatpush.bf16.msrb.mxu0 %v5516_v24  ;;  %v5657_v24 = vld [vmem:[%s11528_s1 + $0x6b0] sm:$0xf0] }
  0xe9   :  { %2204 = vmatpush.bf16.msrb.mxu1 %v5900_v25  ;;  %2232 = vmatpush.bf16.msrb.mxu3 %v5520_v30  ;;  %v4895_v25 = vld [vmem:[%s11528_s1 + $0x88] sm:$0xf]  ;;  %v7212_v30 = vld [vmem:[%s11528_s1 + $0x324] sm:$0xf]  ;;  %v5660_v32 = vor.u32 %v7320_v22, %v5657_v24  ;;  %v5908_v22 = vor.u32 %v7381_v9, %v5905_v10  ;;  %v7273_v24 = vld [vmem:[%s11528_s1 + $0x50c] sm:$0xf] }
  0xea   :  { %2218 = vmatpush.bf16.msrb.mxu2 %v5136_v26  ;;  %v7135_v26 = vld [vmem:[%s11528_s1 + $0xb4] sm:$0xf0]  ;;  %v5228_v48 = vor.u32 %v7212_v30, %v5225_v31  ;;  %v7141_v9 = vld [vmem:[%s11528_s1 + $0xec] sm:$0xf] }
  0xeb   :  { %v4896_v33 = vor.u32 %v7135_v26, %v4895_v25  ;;  %v5473_v25 = vld [vmem:[%s11528_s1 + $0x538] sm:$0xf0]  ;;  %v7369_v26 = vld [vmem:[%s11528_s1 + $0x80c] sm:$0xf] }
  0xec   :  { %2191 = vmatpush.bf16.msrb.mxu0 %v5468_v36  ;;  %v4847_v36 = vld [vmem:[%s11528_s1 + $0x28] sm:$0xf] }
  0xed   :  { %2205 = vmatpush.bf16.msrb.mxu1 %v5852_v39  ;;  %2233 = vmatpush.bf16.msrb.mxu3 %v5472_v44  ;;  %v9341_v39 = vpop.f32.mrf.mxu2  ;;  %v7219_v44 = vld [vmem:[%s11528_s1 + $0x354] sm:$0xf0]  ;;  %v4848_v55 = vor.u32 %v7123_v42, %v4847_v36  ;;  %v5860_v36 = vor.u32 %v7369_v26, %v5857_v27  ;;  %v7261_v42 = vld [vmem:[%s11528_s1 + $0x4ac] sm:$0xf] }
  0xee   :  { %2219 = vmatpush.bf16.msrb.mxu2 %v5088_v40  ;;  %v9343_v40 = vpop.f32.mrf.mxu3  ;;  %v9374_v53 = vpop.f32.mrf.mxu1  ;;  %v5232_v59 = vor.u32 %v7219_v44, %v5231_v43  ;;  %v5425_v43 = vld [vmem:[%s11528_s1 + $0x4d8] sm:$0xf0]  ;;  %v7357_v44 = vld [vmem:[%s11528_s1 + $0x7ac] sm:$0xf] }
  0xef   :  { %v7129_v26 = vld [vmem:[%s11528_s1 + $0x8c] sm:$0xf] }
  0xf0   :  { %2192 = vmatpush.bf16.msrb.mxu0 %v5420_v50  ;;  %v7297_v50 = vld [vmem:[%s11528_s1 + $0x5cc] sm:$0xf] }
  0xf1   :  { %2206 = vmatpush.bf16.msrb.mxu1 %v5804_v51  ;;  %2234 = vmatpush.bf16.msrb.mxu3 %v5424_v56  ;;  %v5569_v51 = vld [vmem:[%s11528_s1 + $0x5f8] sm:$0xf0]  ;;  %v7393_v56 = vld [vmem:[%s11528_s1 + $0x8cc] sm:$0xf] }
  0xf2   :  { %2220 = vmatpush.bf16.msrb.mxu2 %v5040_v52  ;;  %v9372_v52 = vpop.f32.mrf.mxu0  ;;  %v5572_v62 = vor.u32 %v7297_v50, %v5569_v51  ;;  %v5956_v4 = vor.u32 %v7393_v56, %v5953_v58  ;;  %v7351_v50 = vld [vmem:[%s11528_s1 + $0x774] sm:$0xf0]  ;;  %v7153_v51 = vld [vmem:[%s11528_s1 + $0x14c] sm:$0xf]  ;;  %v5812_v56 = vor.u32 %v7357_v44, %v5809_v45  ;;  %v4993_v58 = vld [vmem:[%s11528_s1 + $0x178] sm:$0xf0] }
  0xf4   :  { %2193 = vmatpush.bf16.msrb.mxu0 %v5372_v1  ;;  %v5903_v1 = vld [vmem:[%s11528_s1 + $0x868] sm:$0xf] }
  0xf5   :  { %2207 = vmatpush.bf16.msrb.mxu1 %v5756_v2  ;;  %2235 = vmatpush.bf16.msrb.mxu3 %v5376_v8  ;;  %v7387_v2 = vld [vmem:[%s11528_s1 + $0x894] sm:$0xf0]  ;;  %v5521_v8 = vld [vmem:[%s11528_s1 + $0x598] sm:$0xf0]  ;;  %v9406_v11 = vpop.f32.mrf.mxu2 }
  0xf6   :  { %2221 = vmatpush.bf16.msrb.mxu2 %v4992_v3  ;;  %v7189_v3 = vld [vmem:[%s11528_s1 + $0x26c] sm:$0xf]  ;;  %v9408_v14 = vpop.f32.mrf.mxu3  ;;  %v5904_v15 = vor.u32 %v7387_v2, %v5903_v1  ;;  %v9440_v30 = vpop.f32.mrf.mxu1  ;;  %v5760_v1 = vor.u32 %v7351_v50, %v5759_v49  ;;  %v5233_v50 = vld [vmem:[%s11528_s1 + $0x358] sm:$0xf0] }
  0xf8   :  { %2194 = vmatpush.bf16.msrb.mxu0 %v5324_v16  ;;  %v5140_v16 = vor.u32 %v7189_v3, %v5137_v6 }
  0xf9   :  { %2208 = vmatpush.bf16.msrb.mxu1 %v5708_v17  ;;  %2236 = vmatpush.bf16.msrb.mxu3 %v5328_v23  ;;  %v5524_v17 = vor.u32 %v7285_v7, %v5521_v8  ;;  %v5089_v23 = vld [vmem:[%s11528_s1 + $0x238] sm:$0xf0]  ;;  %v5711_v7 = vld [vmem:[%s11528_s1 + $0x6e8] sm:$0xf]  ;;  %v7339_v8 = vld [vmem:[%s11528_s1 + $0x714] sm:$0xf0] }
  0xfa   :  { %2222 = vmatpush.bf16.msrb.mxu2 %v4944_v18  ;;  %v5855_v18 = vld [vmem:[%s11528_s1 + $0x808] sm:$0xf]  ;;  %v5092_v31 = vor.u32 %v7177_v21, %v5089_v23  ;;  %v5712_v21 = vor.u32 %v7339_v8, %v5711_v7  ;;  %v7470_v7 = vld [vmem:[%s11530_s3 + $0x230] sm:$0xf0] }
  0xfb   :  { %v5856_v28 = vor.u32 %v7375_v19, %v5855_v18  ;;  %v7333_v18 = vld [vmem:[%s11528_s1 + $0x6ec] sm:$0xf]  ;;  %v5713_v19 = vld [vmem:[%s11528_s1 + $0x718] sm:$0xf0] }
  0xfc   :  { %2195 = vmatpush.bf16.msrb.mxu0 %v5276_v29  ;;  %v9438_v29 = vpop.f32.mrf.mxu0 }
  0xfd   :  { %2209 = vmatpush.bf16.msrb.mxu1 %v5660_v32  ;;  %2237 = vmatpush.bf16.msrb.mxu3 %v5280_v41  ;;  %v5476_v32 = vor.u32 %v7273_v24, %v5473_v25  ;;  %v5041_v41 = vld [vmem:[%s11528_s1 + $0x1d8] sm:$0xf0]  ;;  %v5663_v24 = vld [vmem:[%s11528_s1 + $0x688] sm:$0xf]  ;;  %v7327_v25 = vld [vmem:[%s11528_s1 + $0x6b4] sm:$0xf0] }
  0xfe   :  { %2223 = vmatpush.bf16.msrb.mxu2 %v4896_v33  ;;  %v5807_v33 = vld [vmem:[%s11528_s1 + $0x7a8] sm:$0xf]  ;;  %v5044_v47 = vor.u32 %v7165_v35, %v5041_v41  ;;  %v9496_v3 = vpop.f32.mrf.mxu1  ;;  %v7321_v35 = vld [vmem:[%s11528_s1 + $0x68c] sm:$0xf]  ;;  %v5664_v41 = vor.u32 %v7327_v25, %v5663_v24 }
  0xff   :  { %v5808_v46 = vor.u32 %v7363_v34, %v5807_v33  ;;  %v7225_v33 = vld [vmem:[%s11528_s1 + $0x38c] sm:$0xf]  ;;  %v5281_v34 = vld [vmem:[%s11528_s1 + $0x3b8] sm:$0xf0] }
 0x100   :  { %2196 = vmatpush.bf16.msrb.mxu0 %v5228_v48  ;;  %v5428_v48 = vor.u32 %v7261_v42, %v5425_v43  ;;  %v5615_v42 = vld [vmem:[%s11528_s1 + $0x628] sm:$0xf]  ;;  %v7315_v43 = vld [vmem:[%s11528_s1 + $0x654] sm:$0xf0]  ;;  %v5284_v45 = vor.u32 %v7225_v33, %v5281_v34  ;;  %v7467_v33 = vld [vmem:[%s11530_s3 + $0x218] sm:$0xf0] }
 0x101   :  { %2210 = vmatpush.bf16.msrb.mxu1 %v5612_v54  ;;  %2238 = vmatpush.bf16.msrb.mxu3 %v5232_v59  ;;  %v9475_v54 = vpop.f32.mrf.mxu2  ;;  %v7249_v59 = vld [vmem:[%s11528_s1 + $0x44c] sm:$0xf]  ;;  %v6319_v34 = vld [vmem:[%s11530_s3 + $0x2d0] sm:$0xf] }
 0x102   :  { %2224 = vmatpush.bf16.msrb.mxu2 %v4848_v55  ;;  %v9477_v55 = vpop.f32.mrf.mxu3 }
 0x103   :  { %2197 = vmatmul.bf16.vlgmr.msrb.gmra.mxu0 %v8029_v5 }
 0x104   :  { %2245 = vmatpush.bf16.msra.mxu0 %v5952_v60  ;;  %2211 = vmatmul.bf16.vlgmr.msrb.gmra.mxu1 %v8063_v20  ;;  %v5377_v60 = vld [vmem:[%s11528_s1 + $0x478] sm:$0xf0]  ;;  %v9494_v2 = vpop.f32.mrf.mxu0 }
 0x105   :  { %2259 = vmatpush.bf16.msra.mxu1 %v5188_v61  ;;  %2287 = vmatpush.bf16.msra.mxu3 %v5956_v4  ;;  %v7345_v61 = vld [vmem:[%s11528_s1 + $0x74c] sm:$0xf]  ;;  %v4996_v4 = vor.u32 %v7153_v51, %v4993_v58  ;;  %v5380_v6 = vor.u32 %v7249_v59, %v5377_v60  ;;  %v6043_v60 = vld [vmem:[%s11530_s3 + $0xa8] sm:$0xf] }
 0x106   :  { %2273 = vmatpush.bf16.msra.mxu2 %v5572_v62  ;;  %2239 = vmatmul.bf16.vlgmr.msrb.gmra.mxu3 %v8029_v5  ;;  %v5761_v62 = vld [vmem:[%s11528_s1 + $0x778] sm:$0xf0]  ;;  %v7309_v51 = vld [vmem:[%s11528_s1 + $0x62c] sm:$0xf]  ;;  %v9576_v59 = vpop.f32.mrf.mxu1 }
 0x107   :  { %2225 = vmatmul.bf16.vlgmr.msrb.gmra.mxu2 %v8002_v57  ;;  %v5764_v10 = vor.u32 %v7345_v61, %v5761_v62  ;;  %v7422_v61 = vld [vmem:[%s11530_s3 + $0xb0] sm:$0xf0]  ;;  %v6139_v62 = vld [vmem:[%s11530_s3 + $0x168] sm:$0xf] }
 0x108   :  { %2246 = vmatpush.bf16.msra.mxu0 %v5904_v15  ;;  %v4945_v15 = vld [vmem:[%s11528_s1 + $0x118] sm:$0xf0] }
 0x109   :  { %2260 = vmatpush.bf16.msra.mxu1 %v5140_v16  ;;  %2288 = vmatpush.bf16.msra.mxu3 %v5908_v22  ;;  %v7237_v16 = vld [vmem:[%s11528_s1 + $0x3ec] sm:$0xf]  ;;  %v4948_v22 = vor.u32 %v7141_v9, %v4945_v15  ;;  %v9531_v27 = vpop.f32.mrf.mxu2  ;;  %v7494_v15 = vld [vmem:[%s11530_s3 + $0x2f0] sm:$0xf0] }
 0x10a   :  { %2274 = vmatpush.bf16.msra.mxu2 %v5524_v17  ;;  %v5329_v17 = vld [vmem:[%s11528_s1 + $0x418] sm:$0xf0] }
 0x10b   :  { %v5332_v23 = vor.u32 %v7237_v16, %v5329_v17  ;;  %v6044_v17 = vor.u32 %v7422_v61, %v6043_v60 }
 0x10c   :  { %2247 = vmatpush.bf16.msra.mxu0 %v5856_v28  ;;  %v9533_v28 = vpop.f32.mrf.mxu3  ;;  %v9574_v58 = vpop.f32.mrf.mxu0 }
 0x10d   :  { %2261 = vmatpush.bf16.msra.mxu1 %v5092_v31  ;;  %2289 = vmatpush.bf16.msra.mxu3 %v5860_v36  ;;  %v5716_v31 = vor.u32 %v7333_v18, %v5713_v19  ;;  %v5665_v36 = vld [vmem:[%s11528_s1 + $0x6b8] sm:$0xf0] }
 0x10e   :  { %2275 = vmatpush.bf16.msra.mxu2 %v5476_v32  ;;  %v4897_v32 = vld [vmem:[%s11528_s1 + $0xb8] sm:$0xf0]  ;;  %v5668_v49 = vor.u32 %v7321_v35, %v5665_v36  ;;  %v9633_v36 = vld [vmem:[%s11529_s2] sm:$0xff] }
 0x10f   :  { %v4900_v44 = vor.u32 %v7129_v26, %v4897_v32  ;;  %v6223_v32 = vld [vmem:[%s11530_s3 + $0x210] sm:$0xf]  ;;  %v7491_v35 = vld [vmem:[%s11530_s3 + $0x2d8] sm:$0xf0]  ;;  %v317_v60 = vperm.slane %v9633_v36, 0  ;;  %v318_v61 = vperm.slane %v9633_v36, 1 }
 0x110   :  { %2248 = vmatpush.bf16.msra.mxu0 %v5808_v46  ;;  %v7117_v46 = vld [vmem:[%s11528_s1 + $0x2c] sm:$0xf] }
 0x111   :  { %2262 = vmatpush.bf16.msra.mxu1 %v5044_v47  ;;  %2290 = vmatpush.bf16.msra.mxu3 %v5812_v56  ;;  %v4849_v47 = vld [vmem:[%s11528_s1 + $0x58] sm:$0xf0]  ;;  %v9611_v24 = vpop.f32.mrf.mxu2 }
 0x112   :  { %2276 = vmatpush.bf16.msra.mxu2 %v5428_v48  ;;  %v7213_v48 = vld [vmem:[%s11528_s1 + $0x32c] sm:$0xf]  ;;  %v5617_v56 = vld [vmem:[%s11528_s1 + $0x658] sm:$0xf0]  ;;  %v4852_v8 = vor.u32 %v7117_v46, %v4849_v47  ;;  %v6019_v46 = vld [vmem:[%s11530_s3 + $0x78] sm:$0xf] }
 0x113   :  { %v5236_v9 = vor.u32 %v7213_v48, %v5233_v50  ;;  %v5620_v16 = vor.u32 %v7309_v51, %v5617_v56  ;;  %v7416_v47 = vld [vmem:[%s11530_s3 + $0x80] sm:$0xf0]  ;;  %v6115_v48 = vld [vmem:[%s11530_s3 + $0x138] sm:$0xf] }
 0x114   :  { %2249 = vmatpush.bf16.msra.mxu0 %v5760_v1  ;;  %v5616_v1 = vor.u32 %v7315_v43, %v5615_v42  ;;  %v9613_v25 = vpop.f32.mrf.mxu3  ;;  %v9635_v42 = vpop.f32.mrf.mxu0  ;;  %v7440_v50 = vld [vmem:[%s11530_s3 + $0x140] sm:$0xf0]  ;;  %v6211_v51 = vld [vmem:[%s11530_s3 + $0x1f8] sm:$0xf] }
 0x115   :  { %2263 = vmatpush.bf16.msra.mxu1 %v4996_v4  ;;  %2291 = vmatpush.bf16.msra.mxu3 %v5764_v10  ;;  %v7446_v4 = vld [vmem:[%s11530_s3 + $0x170] sm:$0xf0]  ;;  %v6331_v10 = vld [vmem:[%s11530_s3 + $0x2e8] sm:$0xf]  ;;  %v9637_v43 = vpop.f32.mrf.mxu1  ;;  %v7464_v56 = vld [vmem:[%s11530_s3 + $0x200] sm:$0xf0] }
 0x116   :  { %2277 = vmatpush.bf16.msra.mxu2 %v5380_v6  ;;  %v6235_v6 = vld [vmem:[%s11530_s3 + $0x228] sm:$0xf]  ;;  %v6140_v18 = vor.u32 %v7446_v4, %v6139_v62  ;;  %v6332_v26 = vor.u32 %v7494_v15, %v6331_v10  ;;  %v6307_v62 = vld [vmem:[%s11530_s3 + $0x2b8] sm:$0xf]  ;;  %v6020_v4 = vor.u32 %v7416_v47, %v6019_v46  ;;  %v7437_v15 = vld [vmem:[%s11530_s3 + $0x128] sm:$0xf0] }
 0x117   :  { %v6236_v19 = vor.u32 %v7470_v7, %v6235_v6  ;;  %v6116_v6 = vor.u32 %v7440_v50, %v6115_v48  ;;  %v6212_v7 = vor.u32 %v7464_v56, %v6211_v51  ;;  %v6283_v50 = vld [vmem:[%s11530_s3 + $0x288] sm:$0xf]  ;;  %v7482_v51 = vld [vmem:[%s11530_s3 + $0x290] sm:$0xf0] }
 0x118   :  { %2250 = vmatpush.bf16.msra.mxu0 %v5712_v21  ;;  %v6031_v21 = vld [vmem:[%s11530_s3 + $0x90] sm:$0xf] }
 0x119   :  { %2264 = vmatpush.bf16.msra.mxu1 %v4948_v22  ;;  %2292 = vmatpush.bf16.msra.mxu3 %v5716_v31  ;;  %v7419_v22 = vld [vmem:[%s11530_s3 + $0x98] sm:$0xf0] }
 0x11a   :  { %2278 = vmatpush.bf16.msra.mxu2 %v5332_v23  ;;  %v6127_v23 = vld [vmem:[%s11530_s3 + $0x150] sm:$0xf]  ;;  %v7443_v31 = vld [vmem:[%s11530_s3 + $0x158] sm:$0xf0] }
 0x11c   :  { %2251 = vmatpush.bf16.msra.mxu0 %v5664_v41  ;;  %v6032_v41 = vor.u32 %v7419_v22, %v6031_v21  ;;  %v9680_v10 = vpop.f32.mrf.mxu3  ;;  %v1849_v21 = vadd.f32 %v9272_v0, %v318_v61  ;;  %v6295_v22 = vld [vmem:[%s11530_s3 + $0x2a0] sm:$0xf]  ;;  %v9723_v48 = vpop.f32.mrf.mxu0 }
 0x11d   :  { %2265 = vmatpush.bf16.msra.mxu1 %v4900_v44  ;;  %2293 = vmatpush.bf16.msra.mxu3 %v5668_v49  ;;  %v6128_v44 = vor.u32 %v7443_v31, %v6127_v23  ;;  %v6320_v49 = vor.u32 %v7491_v35, %v6319_v34  ;;  %v7485_v23 = vld [vmem:[%s11530_s3 + $0x2a8] sm:$0xf0]  ;;  %v319_v31 = vperm.slane %v9633_v36, 2  ;;  %v7410_v34 = vld [vmem:[%s11530_s3 + $0x50] sm:$0xf0] }
 0x11e   :  { %2279 = vmatpush.bf16.msra.mxu2 %v5284_v45  ;;  %v6224_v45 = vor.u32 %v7467_v33, %v6223_v32  ;;  %v320_v32 = vperm.slane %v9633_v36, 3  ;;  %v5995_v33 = vld [vmem:[%s11530_s3 + $0x48] sm:$0xf]  ;;  %v6296_v35 = vor.u32 %v7485_v23, %v6295_v22  ;;  %v1863_v56 = vadd.f32 %v9372_v52, %v1849_v21  ;;  %v7407_v52 = vld [vmem:[%s11530_s3 + $0x38] sm:$0xf0] }
 0x120   :  { %2252 = vmatpush.bf16.msra.mxu0 %v5616_v1  ;;  %v7488_v1 = vld [vmem:[%s11530_s3 + $0x2c0] sm:$0xf0] }
 0x121   :  { %2266 = vmatpush.bf16.msra.mxu1 %v4852_v8  ;;  %2294 = vmatpush.bf16.msra.mxu3 %v5620_v16  ;;  %v6103_v8 = vld [vmem:[%s11530_s3 + $0x120] sm:$0xf] }
 0x122   :  { %2280 = vmatpush.bf16.msra.mxu2 %v5236_v9  ;;  %v6308_v9 = vor.u32 %v7488_v1, %v6307_v62  ;;  %v6199_v16 = vld [vmem:[%s11530_s3 + $0x1e0] sm:$0xf] }
 0x123   :  { %2253 = vmatmul.bf16.vlgmr.msra.gmra.mxu0 %v8063_v20 }
 0x124   :  { %4265 = vmatpush.bf16.msrb.mxu0 %v6044_v17  ;;  %2267 = vmatmul.bf16.vlgmr.msra.gmra.mxu1 %v8002_v57  ;;  %v6007_v57 = vld [vmem:[%s11530_s3 + $0x60] sm:$0xf]  ;;  %v7461_v17 = vld [vmem:[%s11530_s3 + $0x1e8] sm:$0xf0] }
 0x125   :  { %4279 = vmatpush.bf16.msrb.mxu1 %v6140_v18  ;;  %4307 = vmatpush.bf16.msrb.mxu3 %v6332_v26  ;;  %v1807_v18 = vadd.f32 %v9218_v37, %v317_v60  ;;  %v1851_v26 = vadd.f32 %v9343_v40, %v318_v61  ;;  %v6200_v0 = vor.u32 %v7461_v17, %v6199_v16  ;;  %v6091_v40 = vld [vmem:[%s11530_s3 + $0x108] sm:$0xf] }
 0x126   :  { %4293 = vmatpush.bf16.msrb.mxu2 %v6236_v19  ;;  %2295 = vmatmul.bf16.vlgmr.msra.gmra.mxu3 %v8063_v20  ;;  %v9678_v20 = vpop.f32.mrf.mxu2  ;;  %v1809_v19 = vadd.f32 %v9292_v12, %v317_v60  ;;  %v6104_v12 = vor.u32 %v7437_v15, %v6103_v8  ;;  %v1893_v61 = vadd.f32 %v9475_v54, %v319_v31 }
 0x127   :  { %2281 = vmatmul.bf16.vlgmr.msra.gmra.mxu2 %v8029_v5  ;;  %v7413_v5 = vld [vmem:[%s11530_s3 + $0x68] sm:$0xf0]  ;;  %v1821_v46 = vadd.f32 %v9220_v38, %v1807_v18  ;;  %v1865_v60 = vadd.f32 %v9438_v29, %v1851_v26  ;;  %v1891_v38 = vadd.f32 %v9406_v11, %v319_v31  ;;  %v6079_v11 = vld [vmem:[%s11530_s3 + $0xf0] sm:$0xf]  ;;  %v1933_v29 = vadd.f32 %v9496_v3, %v320_v32  ;;  %v7428_v31 = vld [vmem:[%s11530_s3 + $0xe0] sm:$0xf0] }
 0x128   :  { %4266 = vmatpush.bf16.msrb.mxu0 %v6032_v41  ;;  %v6008_v37 = vor.u32 %v7413_v5, %v6007_v57  ;;  %v7434_v41 = vld [vmem:[%s11530_s3 + $0x110] sm:$0xf0]  ;;  %v1823_v47 = vadd.f32 %v9294_v13, %v1809_v19  ;;  %v5996_v13 = vor.u32 %v7410_v34, %v5995_v33  ;;  %v1935_v54 = vadd.f32 %v9576_v59, %v320_v32  ;;  %v6175_v57 = vld [vmem:[%s11530_s3 + $0x1b0] sm:$0xf]  ;;  %v7455_v5 = vld [vmem:[%s11530_s3 + $0x1b8] sm:$0xf0] }
 0x129   :  { %4280 = vmatpush.bf16.msrb.mxu1 %v6128_v44  ;;  %4308 = vmatpush.bf16.msrb.mxu3 %v6320_v49  ;;  %v6187_v44 = vld [vmem:[%s11530_s3 + $0x1c8] sm:$0xf]  ;;  %v9725_v49 = vpop.f32.mrf.mxu1  ;;  %v6092_v62 = vor.u32 %v7434_v41, %v6091_v40  ;;  %v9758_v8 = vadd.f32 %v9270_v63, %v1821_v46  ;;  %v6271_v59 = vld [vmem:[%s11530_s3 + $0x270] sm:$0xf]  ;;  %v9770_v15 = vadd.f32 %v9374_v53, %v1863_v56  ;;  %v5971_v53 = vld [vmem:[%s11530_s3 + $0x18] sm:$0xf]  ;;  %v9819_v46 = vpop.f32.mrf.mxu0 }
 0x12a   :  { %4294 = vmatpush.bf16.msrb.mxu2 %v6224_v45  ;;  %v7458_v45 = vld [vmem:[%s11530_s3 + $0x1d0] sm:$0xf0]  ;;  %v9761_v3 = vadd.f32 %v9341_v39, %v1823_v47  ;;  %v9773_v16 = vadd.f32 %v9440_v30, %v1865_v60  ;;  %v1905_v63 = vadd.f32 %v9408_v14, %v1891_v38  ;;  %v9778_v39 = vpop.f32.mrf.mxu3  ;;  %v1907_v19 = vadd.f32 %v9477_v55, %v1893_v61  ;;  %v7404_v14 = vld [vmem:[%s11530_s3 + $0x20] sm:$0xf0]  ;;  %v6067_v30 = vld [vmem:[%s11530_s3 + $0xd8] sm:$0xf] }
 0x12b   :  { %v6188_v1 = vor.u32 %v7458_v45, %v6187_v44  ;;  %v6176_v22 = vor.u32 %v7455_v5, %v6175_v57  ;;  %v1947_v23 = vadd.f32 %v9531_v27, %v1933_v29  ;;  %v1949_v55 = vadd.f32 %v9611_v24, %v1935_v54  ;;  %v6163_v32 = vld [vmem:[%s11530_s3 + $0x198] sm:$0xf]  ;;  %v5959_v41 = vld [vmem:[%s11530_s3] sm:$0xf]  ;;  %v7401_v44 = vld [vmem:[%s11530_s3 + $0x8] sm:$0xf0] }
 0x12c   :  { %4267 = vmatpush.bf16.msrb.mxu0 %v6020_v4  ;;  %v5983_v4 = vld [vmem:[%s11530_s3 + $0x30] sm:$0xf]  ;;  %v2313_v27 = vmax.f32 %v9761_v3, 0.0  ;;  %v6259_v24 = vld [vmem:[%s11530_s3 + $0x258] sm:$0xf]  ;;  %v2302_v33 = vmax.f32 %v9770_v15, 0.0  ;;  %v1919_v40 = vadd.f32 %v9494_v2, %v1905_v63  ;;  %v1921_v45 = vadd.f32 %v9574_v58, %v1907_v19 }
 0x12d   :  { %4281 = vmatpush.bf16.msrb.mxu1 %v6116_v6  ;;  %4309 = vmatpush.bf16.msrb.mxu3 %v6308_v9  ;;  %v6284_v6 = vor.u32 %v7482_v51, %v6283_v50  ;;  %v7479_v9 = vld [vmem:[%s11530_s3 + $0x278] sm:$0xf0]  ;;  %v5984_v18 = vor.u32 %v7407_v52, %v5983_v4  ;;  %v2314_v34 = vmax.f32 %v9773_v16, 0.0  ;;  %v6068_v50 = vor.u32 %v7428_v31, %v6067_v30  ;;  %v6055_v51 = vld [vmem:[%s11530_s3 + $0xc0] sm:$0xf] }
 0x12e   :  { %4295 = vmatpush.bf16.msrb.mxu2 %v6212_v7  ;;  %v7431_v7 = vld [vmem:[%s11530_s3 + $0xf8] sm:$0xf0]  ;;  %v9776_v17 = vpop.f32.mrf.mxu2  ;;  %v6272_v26 = vor.u32 %v7479_v9, %v6271_v59  ;;  %v7425_v56 = vld [vmem:[%s11530_s3 + $0xc8] sm:$0xf0]  ;;  %v6151_v58 = vld [vmem:[%s11530_s3 + $0x180] sm:$0xf]  ;;  %v1961_v60 = vadd.f32 %v9533_v28, %v1947_v23  ;;  %v1963_v38 = vadd.f32 %v9613_v25, %v1949_v55  ;;  %v5960_v52 = vor.u32 %v7401_v44, %v5959_v41 }
 0x12f   :  { %v6080_v21 = vor.u32 %v7431_v7, %v6079_v11  ;;  %v7449_v61 = vld [vmem:[%s11530_s3 + $0x188] sm:$0xf0]  ;;  %v6427_v28 = vld [vmem:[%s11530_s3 + $0x3a8] sm:$0xf]  ;;  %v7518_v25 = vld [vmem:[%s11530_s3 + $0x3b0] sm:$0xf0]  ;;  %v9891_v31 = vpack.c.bf16 %v2314_v34, %v2302_v33 }
 0x130   :  { %4268 = vmatpush.bf16.msrb.mxu0 %v6008_v37  ;;  %v7452_v37 = vld [vmem:[%s11530_s3 + $0x1a0] sm:$0xf0]  ;;  %v6523_v4 = vld [vmem:[%s11530_s3 + $0x468] sm:$0xf]  ;;  %v7542_v11 = vld [vmem:[%s11530_s3 + $0x470] sm:$0xf0]  ;;  %v6152_v3 = vor.u32 %v7449_v61, %v6151_v58  ;;  %v6428_v16 = vor.u32 %v7518_v25, %v6427_v28 }
 0x131   :  { %4282 = vmatpush.bf16.msrb.mxu1 %v6104_v12  ;;  %4310 = vmatpush.bf16.msrb.mxu3 %v6296_v35  ;;  %v2301_v12 = vmax.f32 %v9758_v8, 0.0  ;;  %v5972_v35 = vor.u32 %v7404_v14, %v5971_v53  ;;  %v9821_v47 = vpop.f32.mrf.mxu1  ;;  %v6164_v2 = vor.u32 %v7452_v37, %v6163_v32  ;;  %v6619_v29 = vld [vmem:[%s11530_s3 + $0x528] sm:$0xf]  ;;  %v7566_v54 = vld [vmem:[%s11530_s3 + $0x530] sm:$0xf0]  ;;  %v2303_v57 = vmax.f32 %v1919_v40, 0.0 }
 0x132   :  { %4296 = vmatpush.bf16.msrb.mxu2 %v6200_v0  ;;  %v7476_v0 = vld [vmem:[%s11530_s3 + $0x260] sm:$0xf0]  ;;  %v9863_v7 = vpop.f32.mrf.mxu3  ;;  %v2315_v5 = vmax.f32 %v1921_v45, 0.0  ;;  %v6056_v8 = vor.u32 %v7425_v56, %v6055_v51  ;;  %v2304_v59 = vmax.f32 %v1961_v60, 0.0  ;;  %v2316_v9 = vmax.f32 %v1963_v38, 0.0 }
 0x133   :  { %v6715_v63 = vld [vmem:[%s11530_s3 + $0x5e8] sm:$0xf]  ;;  %v6524_v19 = vor.u32 %v7542_v11, %v6523_v4  ;;  %v7515_v53 = vld [vmem:[%s11530_s3 + $0x398] sm:$0xf0]  ;;  %v6511_v14 = vld [vmem:[%s11530_s3 + $0x450] sm:$0xf] }
 0x134   :  { %4269 = vmatpush.bf16.msrb.mxu0 %v5996_v13  ;;  %v6260_v13 = vor.u32 %v7476_v0, %v6259_v24  ;;  %v7539_v30 = vld [vmem:[%s11530_s3 + $0x458] sm:$0xf0]  ;;  %v6607_v23 = vld [vmem:[%s11530_s3 + $0x510] sm:$0xf]  ;;  %v9893_v32 = vpack.c.bf16 %v2315_v5, %v2303_v57  ;;  %v6403_v41 = vld [vmem:[%s11530_s3 + $0x378] sm:$0xf] }
 0x135   :  { %4283 = vmatpush.bf16.msrb.mxu1 %v6092_v62  ;;  %4311 = vmatpush.bf16.msrb.mxu3 %v6284_v6  ;;  %v6247_v62 = vld [vmem:[%s11530_s3 + $0x240] sm:$0xf]  ;;  %v7563_v55 = vld [vmem:[%s11530_s3 + $0x518] sm:$0xf0]  ;;  %v6703_v0 = vld [vmem:[%s11530_s3 + $0x5d0] sm:$0xf]  ;;  %v6512_v34 = vor.u32 %v7539_v30, %v6511_v14 }
 0x136   :  { %4297 = vmatpush.bf16.msrb.mxu2 %v6188_v1  ;;  %v7473_v1 = vld [vmem:[%s11530_s3 + $0x248] sm:$0xf0]  ;;  %v9861_v6 = vpop.f32.mrf.mxu2  ;;  %v7587_v40 = vld [vmem:[%s11530_s3 + $0x5d8] sm:$0xf0]  ;;  %v7512_v44 = vld [vmem:[%s11530_s3 + $0x380] sm:$0xf0] }
 0x137   :  { %v6248_v15 = vor.u32 %v7473_v1, %v6247_v62  ;;  %v6499_v45 = vld [vmem:[%s11530_s3 + $0x438] sm:$0xf]  ;;  %v7560_v51 = vld [vmem:[%s11530_s3 + $0x500] sm:$0xf0]  ;;  %v321_v56 = vperm.slane %v9633_v36, 4  ;;  %v6704_v58 = vor.u32 %v7587_v40, %v6703_v0  ;;  %v6404_v60 = vor.u32 %v7512_v44, %v6403_v41 }
 0x138   :  { %4270 = vmatpush.bf16.msrb.mxu0 %v5984_v18  ;;  %v7590_v18 = vld [vmem:[%s11530_s3 + $0x5f0] sm:$0xf0]  ;;  %v6691_v61 = vld [vmem:[%s11530_s3 + $0x5b8] sm:$0xf]  ;;  %v7584_v62 = vld [vmem:[%s11530_s3 + $0x5c0] sm:$0xf0] }
 0x139   :  { %4284 = vmatpush.bf16.msrb.mxu1 %v6080_v21  ;;  %4312 = vmatpush.bf16.msrb.mxu3 %v6272_v26  ;;  %v6620_v21 = vor.u32 %v7566_v54, %v6619_v29  ;;  %v9889_v26 = vpack.c.bf16 %v2313_v27, %v2301_v12  ;;  %v6716_v37 = vor.u32 %v7590_v18, %v6715_v63  ;;  %v9903_v27 = vpop.f32.mrf.mxu0  ;;  %v9905_v33 = vpop.f32.mrf.mxu1  ;;  %v6391_v25 = vld [vmem:[%s11530_s3 + $0x360] sm:$0xf]  ;;  %v7509_v4 = vld [vmem:[%s11530_s3 + $0x368] sm:$0xf0]  ;;  %v6571_v14 = vld [vmem:[%s11530_s3 + $0x4c8] sm:$0xf] }
 0x13a   :  { %4298 = vmatpush.bf16.msrb.mxu2 %v6176_v22  ;;  %v6415_v22 = vld [vmem:[%s11530_s3 + $0x390] sm:$0xf]  ;;  %v9901_v12 = vpack.c.bf16 %v2316_v9, %v2304_v59  ;;  %v7533_v11 = vld [vmem:[%s11530_s3 + $0x428] sm:$0xf0]  ;;  %v6583_v29 = vld [vmem:[%s11530_s3 + $0x4e0] sm:$0xf]  ;;  %v1975_v57 = vadd.f32 %v9635_v42, %v321_v56  ;;  %v1977_v5 = vadd.f32 %v9723_v48, %v321_v56  ;;  %v6692_v59 = vor.u32 %v7584_v62, %v6691_v61 }
 0x13b   :  { %v6416_v24 = vor.u32 %v7515_v53, %v6415_v22  ;;  %v7557_v54 = vld [vmem:[%s11530_s3 + $0x4e8] sm:$0xf0]  ;;  %v6392_v9 = vor.u32 %v7509_v4, %v6391_v25  ;;  %v6475_v22 = vld [vmem:[%s11530_s3 + $0x408] sm:$0xf]  ;;  %v7530_v53 = vld [vmem:[%s11530_s3 + $0x410] sm:$0xf0] }
 0x13c   :  { %4271 = vmatpush.bf16.msrb.mxu0 %v5972_v35  ;;  %v6608_v35 = vor.u32 %v7563_v55, %v6607_v23  ;;  %v6584_v63 = vor.u32 %v7557_v54, %v6583_v29  ;;  %v7554_v30 = vld [vmem:[%s11530_s3 + $0x4d0] sm:$0xf0]  ;;  %v1989_v23 = vadd.f32 %v9637_v43, %v1975_v57  ;;  %v1991_v55 = vadd.f32 %v9725_v49, %v1977_v5  ;;  %v7503_v41 = vld [vmem:[%s11530_s3 + $0x338] sm:$0xf0]  ;;  %v6463_v44 = vld [vmem:[%s11530_s3 + $0x3f0] sm:$0xf] }
 0x13d   :  { %4285 = vmatpush.bf16.msrb.mxu1 %v6068_v50  ;;  %4313 = vmatpush.bf16.msrb.mxu3 %v6260_v13  ;;  %v7536_v50 = vld [vmem:[%s11530_s3 + $0x440] sm:$0xf0]  ;;  %v9930_v13 = vpop.f32.mrf.mxu3  ;;  %v6476_v49 = vor.u32 %v7530_v53, %v6475_v22  ;;  %v6559_v56 = vld [vmem:[%s11530_s3 + $0x4b0] sm:$0xf]  ;;  %v7575_v25 = vld [vmem:[%s11530_s3 + $0x578] sm:$0xf0] }
 0x13e   :  { %4299 = vmatpush.bf16.msrb.mxu2 %v6164_v2  ;;  %v6595_v2 = vld [vmem:[%s11530_s3 + $0x4f8] sm:$0xf]  ;;  %v2060_v38 = vpop.f32.mrf.mxu2  ;;  %v6500_v1 = vor.u32 %v7536_v50, %v6499_v45  ;;  %v7524_v57 = vld [vmem:[%s11530_s3 + $0x3e0] sm:$0xf0]  ;;  %v7497_v53 = vld [vmem:[%s11530_s3 + $0x308] sm:$0xf0] }
 0x13f   :  { %v6596_v28 = vor.u32 %v7560_v51, %v6595_v2  ;;  %v7527_v51 = vld [vmem:[%s11530_s3 + $0x3f8] sm:$0xf0]  ;;  %v6451_v29 = vld [vmem:[%s11530_s3 + $0x3d8] sm:$0xf] }
 0x140   :  { %4272 = vmatpush.bf16.msrb.mxu0 %v5960_v52  ;;  %v6487_v52 = vld [vmem:[%s11530_s3 + $0x420] sm:$0xf]  ;;  %v6547_v5 = vld [vmem:[%s11530_s3 + $0x498] sm:$0xf] }
 0x141   :  { %4286 = vmatpush.bf16.msrb.mxu1 %v6056_v8  ;;  %4314 = vmatpush.bf16.msrb.mxu3 %v6248_v15  ;;  %v322_v8 = vperm.slane %v9633_v36, 5  ;;  %v6679_v15 = vld [vmem:[%s11530_s3 + $0x5a0] sm:$0xf]  ;;  %v9966_v42 = vpop.f32.mrf.mxu0  ;;  %v6488_v48 = vor.u32 %v7533_v11, %v6487_v52  ;;  %v6355_v52 = vld [vmem:[%s11530_s3 + $0x318] sm:$0xf] }
 0x142   :  { %4300 = vmatpush.bf16.msrb.mxu2 %v6152_v3  ;;  %v323_v3 = vperm.slane %v9633_v36, 6  ;;  %v7500_v11 = vld [vmem:[%s11530_s3 + $0x320] sm:$0xf0] }
 0x143   :  { %4273 = vmatmul.bf16.vlgmr.msrb.gmra.mxu0 %v9889_v26  ;;  %v2100_v18 = vpop.f32.mrf.mxu1  ;;  %v2019_v43 = vadd.f32 %v9778_v39, %v322_v8 }
 0x144   :  { %4321 = vmatpush.bf16.msra.mxu0 %v6428_v16  ;;  %4287 = vmatmul.bf16.vlgmr.msrb.gmra.mxu1 %v9891_v31  ;;  %v7581_v16 = vld [vmem:[%s11530_s3 + $0x5a8] sm:$0xf0]  ;;  %v2059_v45 = vadd.f32 %v9861_v6, %v323_v3  ;;  %v2061_v50 = vadd.f32 %v2060_v38, %v323_v3  ;;  %v10021_v38 = vadd.f32 %v9776_v17, %v1991_v55 }
 0x145   :  { %4335 = vmatpush.bf16.msra.mxu1 %v6524_v19  ;;  %4301 = vmatmul.bf16.vlgmr.msrb.gmra.mxu2 %v9893_v32  ;;  %v6379_v19 = vld [vmem:[%s11530_s3 + $0x348] sm:$0xf]  ;;  %v6680_v0 = vor.u32 %v7581_v16, %v6679_v15 }
 0x146   :  { %4349 = vmatpush.bf16.msra.mxu2 %v6620_v21  ;;  %4315 = vmatmul.bf16.vlgmr.msrb.gmra.mxu3 %v9901_v12  ;;  %v7506_v21 = vld [vmem:[%s11530_s3 + $0x350] sm:$0xf0]  ;;  %v2073_v54 = vadd.f32 %v9863_v7, %v2059_v45  ;;  %v2317_v7 = vmax.f32 %v10021_v38, 0.0 }
 0x147   :  { %4363 = vmatpush.bf16.msra.mxu3 %v6716_v37  ;;  %v2017_v37 = vadd.f32 %v9680_v10, %v322_v8  ;;  %v6380_v40 = vor.u32 %v7506_v21, %v6379_v19  ;;  %v6572_v10 = vor.u32 %v7554_v30, %v6571_v14  ;;  %v2128_v2 = vpop.f32.mrf.mxu3  ;;  %v7548_v8 = vld [vmem:[%s11530_s3 + $0x4a0] sm:$0xf0]  ;;  %v6452_v21 = vor.u32 %v7524_v57, %v6451_v29  ;;  %v6439_v14 = vld [vmem:[%s11530_s3 + $0x3c0] sm:$0xf]  ;;  %v7521_v30 = vld [vmem:[%s11530_s3 + $0x3c8] sm:$0xf0] }
 0x148   :  { %4322 = vmatpush.bf16.msra.mxu0 %v6416_v24  ;;  %v324_v24 = vperm.slane %v9633_v36, 7  ;;  %v6367_v36 = vld [vmem:[%s11530_s3 + $0x330] sm:$0xf]  ;;  %v6548_v22 = vor.u32 %v7548_v8, %v6547_v5  ;;  %v7662_v45 = vld [vmem:[%s11530_s3 + $0x830] sm:$0xf0] }
 0x149   :  { %4336 = vmatpush.bf16.msra.mxu1 %v6512_v34  ;;  %v6667_v34 = vld [vmem:[%s11530_s3 + $0x588] sm:$0xf]  ;;  %v2031_v6 = vadd.f32 %v9819_v46, %v2017_v37  ;;  %v6464_v46 = vor.u32 %v7527_v51, %v6463_v44  ;;  %v6440_v51 = vor.u32 %v7521_v30, %v6439_v14  ;;  %v7087_v14 = vld [vmem:[%s11530_s3 + $0x8d0] sm:$0xf]  ;;  %v6871_v30 = vld [vmem:[%s11530_s3 + $0x720] sm:$0xf] }
 0x14a   :  { %4350 = vmatpush.bf16.msra.mxu2 %v6608_v35  ;;  %v7578_v35 = vld [vmem:[%s11530_s3 + $0x590] sm:$0xf0]  ;;  %v2114_v39 = vpop.f32.mrf.mxu2  ;;  %v2101_v61 = vadd.f32 %v2100_v18, %v324_v24  ;;  %v7572_v18 = vld [vmem:[%s11530_s3 + $0x560] sm:$0xf0]  ;;  %v7003_v44 = vld [vmem:[%s11530_s3 + $0x828] sm:$0xf] }
 0x14b   :  { %4364 = vmatpush.bf16.msra.mxu3 %v6704_v58  ;;  %v7551_v58 = vld [vmem:[%s11530_s3 + $0x4b8] sm:$0xf0]  ;;  %v6668_v62 = vor.u32 %v7578_v35, %v6667_v34  ;;  %v2102_v4 = vpop.f32.mrf.mxu1  ;;  %v6907_v35 = vld [vmem:[%s11530_s3 + $0x768] sm:$0xf] }
 0x14c   :  { %4323 = vmatpush.bf16.msra.mxu0 %v6404_v60  ;;  %v10017_v60 = vadd.f32 %v9678_v20, %v1989_v23  ;;  %v2033_v20 = vadd.f32 %v9903_v27, %v2019_v43  ;;  %v6560_v17 = vor.u32 %v7551_v58, %v6559_v56  ;;  %v2075_v27 = vadd.f32 %v9930_v13, %v2061_v50  ;;  %v2088_v13 = vpop.f32.mrf.mxu0  ;;  %v7638_v43 = vld [vmem:[%s11530_s3 + $0x770] sm:$0xf0] }
 0x14d   :  { %4337 = vmatpush.bf16.msra.mxu1 %v6500_v1  ;;  %v6368_v1 = vor.u32 %v7503_v41, %v6367_v36  ;;  %v2115_v15 = vadd.f32 %v2114_v39, %v2101_v61  ;;  %v2087_v23 = vadd.f32 %v9966_v42, %v2073_v54  ;;  %v7614_v42 = vld [vmem:[%s11530_s3 + $0x6b0] sm:$0xf0]  ;;  %v6908_v61 = vor.u32 %v7638_v43, %v6907_v35 }
 0x14e   :  { %4351 = vmatpush.bf16.msra.mxu2 %v6596_v28  ;;  %v6655_v28 = vld [vmem:[%s11530_s3 + $0x570] sm:$0xf]  ;;  %v2305_v3 = vmax.f32 %v10017_v60, 0.0  ;;  %v2047_v19 = vadd.f32 %v9905_v33, %v2033_v20  ;;  %v2089_v55 = vadd.f32 %v2088_v13, %v2075_v27  ;;  %v7635_v20 = vld [vmem:[%s11530_s3 + $0x758] sm:$0xf0] }
 0x14f   :  { %4365 = vmatpush.bf16.msra.mxu3 %v6692_v59  ;;  %v10052_v59 = vadd.f32 %v9821_v47, %v2031_v6  ;;  %v6656_v16 = vor.u32 %v7575_v25, %v6655_v28  ;;  %v6343_v47 = vld [vmem:[%s11530_s3 + $0x300] sm:$0xf]  ;;  %v2130_v37 = vpop.f32.mrf.mxu3  ;;  %v2307_v58 = vmax.f32 %v2087_v23, 0.0  ;;  %v7611_v28 = vld [vmem:[%s11530_s3 + $0x698] sm:$0xf0] }
 0x150   :  { %4324 = vmatpush.bf16.msra.mxu0 %v6392_v9  ;;  %v2103_v9 = vadd.f32 %v2102_v4, %v324_v24  ;;  %v6535_v24 = vld [vmem:[%s11530_s3 + $0x480] sm:$0xf]  ;;  %v6344_v41 = vor.u32 %v7497_v53, %v6343_v47  ;;  %v2318_v50 = vmax.f32 %v2047_v19, 0.0  ;;  %v2319_v6 = vmax.f32 %v2089_v55, 0.0  ;;  %v6895_v25 = vld [vmem:[%s11530_s3 + $0x750] sm:$0xf] }
 0x151   :  { %4338 = vmatpush.bf16.msra.mxu1 %v6488_v48  ;;  %v6356_v48 = vor.u32 %v7500_v11, %v6355_v52  ;;  %v6991_v52 = vld [vmem:[%s11530_s3 + $0x810] sm:$0xf]  ;;  %v7659_v11 = vld [vmem:[%s11530_s3 + $0x818] sm:$0xf0]  ;;  %v10126_v29 = vpack.c.bf16 %v2317_v7, %v2305_v3  ;;  %v6896_v8 = vor.u32 %v7635_v20, %v6895_v25  ;;  %v7608_v60 = vld [vmem:[%s11530_s3 + $0x680] sm:$0xf0] }
 0x152   :  { %4352 = vmatpush.bf16.msra.mxu2 %v6584_v63  ;;  %v6643_v63 = vld [vmem:[%s11530_s3 + $0x558] sm:$0xf]  ;;  %v2116_v33 = vpop.f32.mrf.mxu2  ;;  %v10130_v57 = vpack.c.bf16 %v2319_v6, %v2307_v58  ;;  %v7632_v7 = vld [vmem:[%s11530_s3 + $0x740] sm:$0xf0]  ;;  %v6992_v13 = vor.u32 %v7659_v11, %v6991_v52  ;;  %v10164_v47 = vld [vmem:[%s11529_s2 + $0x8] sm:$0xf] }
 0x153   :  { %4366 = vmatpush.bf16.msra.mxu3 %v6680_v0  ;;  %v7545_v0 = vld [vmem:[%s11530_s3 + $0x488] sm:$0xf0]  ;;  %v2117_v34 = vadd.f32 %v2116_v33, %v2103_v9  ;;  %v6644_v36 = vor.u32 %v7572_v18, %v6643_v63  ;;  %v6883_v3 = vld [vmem:[%s11530_s3 + $0x738] sm:$0xf]  ;;  %v7099_v9 = vld [vmem:[%s11530_s3 + $0x8e8] sm:$0xf] }
 0x154   :  { %4325 = vmatpush.bf16.msra.mxu0 %v6380_v40  ;;  %v6811_v40 = vld [vmem:[%s11530_s3 + $0x6a8] sm:$0xf]  ;;  %v6536_v56 = vor.u32 %v7545_v0, %v6535_v24  ;;  %v7656_v63 = vld [vmem:[%s11530_s3 + $0x800] sm:$0xf0]  ;;  %v7605_v53 = vld [vmem:[%s11530_s3 + $0x668] sm:$0xf0] }
 0x155   :  { %4339 = vmatpush.bf16.msra.mxu1 %v6476_v49  ;;  %v2306_v49 = vmax.f32 %v10052_v59, 0.0  ;;  %v2131_v39 = vadd.f32 %v2130_v37, %v2117_v34  ;;  %v6812_v38 = vor.u32 %v7614_v42, %v6811_v40  ;;  %v6787_v59 = vld [vmem:[%s11530_s3 + $0x678] sm:$0xf]  ;;  %v7629_v23 = vld [vmem:[%s11530_s3 + $0x728] sm:$0xf0]  ;;  %v325_v37 = vperm.slane %v10164_v47, 0 }
 0x156   :  { %4353 = vmatpush.bf16.msra.mxu2 %v6572_v10  ;;  %v2129_v10 = vadd.f32 %v2128_v2, %v2115_v15  ;;  %v6631_v2 = vld [vmem:[%s11530_s3 + $0x540] sm:$0xf]  ;;  %v7686_v15 = vld [vmem:[%s11530_s3 + $0x8f0] sm:$0xf0]  ;;  %v6788_v19 = vor.u32 %v7608_v60, %v6787_v59  ;;  %v7683_v33 = vld [vmem:[%s11530_s3 + $0x8d8] sm:$0xf0]  ;;  %v6872_v42 = vor.u32 %v7629_v23, %v6871_v30 }
 0x157   :  { %4367 = vmatpush.bf16.msra.mxu3 %v6668_v62  ;;  %v7569_v62 = vld [vmem:[%s11530_s3 + $0x548] sm:$0xf0]  ;;  %v2320_v4 = vmax.f32 %v2131_v39, 0.0  ;;  %v10128_v54 = vpack.c.bf16 %v2318_v50, %v2306_v49  ;;  %v7100_v18 = vor.u32 %v7686_v15, %v7099_v9  ;;  %v6967_v24 = vld [vmem:[%s11530_s3 + $0x7e0] sm:$0xf]  ;;  %v7088_v40 = vor.u32 %v7683_v33, %v7087_v14 }
 0x158   :  { %4326 = vmatpush.bf16.msra.mxu0 %v6368_v1  ;;  %v6799_v1 = vld [vmem:[%s11530_s3 + $0x690] sm:$0xf]  ;;  %v6632_v27 = vor.u32 %v7569_v62, %v6631_v2  ;;  %v7653_v0 = vld [vmem:[%s11530_s3 + $0x7e8] sm:$0xf0]  ;;  %v6763_v49 = vld [vmem:[%s11530_s3 + $0x648] sm:$0xf] }
 0x159   :  { %4340 = vmatpush.bf16.msra.mxu1 %v6464_v46  ;;  %v7004_v46 = vor.u32 %v7662_v45, %v7003_v44  ;;  %v6800_v5 = vor.u32 %v7611_v28, %v6799_v1  ;;  %v7626_v44 = vld [vmem:[%s11530_s3 + $0x710] sm:$0xf0]  ;;  %v6968_v45 = vor.u32 %v7653_v0, %v6967_v24  ;;  %v7680_v50 = vld [vmem:[%s11530_s3 + $0x8c0] sm:$0xf0]  ;;  %v7063_v62 = vld [vmem:[%s11530_s3 + $0x8a0] sm:$0xf] }
 0x15a   :  { %4354 = vmatpush.bf16.msra.mxu2 %v6560_v17  ;;  %v2308_v17 = vmax.f32 %v2129_v10, 0.0  ;;  %v7602_v10 = vld [vmem:[%s11530_s3 + $0x650] sm:$0xf0]  ;;  %v6847_v28 = vld [vmem:[%s11530_s3 + $0x6f0] sm:$0xf] }
 0x15b   :  { %4368 = vmatpush.bf16.msra.mxu3 %v6656_v16  ;;  %v6764_v58 = vor.u32 %v7602_v10, %v6763_v49  ;;  %v7623_v25 = vld [vmem:[%s11530_s3 + $0x6f8] sm:$0xf0]  ;;  %v6739_v60 = vld [vmem:[%s11530_s3 + $0x618] sm:$0xf]  ;;  %v7620_v9 = vld [vmem:[%s11530_s3 + $0x6e0] sm:$0xf0] }
 0x15c   :  { %4327 = vmatpush.bf16.msra.mxu0 %v6356_v48  ;;  %v10151_v16 = vpack.c.bf16 %v2320_v4, %v2308_v17  ;;  %v6979_v48 = vld [vmem:[%s11530_s3 + $0x7f8] sm:$0xf]  ;;  %v6943_v4 = vld [vmem:[%s11530_s3 + $0x7b0] sm:$0xf]  ;;  %v7647_v52 = vld [vmem:[%s11530_s3 + $0x7b8] sm:$0xf0] }
 0x15d   :  { %4341 = vmatpush.bf16.msra.mxu1 %v6452_v21  ;;  %v6884_v21 = vor.u32 %v7632_v7, %v6883_v3  ;;  %v6980_v55 = vor.u32 %v7656_v63, %v6979_v48  ;;  %v7596_v3 = vld [vmem:[%s11530_s3 + $0x620] sm:$0xf0]  ;;  %v6835_v7 = vld [vmem:[%s11530_s3 + $0x6d8] sm:$0xf]  ;;  %v6944_v15 = vor.u32 %v7647_v52, %v6943_v4  ;;  %v7051_v48 = vld [vmem:[%s11530_s3 + $0x888] sm:$0xf] }
 0x15e   :  { %4355 = vmatpush.bf16.msra.mxu2 %v6548_v22  ;;  %v6775_v22 = vld [vmem:[%s11530_s3 + $0x660] sm:$0xf]  ;;  %v7674_v63 = vld [vmem:[%s11530_s3 + $0x890] sm:$0xf0]  ;;  %v7593_v30 = vld [vmem:[%s11530_s3 + $0x608] sm:$0xf0]  ;;  %v6836_v33 = vor.u32 %v7620_v9, %v6835_v7 }
 0x15f   :  { %4369 = vmatpush.bf16.msra.mxu3 %v6644_v36  ;;  %v6776_v34 = vor.u32 %v7605_v53, %v6775_v22  ;;  %v7075_v36 = vld [vmem:[%s11530_s3 + $0x8b8] sm:$0xf]  ;;  %v7052_v22 = vor.u32 %v7674_v63, %v7051_v48  ;;  %v6727_v14 = vld [vmem:[%s11530_s3 + $0x600] sm:$0xf]  ;;  %v7421_v24 = vld [vmem:[%s11530_s3 + $0xac] sm:$0xf] }
 0x160   :  { %4328 = vmatpush.bf16.msra.mxu0 %v6344_v41  ;;  %v2142_v35 = vpop.f32.mrf.mxu0  ;;  %v6859_v41 = vld [vmem:[%s11530_s3 + $0x708] sm:$0xf]  ;;  %v7076_v2 = vor.u32 %v7680_v50, %v7075_v36  ;;  %v6823_v23 = vld [vmem:[%s11530_s3 + $0x6c0] sm:$0xf]  ;;  %v6045_v0 = vld [vmem:[%s11530_s3 + $0xb4] sm:$0xf0] }
 0x161   :  { %4342 = vmatpush.bf16.msra.mxu1 %v6440_v51  ;;  %v2156_v43 = vpop.f32.mrf.mxu1  ;;  %v2143_v39 = vadd.f32 %v2142_v35, %v325_v37  ;;  %v6955_v51 = vld [vmem:[%s11530_s3 + $0x7c8] sm:$0xf]  ;;  %v6860_v6 = vor.u32 %v7626_v44, %v6859_v41  ;;  %v7039_v35 = vld [vmem:[%s11530_s3 + $0x870] sm:$0xf]  ;;  %v6141_v36 = vld [vmem:[%s11530_s3 + $0x174] sm:$0xf0] }
 0x162   :  { %4356 = vmatpush.bf16.msra.mxu2 %v6536_v56  ;;  %v7650_v56 = vld [vmem:[%s11530_s3 + $0x7d0] sm:$0xf0]  ;;  %v6919_v41 = vld [vmem:[%s11530_s3 + $0x780] sm:$0xf]  ;;  %v7469_v50 = vld [vmem:[%s11530_s3 + $0x22c] sm:$0xf] }
 0x163   :  { %4329 = vmatmul.bf16.vlgmr.msra.gmra.mxu0 %v10126_v29  ;;  %4370 = vmatpush.bf16.msra.mxu3 %v6632_v27  ;;  %v6956_v20 = vor.u32 %v7650_v56, %v6955_v51  ;;  %v2157_v17 = vadd.f32 %v2156_v43, %v2143_v39  ;;  %v7671_v43 = vld [vmem:[%s11530_s3 + $0x878] sm:$0xf0]  ;;  %v6237_v39 = vld [vmem:[%s11530_s3 + $0x234] sm:$0xf0]  ;;  %v6728_v56 = vor.u32 %v7593_v30, %v6727_v14  ;;  %v7466_v52 = vld [vmem:[%s11530_s3 + $0x214] sm:$0xf] }
 0x164   :  { %4377 = vmatpush.bf16.msrb.mxu0 %v6812_v38  ;;  %4343 = vmatmul.bf16.vlgmr.msra.gmra.mxu1 %v10128_v54  ;;  %v6751_v38 = vld [vmem:[%s11530_s3 + $0x630] sm:$0xf]  ;;  %v7040_v44 = vor.u32 %v7671_v43, %v7039_v35  ;;  %v6240_v4 = vor.u32 %v7469_v50, %v6237_v39  ;;  %v6021_v7 = vld [vmem:[%s11530_s3 + $0x84] sm:$0xf0]  ;;  %v7493_v48 = vld [vmem:[%s11530_s3 + $0x2ec] sm:$0xf] }
 0x165   :  { %4391 = vmatpush.bf16.msrb.mxu1 %v6908_v61  ;;  %4357 = vmatmul.bf16.vlgmr.msra.gmra.mxu2 %v10130_v57  ;;  %v7599_v61 = vld [vmem:[%s11530_s3 + $0x638] sm:$0xf0]  ;;  %v6117_v9 = vld [vmem:[%s11530_s3 + $0x144] sm:$0xf0]  ;;  %v7460_v35 = vld [vmem:[%s11530_s3 + $0x1e4] sm:$0xf] }
 0x166   :  { %4405 = vmatpush.bf16.msrb.mxu2 %v7004_v46  ;;  %4371 = vmatmul.bf16.vlgmr.msra.gmra.mxu3 %v10151_v16  ;;  %v7677_v46 = vld [vmem:[%s11530_s3 + $0x8a8] sm:$0xf0]  ;;  %v6752_v27 = vor.u32 %v7599_v61, %v6751_v38  ;;  %v6048_v38 = vor.u32 %v7421_v24, %v6045_v0  ;;  %v6105_v24 = vld [vmem:[%s11530_s3 + $0x12c] sm:$0xf0]  ;;  %v6321_v0 = vld [vmem:[%s11530_s3 + $0x2dc] sm:$0xf0] }
 0x167   :  { %4419 = vmatpush.bf16.msrb.mxu3 %v7100_v18  ;;  %v7064_v11 = vor.u32 %v7677_v46, %v7063_v62  ;;  %v7418_v62 = vld [vmem:[%s11530_s3 + $0x94] sm:$0xf]  ;;  %v6201_v43 = vld [vmem:[%s11530_s3 + $0x1ec] sm:$0xf0]  ;;  %v6093_v39 = vld [vmem:[%s11530_s3 + $0x114] sm:$0xf0] }
 0x168   :  { %4378 = vmatpush.bf16.msrb.mxu0 %v6800_v5  ;;  %v6848_v5 = vor.u32 %v7623_v25, %v6847_v28  ;;  %v7442_v28 = vld [vmem:[%s11530_s3 + $0x154] sm:$0xf]  ;;  %v6129_v25 = vld [vmem:[%s11530_s3 + $0x15c] sm:$0xf0] }
 0x169   :  { %4392 = vmatpush.bf16.msrb.mxu1 %v6896_v8  ;;  %v2144_v8 = vpop.f32.mrf.mxu0  ;;  %v2158_v59 = vpop.f32.mrf.mxu1 }
 0x16a   :  { %4406 = vmatpush.bf16.msrb.mxu2 %v6992_v13  ;;  %v2170_v1 = vpop.f32.mrf.mxu2  ;;  %v2145_v13 = vadd.f32 %v2144_v8, %v325_v37  ;;  %v7617_v37 = vld [vmem:[%s11530_s3 + $0x6c8] sm:$0xf0] }
 0x16b   :  { %4420 = vmatpush.bf16.msrb.mxu3 %v7088_v40  ;;  %v2171_v18 = vadd.f32 %v2170_v1, %v2157_v17  ;;  %v6033_v1 = vld [vmem:[%s11530_s3 + $0x9c] sm:$0xf0] }
 0x16c   :  { %4379 = vmatpush.bf16.msrb.mxu0 %v6788_v19  ;;  %v6931_v19 = vld [vmem:[%s11530_s3 + $0x798] sm:$0xf]  ;;  %v2159_v53 = vadd.f32 %v2158_v59, %v2145_v13  ;;  %v6036_v8 = vor.u32 %v7418_v62, %v6033_v1  ;;  %v6132_v59 = vor.u32 %v7442_v28, %v6129_v25  ;;  %v7439_v13 = vld [vmem:[%s11530_s3 + $0x13c] sm:$0xf]  ;;  %v7406_v25 = vld [vmem:[%s11530_s3 + $0x34] sm:$0xf] }
 0x16d   :  { %4393 = vmatpush.bf16.msrb.mxu1 %v6884_v21  ;;  %v7644_v21 = vld [vmem:[%s11530_s3 + $0x7a0] sm:$0xf0]  ;;  %v2309_v49 = vmax.f32 %v2171_v18, 0.0  ;;  %v6333_v18 = vld [vmem:[%s11530_s3 + $0x2f4] sm:$0xf0]  ;;  %v6120_v30 = vor.u32 %v7439_v13, %v6117_v9 }
 0x16e   :  { %4407 = vmatpush.bf16.msrb.mxu2 %v6980_v55  ;;  %v6740_v55 = vor.u32 %v7596_v3, %v6739_v60  ;;  %v2184_v60 = vpop.f32.mrf.mxu3  ;;  %v7415_v3 = vld [vmem:[%s11530_s3 + $0x7c] sm:$0xf]  ;;  %v6189_v62 = vld [vmem:[%s11530_s3 + $0x1d4] sm:$0xf0] }
 0x16f   :  { %4421 = vmatpush.bf16.msrb.mxu3 %v7076_v2  ;;  %v6824_v2 = vor.u32 %v7617_v37, %v6823_v23  ;;  %v6024_v14 = vor.u32 %v7415_v3, %v6021_v7  ;;  %v7412_v23 = vld [vmem:[%s11530_s3 + $0x64] sm:$0xf]  ;;  %v6177_v3 = vld [vmem:[%s11530_s3 + $0x1bc] sm:$0xf0] }
 0x170   :  { %4380 = vmatpush.bf16.msrb.mxu0 %v6776_v34  ;;  %v7445_v34 = vld [vmem:[%s11530_s3 + $0x16c] sm:$0xf]  ;;  %v7436_v37 = vld [vmem:[%s11530_s3 + $0x124] sm:$0xf] }
 0x171   :  { %4394 = vmatpush.bf16.msrb.mxu1 %v6872_v42  ;;  %v6932_v42 = vor.u32 %v7644_v21, %v6931_v19  ;;  %v6144_v61 = vor.u32 %v7445_v34, %v6141_v36  ;;  %v326_v19 = vperm.slane %v10164_v47, 1  ;;  %v7463_v21 = vld [vmem:[%s11530_s3 + $0x1fc] sm:$0xf]  ;;  %v6108_v36 = vor.u32 %v7436_v37, %v6105_v24  ;;  %v5961_v37 = vld [vmem:[%s11530_s3 + $0xc] sm:$0xf0] }
 0x172   :  { %4408 = vmatpush.bf16.msrb.mxu2 %v6968_v45  ;;  %v2172_v40 = vpop.f32.mrf.mxu2  ;;  %v7641_v45 = vld [vmem:[%s11530_s3 + $0x788] sm:$0xf0]  ;;  %v7451_v24 = vld [vmem:[%s11530_s3 + $0x19c] sm:$0xf] }
 0x173   :  { %4422 = vmatpush.bf16.msrb.mxu3 %v7064_v11  ;;  %v2173_v10 = vadd.f32 %v2172_v40, %v2159_v53  ;;  %v6225_v11 = vld [vmem:[%s11530_s3 + $0x21c] sm:$0xf0]  ;;  %v6336_v53 = vor.u32 %v7493_v48, %v6333_v18  ;;  %v5973_v48 = vld [vmem:[%s11530_s3 + $0x24] sm:$0xf0] }
 0x174   :  { %4381 = vmatpush.bf16.msrb.mxu0 %v6764_v58  ;;  %v7027_v58 = vld [vmem:[%s11530_s3 + $0x858] sm:$0xf]  ;;  %v6228_v63 = vor.u32 %v7466_v52, %v6225_v11  ;;  %v7430_v52 = vld [vmem:[%s11530_s3 + $0xf4] sm:$0xf]  ;;  %v6081_v11 = vld [vmem:[%s11530_s3 + $0xfc] sm:$0xf0] }
 0x175   :  { %4395 = vmatpush.bf16.msrb.mxu1 %v6860_v6  ;;  %v2321_v51 = vmax.f32 %v2173_v10, 0.0  ;;  %v7668_v6 = vld [vmem:[%s11530_s3 + $0x860] sm:$0xf0]  ;;  %v6084_v9 = vor.u32 %v7430_v52, %v6081_v11 }
 0x176   :  { %4409 = vmatpush.bf16.msrb.mxu2 %v6956_v20  ;;  %v6920_v20 = vor.u32 %v7641_v45, %v6919_v41  ;;  %v7028_v46 = vor.u32 %v7668_v6, %v7027_v58  ;;  %v7409_v41 = vld [vmem:[%s11530_s3 + $0x4c] sm:$0xf]  ;;  %v6204_v58 = vor.u32 %v7460_v35, %v6201_v43  ;;  %v6057_v35 = vld [vmem:[%s11530_s3 + $0xcc] sm:$0xf0] }
 0x177   :  { %4423 = vmatpush.bf16.msrb.mxu3 %v7052_v22  ;;  %v10324_v17 = vpack.c.bf16 %v2321_v51, %v2309_v49  ;;  %v6213_v22 = vld [vmem:[%s11530_s3 + $0x204] sm:$0xf0]  ;;  %v7433_v45 = vld [vmem:[%s11530_s3 + $0x10c] sm:$0xf]  ;;  %v7487_v51 = vld [vmem:[%s11530_s3 + $0x2bc] sm:$0xf] }
 0x178   :  { %4382 = vmatpush.bf16.msrb.mxu0 %v6752_v27  ;;  %v7015_v27 = vld [vmem:[%s11530_s3 + $0x840] sm:$0xf]  ;;  %v6216_v40 = vor.u32 %v7463_v21, %v6213_v22  ;;  %v6096_v28 = vor.u32 %v7433_v45, %v6093_v39  ;;  %v6069_v21 = vld [vmem:[%s11530_s3 + $0xe4] sm:$0xf0]  ;;  %v7481_v22 = vld [vmem:[%s11530_s3 + $0x28c] sm:$0xf] }
 0x179   :  { %4396 = vmatpush.bf16.msrb.mxu1 %v6848_v5  ;;  %v7665_v5 = vld [vmem:[%s11530_s3 + $0x848] sm:$0xf0]  ;;  %v6525_v45 = vld [vmem:[%s11530_s3 + $0x474] sm:$0xf0] }
 0x17a   :  { %4410 = vmatpush.bf16.msrb.mxu2 %v6944_v15  ;;  %v7016_v15 = vor.u32 %v7665_v5, %v7015_v27  ;;  %v6297_v27 = vld [vmem:[%s11530_s3 + $0x2ac] sm:$0xf0]  ;;  %v7517_v43 = vld [vmem:[%s11530_s3 + $0x3ac] sm:$0xf] }
 0x17b   :  { %4424 = vmatpush.bf16.msrb.mxu3 %v7040_v44  ;;  %v5997_v44 = vld [vmem:[%s11530_s3 + $0x54] sm:$0xf0] }
 0x17c   :  { %4383 = vmatpush.bf16.msrb.mxu0 %v6740_v55  ;;  %v6009_v55 = vld [vmem:[%s11530_s3 + $0x6c] sm:$0xf0]  ;;  %v6000_v1 = vor.u32 %v7409_v41, %v5997_v44  ;;  %v6429_v41 = vld [vmem:[%s11530_s3 + $0x3b4] sm:$0xf0]  ;;  %v7541_v44 = vld [vmem:[%s11530_s3 + $0x46c] sm:$0xf] }
 0x17d   :  { %4397 = vmatpush.bf16.msrb.mxu1 %v6836_v33  ;;  %v7490_v33 = vld [vmem:[%s11530_s3 + $0x2d4] sm:$0xf]  ;;  %v6012_v10 = vor.u32 %v7412_v23, %v6009_v55 }
 0x17e   :  { %4411 = vmatpush.bf16.msrb.mxu2 %v6932_v42  ;;  %v6324_v34 = vor.u32 %v7490_v33, %v6321_v0  ;;  %v2185_v42 = vadd.f32 %v2184_v60, %v326_v19  ;;  %v7454_v60 = vld [vmem:[%s11530_s3 + $0x1b4] sm:$0xf]  ;;  %v7400_v33 = vld [vmem:[%s11530_s3 + $0x4] sm:$0xf]  ;;  %v6165_v0 = vld [vmem:[%s11530_s3 + $0x1a4] sm:$0xf0] }
 0x17f   :  { %4425 = vmatpush.bf16.msrb.mxu3 %v7028_v46  ;;  %v7484_v46 = vld [vmem:[%s11530_s3 + $0x2a4] sm:$0xf] }
 0x180   :  { %4384 = vmatpush.bf16.msrb.mxu0 %v6728_v56  ;;  %v2198_v49 = vpop.f32.mrf.mxu0  ;;  %v6309_v56 = vld [vmem:[%s11530_s3 + $0x2c4] sm:$0xf0] }
 0x181   :  { %4398 = vmatpush.bf16.msrb.mxu1 %v6824_v2  ;;  %v2212_v50 = vpop.f32.mrf.mxu1  ;;  %v2186_v2 = vpop.f32.mrf.mxu3  ;;  %v6312_v6 = vor.u32 %v7487_v51, %v6309_v56  ;;  %v7448_v56 = vld [vmem:[%s11530_s3 + $0x184] sm:$0xf] }
 0x182   :  { %4412 = vmatpush.bf16.msrb.mxu2 %v6920_v20  ;;  %v5985_v20 = vld [vmem:[%s11530_s3 + $0x3c] sm:$0xf0] }
 0x183   :  { %4385 = vmatmul.bf16.vlgmr.msrb.gmra.mxu0 %v10324_v17  ;;  %4426 = vmatpush.bf16.msrb.mxu3 %v7016_v15  ;;  %v5988_v13 = vor.u32 %v7406_v25, %v5985_v20  ;;  %v7403_v15 = vld [vmem:[%s11530_s3 + $0x1c] sm:$0xf]  ;;  %v6417_v25 = vld [vmem:[%s11530_s3 + $0x39c] sm:$0xf0]  ;;  %v7538_v20 = vld [vmem:[%s11530_s3 + $0x454] sm:$0xf] }
 0x184   :  { %4433 = vmatpush.bf16.msra.mxu0 %v6048_v38  ;;  %v2199_v38 = vadd.f32 %v2198_v49, %v2185_v42  ;;  %v7424_v42 = vld [vmem:[%s11530_s3 + $0xc4] sm:$0xf] }
 0x185   :  { %4447 = vmatpush.bf16.msra.mxu1 %v6144_v61  ;;  %v7457_v61 = vld [vmem:[%s11530_s3 + $0x1cc] sm:$0xf] }
 0x186   :  { %4461 = vmatpush.bf16.msra.mxu2 %v6240_v4  ;;  %v2187_v4 = vadd.f32 %v2186_v2, %v326_v19  ;;  %v6192_v5 = vor.u32 %v7457_v61, %v6189_v62  ;;  %v6153_v2 = vld [vmem:[%s11530_s3 + $0x18c] sm:$0xf0]  ;;  %v6261_v61 = vld [vmem:[%s11530_s3 + $0x264] sm:$0xf0]  ;;  %v6432_v62 = vor.u32 %v7517_v43, %v6429_v41  ;;  %v328_v41 = vperm.slane %v10164_v47, 3 }
 0x187   :  { %4475 = vmatpush.bf16.msra.mxu3 %v6336_v53  ;;  %v6285_v53 = vld [vmem:[%s11530_s3 + $0x294] sm:$0xf0] }
 0x188   :  { %4434 = vmatpush.bf16.msra.mxu0 %v6036_v8  ;;  %v6300_v8 = vor.u32 %v7484_v46, %v6297_v27  ;;  %v2200_v7 = vpop.f32.mrf.mxu0  ;;  %v6513_v46 = vld [vmem:[%s11530_s3 + $0x45c] sm:$0xf0] }
 0x189   :  { %4448 = vmatpush.bf16.msra.mxu1 %v6132_v59  ;;  %v2213_v59 = vadd.f32 %v2212_v50, %v2199_v38  ;;  %v2201_v18 = vadd.f32 %v2200_v7, %v2187_v4  ;;  %v2214_v19 = vpop.f32.mrf.mxu1  ;;  %v6168_v50 = vor.u32 %v7451_v24, %v6165_v0  ;;  %v7475_v38 = vld [vmem:[%s11530_s3 + $0x25c] sm:$0xf]  ;;  %v6156_v4 = vor.u32 %v7448_v56, %v6153_v2  ;;  %v2240_v27 = vpop.f32.mrf.mxu3  ;;  %v6405_v7 = vld [vmem:[%s11530_s3 + $0x384] sm:$0xf0]  ;;  %v6381_v24 = vld [vmem:[%s11530_s3 + $0x354] sm:$0xf0] }
 0x18a   :  { %4462 = vmatpush.bf16.msra.mxu2 %v6228_v63  ;;  %v7427_v63 = vld [vmem:[%s11530_s3 + $0xdc] sm:$0xf]  ;;  %v6264_v52 = vor.u32 %v7475_v38, %v6261_v61  ;;  %v2226_v11 = vpop.f32.mrf.mxu2  ;;  %v7529_v0 = vld [vmem:[%s11530_s3 + $0x40c] sm:$0xf] }
 0x18b   :  { %4476 = vmatpush.bf16.msra.mxu3 %v6324_v34  ;;  %v2310_v23 = vmax.f32 %v2213_v59, 0.0  ;;  %v2215_v55 = vadd.f32 %v2214_v19, %v2201_v18  ;;  %v6072_v34 = vor.u32 %v7427_v63, %v6069_v21  ;;  %v7508_v18 = vld [vmem:[%s11530_s3 + $0x364] sm:$0xf]  ;;  %v6393_v19 = vld [vmem:[%s11530_s3 + $0x36c] sm:$0xf0] }
 0x18c   :  { %4435 = vmatpush.bf16.msra.mxu0 %v6024_v14  ;;  %v6180_v14 = vor.u32 %v7454_v60, %v6177_v3  ;;  %v6516_v60 = vor.u32 %v7538_v20, %v6513_v46  ;;  %v7511_v3 = vld [vmem:[%s11530_s3 + $0x37c] sm:$0xf]  ;;  %v7532_v21 = vld [vmem:[%s11530_s3 + $0x424] sm:$0xf]  ;;  %v7565_v46 = vld [vmem:[%s11530_s3 + $0x52c] sm:$0xf] }
 0x18d   :  { %4449 = vmatpush.bf16.msra.mxu1 %v6120_v30  ;;  %v6288_v30 = vor.u32 %v7481_v22, %v6285_v53  ;;  %v2322_v49 = vmax.f32 %v2215_v55, 0.0  ;;  %v6489_v22 = vld [vmem:[%s11530_s3 + $0x42c] sm:$0xf0]  ;;  %v327_v53 = vperm.slane %v10164_v47, 2  ;;  %v7505_v55 = vld [vmem:[%s11530_s3 + $0x34c] sm:$0xf] }
 0x18e   :  { %4463 = vmatpush.bf16.msra.mxu2 %v6216_v40  ;;  %v5976_v40 = vor.u32 %v7403_v15, %v5973_v48  ;;  %v6408_v48 = vor.u32 %v7511_v3, %v6405_v7  ;;  %v6384_v43 = vor.u32 %v7505_v55, %v6381_v24  ;;  %v7499_v47 = vld [vmem:[%s11530_s3 + $0x31c] sm:$0xf]  ;;  %v7520_v7 = vld [vmem:[%s11530_s3 + $0x3c4] sm:$0xf] }
 0x18f   :  { %4477 = vmatpush.bf16.msra.mxu3 %v6312_v6  ;;  %v10490_v51 = vpack.c.bf16 %v2322_v49, %v2310_v23  ;;  %v6060_v6 = vor.u32 %v7424_v42, %v6057_v35  ;;  %v6492_v23 = vor.u32 %v7532_v21, %v6489_v22  ;;  %v7562_v22 = vld [vmem:[%s11530_s3 + $0x514] sm:$0xf] }
 0x190   :  { %4436 = vmatpush.bf16.msra.mxu0 %v6012_v10  ;;  %v7478_v10 = vld [vmem:[%s11530_s3 + $0x274] sm:$0xf] }
 0x191   :  { %4450 = vmatpush.bf16.msra.mxu1 %v6108_v36  ;;  %v6273_v36 = vld [vmem:[%s11530_s3 + $0x27c] sm:$0xf0] }
 0x192   :  { %4464 = vmatpush.bf16.msra.mxu2 %v6204_v58  ;;  %v6276_v39 = vor.u32 %v7478_v10, %v6273_v36  ;;  %v5964_v58 = vor.u32 %v7400_v33, %v5961_v37  ;;  %4399 = vmatmul.bf16.vlgmr.msrb.gmra.mxu1 %v10490_v51  ;;  %v2242_v33 = vpop.f32.mrf.mxu3  ;;  %v7502_v10 = vld [vmem:[%s11530_s3 + $0x334] sm:$0xf]  ;;  %v6369_v36 = vld [vmem:[%s11530_s3 + $0x33c] sm:$0xf0] }
 0x193   :  { %4478 = vmatpush.bf16.msra.mxu3 %v6300_v8  ;;  %v6249_v8 = vld [vmem:[%s11530_s3 + $0x24c] sm:$0xf0] }
 0x194   :  { %4437 = vmatpush.bf16.msra.mxu0 %v6000_v1  ;;  %v6528_v1 = vor.u32 %v7541_v44, %v6525_v45  ;;  %v7526_v44 = vld [vmem:[%s11530_s3 + $0x3f4] sm:$0xf]  ;;  %v6465_v45 = vld [vmem:[%s11530_s3 + $0x3fc] sm:$0xf0] }
 0x195   :  { %4451 = vmatpush.bf16.msra.mxu1 %v6096_v28  ;;  %v7514_v28 = vld [vmem:[%s11530_s3 + $0x394] sm:$0xf] }
 0x196   :  { %4465 = vmatpush.bf16.msra.mxu2 %v6192_v5  ;;  %v7472_v5 = vld [vmem:[%s11530_s3 + $0x244] sm:$0xf]  ;;  %v6420_v59 = vor.u32 %v7514_v28, %v6417_v25  ;;  %v7523_v28 = vld [vmem:[%s11530_s3 + $0x3dc] sm:$0xf]  ;;  %v6453_v25 = vld [vmem:[%s11530_s3 + $0x3e4] sm:$0xf0] }
 0x197   :  { %4479 = vmatpush.bf16.msra.mxu3 %v6288_v30  ;;  %v6252_v15 = vor.u32 %v7472_v5, %v6249_v8  ;;  %v6396_v30 = vor.u32 %v7508_v18, %v6393_v19  ;;  %v6456_v8 = vor.u32 %v7523_v28, %v6453_v25  ;;  %v7637_v18 = vld [vmem:[%s11530_s3 + $0x76c] sm:$0xf]  ;;  %v6909_v19 = vld [vmem:[%s11530_s3 + $0x774] sm:$0xf0]  ;;  %v6585_v28 = vld [vmem:[%s11530_s3 + $0x4ec] sm:$0xf0] }
 0x198   :  { %4438 = vmatpush.bf16.msra.mxu0 %v5988_v13  ;;  %v7535_v13 = vld [vmem:[%s11530_s3 + $0x43c] sm:$0xf]  ;;  %v6912_v24 = vor.u32 %v7637_v18, %v6909_v19  ;;  %v7586_v25 = vld [vmem:[%s11530_s3 + $0x5d4] sm:$0xf]  ;;  %v6765_v18 = vld [vmem:[%s11530_s3 + $0x654] sm:$0xf0] }
 0x199   :  { %4452 = vmatpush.bf16.msra.mxu1 %v6084_v9  ;;  %v6501_v9 = vld [vmem:[%s11530_s3 + $0x444] sm:$0xf0]  ;;  %v7625_v19 = vld [vmem:[%s11530_s3 + $0x70c] sm:$0xf] }
 0x19a   :  { %4466 = vmatpush.bf16.msra.mxu2 %v6180_v14  ;;  %v6504_v63 = vor.u32 %v7535_v13, %v6501_v9  ;;  %v2228_v14 = vpop.f32.mrf.mxu2  ;;  %v6441_v13 = vld [vmem:[%s11530_s3 + $0x3cc] sm:$0xf0]  ;;  %v7613_v9 = vld [vmem:[%s11530_s3 + $0x6ac] sm:$0xf] }
 0x19b   :  { %4480 = vmatpush.bf16.msra.mxu3 %v6276_v39  ;;  %v2229_v35 = vadd.f32 %v2228_v14, %v327_v53  ;;  %v6372_v39 = vor.u32 %v7502_v10, %v6369_v36  ;;  %v7559_v10 = vld [vmem:[%s11530_s3 + $0x4fc] sm:$0xf]  ;;  %v6597_v36 = vld [vmem:[%s11530_s3 + $0x504] sm:$0xf0] }
 0x19c   :  { %4439 = vmatpush.bf16.msra.mxu0 %v5976_v40  ;;  %v6477_v40 = vld [vmem:[%s11530_s3 + $0x414] sm:$0xf0] }
 0x19d   :  { %4453 = vmatpush.bf16.msra.mxu1 %v6072_v34  ;;  %v2227_v34 = vadd.f32 %v2226_v11, %v327_v53  ;;  %v6480_v49 = vor.u32 %v7529_v0, %v6477_v40  ;;  %v2243_v56 = vadd.f32 %v2242_v33, %v2229_v35  ;;  %v6609_v53 = vld [vmem:[%s11530_s3 + $0x51c] sm:$0xf0]  ;;  %v7610_v0 = vld [vmem:[%s11530_s3 + $0x694] sm:$0xf] }
 0x19e   :  { %4467 = vmatpush.bf16.msra.mxu2 %v6168_v50  ;;  %v7634_v35 = vld [vmem:[%s11530_s3 + $0x754] sm:$0xf] }
 0x19f   :  { %4481 = vmatpush.bf16.msra.mxu3 %v6264_v52  ;;  %v2241_v50 = vadd.f32 %v2240_v27, %v2227_v34  ;;  %v6612_v34 = vor.u32 %v7562_v22, %v6609_v53 }
 0x1a0   :  { %4440 = vmatpush.bf16.msra.mxu0 %v5964_v58  ;;  %v2254_v37 = vpop.f32.mrf.mxu0 }
 0x1a1   :  { %4454 = vmatpush.bf16.msra.mxu1 %v6060_v6  ;;  %v2268_v42 = vpop.f32.mrf.mxu1  ;;  %v2255_v2 = vadd.f32 %v2254_v37, %v2241_v50  ;;  %v6468_v6 = vor.u32 %v7526_v44, %v6465_v45  ;;  %v6717_v44 = vld [vmem:[%s11530_s3 + $0x5f4] sm:$0xf0] }
 0x1a2   :  { %4468 = vmatpush.bf16.msra.mxu2 %v6156_v4  ;;  %v2269_v38 = vadd.f32 %v2268_v42, %v328_v41  ;;  %v6621_v4 = vld [vmem:[%s11530_s3 + $0x534] sm:$0xf0]  ;;  %v6801_v42 = vld [vmem:[%s11530_s3 + $0x69c] sm:$0xf0] }
 0x1a3   :  { %4441 = vmatmul.bf16.vlgmr.msra.gmra.mxu0 %v9889_v26  ;;  %4482 = vmatpush.bf16.msra.mxu3 %v6252_v15  ;;  %v2311_v52 = vmax.f32 %v2255_v2, 0.0  ;;  %v7607_v2 = vld [vmem:[%s11530_s3 + $0x67c] sm:$0xf] }
 0x1a4   :  { %4489 = vmatpush.bf16.msrb.mxu0 %v6432_v62  ;;  %4455 = vmatmul.bf16.vlgmr.msra.gmra.mxu1 %v9891_v31 }
 0x1a5   :  { %4503 = vmatpush.bf16.msrb.mxu1 %v6528_v1  ;;  %v6357_v1 = vld [vmem:[%s11530_s3 + $0x324] sm:$0xf0] }
 0x1a6   :  { %v6360_v5 = vor.u32 %v7499_v47, %v6357_v1  ;;  %v7631_v47 = vld [vmem:[%s11530_s3 + $0x73c] sm:$0xf]  ;;  %v7556_v1 = vld [vmem:[%s11530_s3 + $0x4e4] sm:$0xf] }
 0x1a8   :  { %4490 = vmatpush.bf16.msrb.mxu0 %v6420_v59  ;;  %v2256_v62 = vpop.f32.mrf.mxu0  ;;  %v7496_v59 = vld [vmem:[%s11530_s3 + $0x304] sm:$0xf] }
 0x1a9   :  { %4504 = vmatpush.bf16.msrb.mxu1 %v6516_v60  ;;  %v2296_v61 = vpop.f32.mrf.mxu3  ;;  %v2257_v20 = vadd.f32 %v2256_v62, %v2243_v56  ;;  %v2270_v27 = vpop.f32.mrf.mxu1  ;;  %v6345_v60 = vld [vmem:[%s11530_s3 + $0x30c] sm:$0xf0] }
 0x1aa   :  { %v2282_v58 = vpop.f32.mrf.mxu2  ;;  %v2271_v21 = vadd.f32 %v2270_v27, %v328_v41  ;;  %v7589_v41 = vld [vmem:[%s11530_s3 + $0x5ec] sm:$0xf]  ;;  %v6777_v27 = vld [vmem:[%s11530_s3 + $0x66c] sm:$0xf0] }
 0x1ab   :  { %v2323_v11 = vmax.f32 %v2257_v20, 0.0  ;;  %v2283_v3 = vadd.f32 %v2282_v58, %v2269_v38  ;;  %v6600_v58 = vor.u32 %v7559_v10, %v6597_v36  ;;  %v6885_v38 = vld [vmem:[%s11530_s3 + $0x744] sm:$0xf0]  ;;  %v6720_v62 = vor.u32 %v7589_v41, %v6717_v44  ;;  %v6705_v20 = vld [vmem:[%s11530_s3 + $0x5dc] sm:$0xf0] }
 0x1ac   :  { %4491 = vmatpush.bf16.msrb.mxu0 %v6408_v48  ;;  %v6624_v48 = vor.u32 %v7565_v46, %v6621_v4  ;;  %v6888_v4 = vor.u32 %v7631_v47, %v6885_v38  ;;  %v7577_v10 = vld [vmem:[%s11530_s3 + $0x58c] sm:$0xf]  ;;  %v6669_v36 = vld [vmem:[%s11530_s3 + $0x594] sm:$0xf0]  ;;  %v6537_v47 = vld [vmem:[%s11530_s3 + $0x48c] sm:$0xf0] }
 0x1ad   :  { %4505 = vmatpush.bf16.msrb.mxu1 %v6504_v63  ;;  %v10608_v15 = vpack.c.bf16 %v2323_v11, %v2311_v52  ;;  %v6813_v63 = vld [vmem:[%s11530_s3 + $0x6b4] sm:$0xf0]  ;;  %v2297_v55 = vadd.f32 %v2296_v61, %v2283_v3  ;;  %v7604_v52 = vld [vmem:[%s11530_s3 + $0x664] sm:$0xf]  ;;  %v6588_v11 = vor.u32 %v7556_v1, %v6585_v28  ;;  %v7574_v38 = vld [vmem:[%s11530_s3 + $0x574] sm:$0xf] }
 0x1ae   :  { %v6816_v37 = vor.u32 %v7613_v9, %v6813_v63  ;;  %v6573_v3 = vld [vmem:[%s11530_s3 + $0x4d4] sm:$0xf0]  ;;  %v6780_v9 = vor.u32 %v7604_v52, %v6777_v27  ;;  %v7601_v63 = vld [vmem:[%s11530_s3 + $0x64c] sm:$0xf]  ;;  %v7616_v52 = vld [vmem:[%s11530_s3 + $0x6c4] sm:$0xf] }
 0x1af   :  { %4413 = vmatmul.bf16.vlgmr.msrb.gmra.mxu2 %v10608_v15  ;;  %v2312_v45 = vmax.f32 %v2297_v55, 0.0  ;;  %v6681_v55 = vld [vmem:[%s11530_s3 + $0x5ac] sm:$0xf0] }
 0x1b0   :  { %4492 = vmatpush.bf16.msrb.mxu0 %v6396_v30  ;;  %v6348_v30 = vor.u32 %v7496_v59, %v6345_v60  ;;  %4517 = vmatpush.bf16.msrb.mxu2 %v6624_v48  ;;  %v6708_v59 = vor.u32 %v7586_v25, %v6705_v20  ;;  %v7553_v60 = vld [vmem:[%s11530_s3 + $0x4cc] sm:$0xf]  ;;  %v7005_v20 = vld [vmem:[%s11530_s3 + $0x834] sm:$0xf0] }
 0x1b1   :  { %4506 = vmatpush.bf16.msrb.mxu1 %v6492_v23  ;;  %v6444_v23 = vor.u32 %v7520_v7, %v6441_v13  ;;  %v2298_v40 = vpop.f32.mrf.mxu3  ;;  %v7583_v7 = vld [vmem:[%s11530_s3 + $0x5bc] sm:$0xf]  ;;  %v6693_v13 = vld [vmem:[%s11530_s3 + $0x5c4] sm:$0xf0]  ;;  %v6576_v22 = vor.u32 %v7553_v60, %v6573_v3  ;;  %v7661_v25 = vld [vmem:[%s11530_s3 + $0x82c] sm:$0xf] }
 0x1b2   :  { %v2284_v14 = vpop.f32.mrf.mxu2  ;;  %v6696_v53 = vor.u32 %v7583_v7, %v6693_v13  ;;  %v7423_v60 = vld [vmem:[%s11530_s3 + $0xb8] sm:$0xf0]  ;;  %v7008_v3 = vor.u32 %v7661_v25, %v7005_v20  ;;  %v6645_v7 = vld [vmem:[%s11530_s3 + $0x564] sm:$0xf0]  ;;  %v6147_v13 = vld [vmem:[%s11530_s3 + $0x170] sm:$0xf] }
 0x1b3   :  { %v2285_v33 = vadd.f32 %v2284_v14, %v2271_v21  ;;  %v6861_v21 = vld [vmem:[%s11530_s3 + $0x714] sm:$0xf0]  ;;  %v7550_v14 = vld [vmem:[%s11530_s3 + $0x4b4] sm:$0xf]  ;;  %v6111_v25 = vld [vmem:[%s11530_s3 + $0x128] sm:$0xf] }
 0x1b4   :  { %4493 = vmatpush.bf16.msrb.mxu0 %v6384_v43  ;;  %v6897_v43 = vld [vmem:[%s11530_s3 + $0x75c] sm:$0xf0]  ;;  %4518 = vmatpush.bf16.msrb.mxu2 %v6612_v34  ;;  %v7438_v20 = vld [vmem:[%s11530_s3 + $0x130] sm:$0xf0] }
 0x1b5   :  { %4507 = vmatpush.bf16.msrb.mxu1 %v6480_v49  ;;  %v2299_v49 = vadd.f32 %v2298_v40, %v2285_v33  ;;  %v6900_v56 = vor.u32 %v7634_v35, %v6897_v43  ;;  %v6768_v33 = vor.u32 %v7601_v63, %v6765_v18  ;;  %v7622_v40 = vld [vmem:[%s11530_s3 + $0x6f4] sm:$0xf]  ;;  %v6849_v34 = vld [vmem:[%s11530_s3 + $0x6fc] sm:$0xf0]  ;;  %v7547_v43 = vld [vmem:[%s11530_s3 + $0x49c] sm:$0xf] }
 0x1b6   :  { %v6852_v44 = vor.u32 %v7622_v40, %v6849_v34  ;;  %v7658_v18 = vld [vmem:[%s11530_s3 + $0x814] sm:$0xf]  ;;  %v6981_v40 = vld [vmem:[%s11530_s3 + $0x804] sm:$0xf0]  ;;  %v7685_v34 = vld [vmem:[%s11530_s3 + $0x8ec] sm:$0xf] }
 0x1b7   :  { %v2324_v50 = vmax.f32 %v2299_v49, 0.0  ;;  %v6549_v49 = vld [vmem:[%s11530_s3 + $0x4a4] sm:$0xf0] }
 0x1b8   :  { %4494 = vmatpush.bf16.msrb.mxu0 %v6372_v39  ;;  %v6804_v39 = vor.u32 %v7610_v0, %v6801_v42  ;;  %4519 = vmatpush.bf16.msrb.mxu2 %v6600_v58  ;;  %v6753_v0 = vld [vmem:[%s11530_s3 + $0x63c] sm:$0xf0]  ;;  %v6672_v58 = vor.u32 %v7577_v10, %v6669_v36  ;;  %v7417_v36 = vld [vmem:[%s11530_s3 + $0x88] sm:$0xf0] }
 0x1b9   :  { %4508 = vmatpush.bf16.msrb.mxu1 %v6468_v6  ;;  %v6789_v6 = vld [vmem:[%s11530_s3 + $0x684] sm:$0xf0]  ;;  %v10662_v61 = vpack.c.bf16 %v2324_v50, %v2312_v45  ;;  %v7595_v45 = vld [vmem:[%s11530_s3 + $0x61c] sm:$0xf]  ;;  %v6027_v10 = vld [vmem:[%s11530_s3 + $0x80] sm:$0xf] }
 0x1ba   :  { %v6792_v46 = vor.u32 %v7607_v2, %v6789_v6  ;;  %v6741_v50 = vld [vmem:[%s11530_s3 + $0x624] sm:$0xf0]  ;;  %v6552_v2 = vor.u32 %v7547_v43, %v6549_v49  ;;  %v7544_v6 = vld [vmem:[%s11530_s3 + $0x484] sm:$0xf] }
 0x1bb   :  { %4427 = vmatmul.bf16.vlgmr.msrb.gmra.mxu3 %v10662_v61  ;;  %v6744_v1 = vor.u32 %v7595_v45, %v6741_v50  ;;  %v6540_v27 = vor.u32 %v7544_v6, %v6537_v47  ;;  %v6123_v45 = vld [vmem:[%s11530_s3 + $0x140] sm:$0xf]  ;;  %v7441_v50 = vld [vmem:[%s11530_s3 + $0x148] sm:$0xf0]  ;;  %v6028_v6 = vor.u32 %v7417_v36, %v6027_v10 }
 0x1bc   :  { %4495 = vmatpush.bf16.msrb.mxu0 %v6360_v5  ;;  %v7628_v5 = vld [vmem:[%s11530_s3 + $0x724] sm:$0xf]  ;;  %4531 = vmatpush.bf16.msrb.mxu3 %v6720_v62  ;;  %v6657_v62 = vld [vmem:[%s11530_s3 + $0x57c] sm:$0xf0]  ;;  %v6124_v47 = vor.u32 %v7441_v50, %v6123_v45  ;;  %v7429_v36 = vld [vmem:[%s11530_s3 + $0xe8] sm:$0xf0] }
 0x1bd   :  { %4509 = vmatpush.bf16.msrb.mxu1 %v6456_v8  ;;  %v6873_v8 = vld [vmem:[%s11530_s3 + $0x72c] sm:$0xf0]  ;;  %4520 = vmatpush.bf16.msrb.mxu2 %v6588_v11  ;;  %v6075_v10 = vld [vmem:[%s11530_s3 + $0xe0] sm:$0xf]  ;;  %v7670_v45 = vld [vmem:[%s11530_s3 + $0x874] sm:$0xf] }
 0x1be   :  { %v6876_v48 = vor.u32 %v7628_v5, %v6873_v8  ;;  %v6825_v11 = vld [vmem:[%s11530_s3 + $0x6cc] sm:$0xf0]  ;;  %v6660_v5 = vor.u32 %v7574_v38, %v6657_v62  ;;  %v7571_v8 = vld [vmem:[%s11530_s3 + $0x55c] sm:$0xf]  ;;  %v6015_v38 = vld [vmem:[%s11530_s3 + $0x68] sm:$0xf] }
 0x1bf   :  { %4469 = vmatmul.bf16.vlgmr.msra.gmra.mxu2 %v9893_v32  ;;  %v6828_v63 = vor.u32 %v7616_v52, %v6825_v11  ;;  %v7414_v62 = vld [vmem:[%s11530_s3 + $0x70] sm:$0xf0]  ;;  %v7679_v52 = vld [vmem:[%s11530_s3 + $0x8bc] sm:$0xf]  ;;  %v7077_v11 = vld [vmem:[%s11530_s3 + $0x8c4] sm:$0xf0] }
 0x1c0   :  { %4496 = vmatpush.bf16.msrb.mxu0 %v6348_v30  ;;  %4532 = vmatpush.bf16.msrb.mxu3 %v6708_v59  ;;  %v6561_v30 = vld [vmem:[%s11530_s3 + $0x4bc] sm:$0xf0]  ;;  %v6051_v59 = vld [vmem:[%s11530_s3 + $0xb0] sm:$0xf] }
 0x1c1   :  { %4510 = vmatpush.bf16.msrb.mxu1 %v6444_v23  ;;  %v7580_v23 = vld [vmem:[%s11530_s3 + $0x5a4] sm:$0xf]  ;;  %4521 = vmatpush.bf16.msrb.mxu2 %v6576_v22  ;;  %v6564_v42 = vor.u32 %v7550_v14, %v6561_v30  ;;  %v6633_v30 = vld [vmem:[%s11530_s3 + $0x54c] sm:$0xf0]  ;;  %v7041_v50 = vld [vmem:[%s11530_s3 + $0x87c] sm:$0xf0] }
 0x1c2   :  { %v6684_v35 = vor.u32 %v7580_v23, %v6681_v55  ;;  %v7568_v22 = vld [vmem:[%s11530_s3 + $0x544] sm:$0xf]  ;;  %v6039_v23 = vld [vmem:[%s11530_s3 + $0x98] sm:$0xf] }
 0x1c3   :  { %4497 = vmatmul.bf16.vlgmr.msrb.gmra.mxu0 %v10126_v29  ;;  %v7420_v55 = vld [vmem:[%s11530_s3 + $0xa0] sm:$0xf0]  ;;  %v6636_v43 = vor.u32 %v7568_v22, %v6633_v30  ;;  %v5991_v22 = vld [vmem:[%s11530_s3 + $0x38] sm:$0xf] }
 0x1c4   :  { %4545 = vmatpush.bf16.msra.mxu0 %v6816_v37  ;;  %4511 = vmatmul.bf16.vlgmr.msrb.gmra.mxu1 %v10128_v54  ;;  %v6864_v37 = vor.u32 %v7625_v19, %v6861_v21  ;;  %v6993_v19 = vld [vmem:[%s11530_s3 + $0x81c] sm:$0xf0]  ;;  %v6052_v21 = vor.u32 %v7423_v60, %v6051_v59  ;;  %v7411_v59 = vld [vmem:[%s11530_s3 + $0x58] sm:$0xf0] }
 0x1c5   :  { %4559 = vmatpush.bf16.msra.mxu1 %v6912_v24  ;;  %v7598_v24 = vld [vmem:[%s11530_s3 + $0x634] sm:$0xf]  ;;  %4533 = vmatpush.bf16.msrb.mxu3 %v6696_v53  ;;  %v6648_v53 = vor.u32 %v7571_v8, %v6645_v7  ;;  %v6003_v8 = vld [vmem:[%s11530_s3 + $0x50] sm:$0xf] }
 0x1c6   :  { %v6756_v41 = vor.u32 %v7598_v24, %v6753_v0  ;;  %4522 = vmatpush.bf16.msrb.mxu2 %v6564_v42  ;;  %v7444_v24 = vld [vmem:[%s11530_s3 + $0x160] sm:$0xf0]  ;;  %v7655_v0 = vld [vmem:[%s11530_s3 + $0x7fc] sm:$0xf]  ;;  %v7101_v42 = vld [vmem:[%s11530_s3 + $0x8f4] sm:$0xf0] }
 0x1c7   :  { %v6099_v7 = vld [vmem:[%s11530_s3 + $0x110] sm:$0xf] }
 0x1c8   :  { %4546 = vmatpush.bf16.msra.mxu0 %v6804_v39  ;;  %v7619_v39 = vld [vmem:[%s11530_s3 + $0x6dc] sm:$0xf] }
 0x1c9   :  { %4560 = vmatpush.bf16.msra.mxu1 %v6900_v56  ;;  %v6837_v56 = vld [vmem:[%s11530_s3 + $0x6e4] sm:$0xf0]  ;;  %4534 = vmatpush.bf16.msrb.mxu3 %v6684_v35  ;;  %v6040_v35 = vor.u32 %v7420_v55, %v6039_v23  ;;  %v6087_v23 = vld [vmem:[%s11530_s3 + $0xf8] sm:$0xf]  ;;  %v7432_v55 = vld [vmem:[%s11530_s3 + $0x100] sm:$0xf0] }
 0x1ca   :  { %v6840_v28 = vor.u32 %v7619_v39, %v6837_v56  ;;  %4523 = vmatpush.bf16.msrb.mxu2 %v6552_v2  ;;  %v7652_v39 = vld [vmem:[%s11530_s3 + $0x7e4] sm:$0xf]  ;;  %v6969_v56 = vld [vmem:[%s11530_s3 + $0x7ec] sm:$0xf0]  ;;  %v7682_v2 = vld [vmem:[%s11530_s3 + $0x8d4] sm:$0xf] }
 0x1cb   :  { %4483 = vmatmul.bf16.vlgmr.msra.gmra.mxu3 %v9901_v12 }
 0x1cc   :  { %4547 = vmatpush.bf16.msra.mxu0 %v6792_v46  ;;  %v7592_v46 = vld [vmem:[%s11530_s3 + $0x604] sm:$0xf] }
 0x1cd   :  { %4561 = vmatpush.bf16.msra.mxu1 %v6888_v4  ;;  %v6729_v4 = vld [vmem:[%s11530_s3 + $0x60c] sm:$0xf0]  ;;  %4535 = vmatpush.bf16.msrb.mxu3 %v6672_v58  ;;  %v7089_v58 = vld [vmem:[%s11530_s3 + $0x8dc] sm:$0xf0] }
 0x1ce   :  { %4524 = vmatpush.bf16.msrb.mxu2 %v6540_v27  ;;  %v6016_v27 = vor.u32 %v7414_v62, %v6015_v38  ;;  %v6063_v38 = vld [vmem:[%s11530_s3 + $0xc8] sm:$0xf] }
 0x1d0   :  { %4548 = vmatpush.bf16.msra.mxu0 %v6780_v9  ;;  %v7447_v9 = vld [vmem:[%s11530_s3 + $0x178] sm:$0xf0] }
 0x1d1   :  { %4562 = vmatpush.bf16.msra.mxu1 %v6876_v48  ;;  %v6732_v48 = vor.u32 %v7592_v46, %v6729_v4  ;;  %4536 = vmatpush.bf16.msrb.mxu3 %v6660_v5  ;;  %v6148_v14 = vor.u32 %v7447_v9, %v6147_v13  ;;  %v7649_v46 = vld [vmem:[%s11530_s3 + $0x7cc] sm:$0xf]  ;;  %v6957_v4 = vld [vmem:[%s11530_s3 + $0x7d4] sm:$0xf0]  ;;  %v6112_v5 = vor.u32 %v7438_v20, %v6111_v25  ;;  %v7435_v13 = vld [vmem:[%s11530_s3 + $0x118] sm:$0xf0] }
 0x1d2   :  { %4573 = vmatpush.bf16.msra.mxu2 %v7008_v3  ;;  %v6960_v60 = vor.u32 %v7649_v46, %v6957_v4  ;;  %v7080_v3 = vor.u32 %v7679_v52, %v7077_v11  ;;  %v7646_v9 = vld [vmem:[%s11530_s3 + $0x7b4] sm:$0xf]  ;;  %v7667_v25 = vld [vmem:[%s11530_s3 + $0x85c] sm:$0xf]  ;;  %v7029_v20 = vld [vmem:[%s11530_s3 + $0x864] sm:$0xf0] }
 0x1d3   :  { %4525 = vmatmul.bf16.vlgmr.msrb.gmra.mxu2 %v10130_v57  ;;  %v6435_v4 = vld [vmem:[%s11530_s3 + $0x3b0] sm:$0xf]  ;;  %v7519_v52 = vld [vmem:[%s11530_s3 + $0x3b8] sm:$0xf0] }
 0x1d4   :  { %4549 = vmatpush.bf16.msra.mxu0 %v6768_v33  ;;  %v6996_v33 = vor.u32 %v7658_v18, %v6993_v19  ;;  %v7065_v18 = vld [vmem:[%s11530_s3 + $0x8ac] sm:$0xf0]  ;;  %v6004_v19 = vor.u32 %v7411_v59, %v6003_v8  ;;  %v6231_v8 = vld [vmem:[%s11530_s3 + $0x218] sm:$0xf]  ;;  %v7468_v59 = vld [vmem:[%s11530_s3 + $0x220] sm:$0xf0] }
 0x1d5   :  { %4563 = vmatpush.bf16.msra.mxu1 %v6864_v37  ;;  %v6135_v37 = vld [vmem:[%s11530_s3 + $0x158] sm:$0xf]  ;;  %4537 = vmatpush.bf16.msrb.mxu3 %v6648_v53  ;;  %v7408_v53 = vld [vmem:[%s11530_s3 + $0x40] sm:$0xf0]  ;;  %v6531_v11 = vld [vmem:[%s11530_s3 + $0x470] sm:$0xf] }
 0x1d6   :  { %v6136_v49 = vor.u32 %v7444_v24, %v6135_v37  ;;  %4574 = vmatpush.bf16.msra.mxu2 %v6996_v33  ;;  %v7643_v33 = vld [vmem:[%s11530_s3 + $0x79c] sm:$0xf]  ;;  %v6933_v37 = vld [vmem:[%s11530_s3 + $0x7a4] sm:$0xf0]  ;;  %v7673_v24 = vld [vmem:[%s11530_s3 + $0x88c] sm:$0xf] }
 0x1d8   :  { %4550 = vmatpush.bf16.msra.mxu0 %v6756_v41  ;;  %v6984_v41 = vor.u32 %v7655_v0, %v6981_v40  ;;  %v7053_v0 = vld [vmem:[%s11530_s3 + $0x894] sm:$0xf0]  ;;  %v5992_v40 = vor.u32 %v7408_v53, %v5991_v22  ;;  %v7540_v22 = vld [vmem:[%s11530_s3 + $0x460] sm:$0xf0]  ;;  %v6219_v53 = vld [vmem:[%s11530_s3 + $0x200] sm:$0xf] }
 0x1d9   :  { %4564 = vmatpush.bf16.msra.mxu1 %v6852_v44  ;;  %v7104_v44 = vor.u32 %v7685_v34, %v7101_v42  ;;  %4538 = vmatpush.bf16.msrb.mxu3 %v6636_v43  ;;  %v6088_v34 = vor.u32 %v7432_v55, %v6087_v23  ;;  %v5979_v42 = vld [vmem:[%s11530_s3 + $0x20] sm:$0xf]  ;;  %v6936_v43 = vor.u32 %v7643_v33, %v6933_v37  ;;  %v7495_v23 = vld [vmem:[%s11530_s3 + $0x2f8] sm:$0xf0] }
 0x1da   :  { %4575 = vmatpush.bf16.msra.mxu2 %v6984_v41  ;;  %v7640_v41 = vld [vmem:[%s11530_s3 + $0x784] sm:$0xf] }
 0x1dc   :  { %4551 = vmatpush.bf16.msra.mxu0 %v6744_v1  ;;  %v6972_v1 = vor.u32 %v7652_v39, %v6969_v56  ;;  %4539 = vmatmul.bf16.vlgmr.msrb.gmra.mxu3 %v10151_v16  ;;  %v6243_v56 = vld [vmem:[%s11530_s3 + $0x230] sm:$0xf] }
 0x1dd   :  { %4565 = vmatpush.bf16.msra.mxu1 %v6840_v28  ;;  %4587 = vmatpush.bf16.msra.mxu3 %v7104_v44  ;;  %v7092_v28 = vor.u32 %v7682_v2, %v7089_v58  ;;  %v6921_v44 = vld [vmem:[%s11530_s3 + $0x78c] sm:$0xf0]  ;;  %v7471_v2 = vld [vmem:[%s11530_s3 + $0x238] sm:$0xf0]  ;;  %v6076_v58 = vor.u32 %v7429_v36, %v6075_v10  ;;  %v6327_v10 = vld [vmem:[%s11530_s3 + $0x2d8] sm:$0xf] }
 0x1de   :  { %4576 = vmatpush.bf16.msra.mxu2 %v6972_v1  ;;  %v6924_v62 = vor.u32 %v7640_v41, %v6921_v44  ;;  %v7044_v1 = vor.u32 %v7670_v45, %v7041_v50  ;;  %v6244_v46 = vor.u32 %v7471_v2, %v6243_v56  ;;  %v6399_v44 = vld [vmem:[%s11530_s3 + $0x368] sm:$0xf]  ;;  %v7510_v45 = vld [vmem:[%s11530_s3 + $0x370] sm:$0xf0]  ;;  %v6195_v2 = vld [vmem:[%s11530_s3 + $0x1d0] sm:$0xf] }
 0x1df   :  { %v6495_v50 = vld [vmem:[%s11530_s3 + $0x428] sm:$0xf]  ;;  %v7534_v56 = vld [vmem:[%s11530_s3 + $0x430] sm:$0xf0] }
 0x1e0   :  { %4552 = vmatpush.bf16.msra.mxu0 %v6732_v48  ;;  %v6945_v48 = vld [vmem:[%s11530_s3 + $0x7bc] sm:$0xf0] }
 0x1e1   :  { %4566 = vmatpush.bf16.msra.mxu1 %v6828_v63  ;;  %4588 = vmatpush.bf16.msra.mxu3 %v7092_v28  ;;  %v7676_v63 = vld [vmem:[%s11530_s3 + $0x8a4] sm:$0xf]  ;;  %v7426_v28 = vld [vmem:[%s11530_s3 + $0xd0] sm:$0xf0] }
 0x1e2   :  { %4577 = vmatpush.bf16.msra.mxu2 %v6960_v60  ;;  %v7068_v30 = vor.u32 %v7676_v63, %v7065_v18  ;;  %v6064_v60 = vor.u32 %v7426_v28, %v6063_v38  ;;  %v6232_v63 = vor.u32 %v7468_v59, %v6231_v8  ;;  %v6423_v18 = vld [vmem:[%s11530_s3 + $0x398] sm:$0xf]  ;;  %v6400_v38 = vor.u32 %v7510_v45, %v6399_v44  ;;  %v6387_v28 = vld [vmem:[%s11530_s3 + $0x350] sm:$0xf] }
 0x1e3   :  { %4553 = vmatmul.bf16.vlgmr.msra.gmra.mxu0 %v10324_v17 }
 0x1e4   :  { %4601 = vmatpush.bf16.msrb.mxu0 %v6052_v21  ;;  %4567 = vmatmul.bf16.vlgmr.msra.gmra.mxu1 %v10490_v51  ;;  %v6100_v21 = vor.u32 %v7435_v13, %v6099_v7  ;;  %v6436_v7 = vor.u32 %v7519_v52, %v6435_v4  ;;  %v7664_v13 = vld [vmem:[%s11530_s3 + $0x844] sm:$0xf]  ;;  %v7531_v4 = vld [vmem:[%s11530_s3 + $0x418] sm:$0xf0]  ;;  %v6183_v52 = vld [vmem:[%s11530_s3 + $0x1b8] sm:$0xf] }
 0x1e5   :  { %4615 = vmatpush.bf16.msrb.mxu1 %v6148_v14  ;;  %4589 = vmatpush.bf16.msra.mxu3 %v7080_v3  ;;  %v6948_v14 = vor.u32 %v7646_v9, %v6945_v48  ;;  %v7032_v3 = vor.u32 %v7667_v25, %v7029_v20  ;;  %v7017_v9 = vld [vmem:[%s11530_s3 + $0x84c] sm:$0xf0]  ;;  %v7507_v25 = vld [vmem:[%s11530_s3 + $0x358] sm:$0xf0] }
 0x1e6   :  { %v7020_v55 = vor.u32 %v7664_v13, %v7017_v9  ;;  %v6483_v20 = vld [vmem:[%s11530_s3 + $0x410] sm:$0xf]  ;;  %v6388_v8 = vor.u32 %v7507_v25, %v6387_v28  ;;  %v6471_v13 = vld [vmem:[%s11530_s3 + $0x3f8] sm:$0xf]  ;;  %v6255_v25 = vld [vmem:[%s11530_s3 + $0x248] sm:$0xf] }
 0x1e7   :  { %4578 = vmatpush.bf16.msra.mxu2 %v6948_v14  ;;  %v7465_v14 = vld [vmem:[%s11530_s3 + $0x208] sm:$0xf0]  ;;  %v6484_v59 = vor.u32 %v7531_v4, %v6483_v20  ;;  %v7474_v4 = vld [vmem:[%s11530_s3 + $0x250] sm:$0xf0] }
 0x1e8   :  { %4602 = vmatpush.bf16.msrb.mxu0 %v6040_v35  ;;  %v7405_v35 = vld [vmem:[%s11530_s3 + $0x28] sm:$0xf0] }
 0x1e9   :  { %4616 = vmatpush.bf16.msrb.mxu1 %v6136_v49  ;;  %4590 = vmatpush.bf16.msra.mxu3 %v7068_v30  ;;  %v7056_v49 = vor.u32 %v7673_v24, %v7053_v0  ;;  %v5980_v39 = vor.u32 %v7405_v35, %v5979_v42  ;;  %v6339_v30 = vld [vmem:[%s11530_s3 + $0x2f0] sm:$0xf]  ;;  %v6220_v24 = vor.u32 %v7465_v14, %v6219_v53  ;;  %v6411_v0 = vld [vmem:[%s11530_s3 + $0x380] sm:$0xf]  ;;  %v7537_v35 = vld [vmem:[%s11530_s3 + $0x448] sm:$0xf0] }
 0x1ea   :  { %v6340_v42 = vor.u32 %v7495_v23, %v6339_v30  ;;  %v6363_v53 = vld [vmem:[%s11530_s3 + $0x320] sm:$0xf]  ;;  %v7501_v23 = vld [vmem:[%s11530_s3 + $0x328] sm:$0xf0] }
 0x1eb   :  { %4579 = vmatpush.bf16.msra.mxu2 %v6936_v43  ;;  %v6207_v43 = vld [vmem:[%s11530_s3 + $0x1e8] sm:$0xf] }
 0x1ec   :  { %4603 = vmatpush.bf16.msrb.mxu0 %v6028_v6  ;;  %v5967_v6 = vld [vmem:[%s11530_s3 + $0x8] sm:$0xf] }
 0x1ed   :  { %4617 = vmatpush.bf16.msrb.mxu1 %v6124_v47  ;;  %v7402_v47 = vld [vmem:[%s11530_s3 + $0x10] sm:$0xf0]  ;;  %4591 = vmatpush.bf16.msra.mxu3 %v7056_v49 }
 0x1ee   :  { %v7462_v49 = vld [vmem:[%s11530_s3 + $0x1f0] sm:$0xf0] }
 0x1ef   :  { %4580 = vmatpush.bf16.msra.mxu2 %v6924_v62  ;;  %v6208_v41 = vor.u32 %v7462_v49, %v6207_v43  ;;  %v6496_v62 = vor.u32 %v7534_v56, %v6495_v50  ;;  %v6364_v43 = vor.u32 %v7501_v23, %v6363_v53  ;;  %v6351_v49 = vld [vmem:[%s11530_s3 + $0x308] sm:$0xf]  ;;  %v6267_v50 = vld [vmem:[%s11530_s3 + $0x260] sm:$0xf]  ;;  %v7615_v56 = vld [vmem:[%s11530_s3 + $0x6b8] sm:$0xf0] }
 0x1f0   :  { %4604 = vmatpush.bf16.msrb.mxu0 %v6016_v27  ;;  %v5968_v27 = vor.u32 %v7402_v47, %v5967_v6  ;;  %v6315_v6 = vld [vmem:[%s11530_s3 + $0x2c0] sm:$0xf]  ;;  %v7489_v47 = vld [vmem:[%s11530_s3 + $0x2c8] sm:$0xf0]  ;;  %v7588_v23 = vld [vmem:[%s11530_s3 + $0x5e0] sm:$0xf0] }
 0x1f1   :  { %4618 = vmatpush.bf16.msrb.mxu1 %v6112_v5  ;;  %v7543_v5 = vld [vmem:[%s11530_s3 + $0x478] sm:$0xf0]  ;;  %4592 = vmatpush.bf16.msra.mxu3 %v7044_v1  ;;  %v7633_v53 = vld [vmem:[%s11530_s3 + $0x748] sm:$0xf0] }
 0x1f2   :  { %v6532_v48 = vor.u32 %v7543_v5, %v6531_v11  ;;  %4581 = vmatmul.bf16.vlgmr.msra.gmra.mxu2 %v10608_v15  ;;  %v7456_v11 = vld [vmem:[%s11530_s3 + $0x1c0] sm:$0xf0]  ;;  %v7486_v5 = vld [vmem:[%s11530_s3 + $0x2b0] sm:$0xf0] }
 0x1f3   :  { %4629 = vmatpush.bf16.msrb.mxu2 %v6244_v46  ;;  %v6316_v46 = vor.u32 %v7489_v47, %v6315_v6  ;;  %v7639_v6 = vld [vmem:[%s11530_s3 + $0x778] sm:$0xf0] }
 0x1f4   :  { %4605 = vmatpush.bf16.msrb.mxu0 %v6004_v19  ;;  %v7516_v19 = vld [vmem:[%s11530_s3 + $0x3a0] sm:$0xf0] }
 0x1f5   :  { %4619 = vmatpush.bf16.msrb.mxu1 %v6100_v21  ;;  %v6519_v21 = vld [vmem:[%s11530_s3 + $0x458] sm:$0xf]  ;;  %4593 = vmatpush.bf16.msra.mxu3 %v7032_v3  ;;  %v6424_v33 = vor.u32 %v7516_v19, %v6423_v18  ;;  %v7453_v18 = vld [vmem:[%s11530_s3 + $0x1a8] sm:$0xf0]  ;;  %v6291_v19 = vld [vmem:[%s11530_s3 + $0x290] sm:$0xf] }
 0x1f6   :  { %v6520_v37 = vor.u32 %v7540_v22, %v6519_v21  ;;  %v6375_v3 = vld [vmem:[%s11530_s3 + $0x338] sm:$0xf]  ;;  %v7483_v21 = vld [vmem:[%s11530_s3 + $0x298] sm:$0xf0] }
 0x1f7   :  { %4630 = vmatpush.bf16.msrb.mxu2 %v6232_v63  ;;  %v6171_v63 = vld [vmem:[%s11530_s3 + $0x1a0] sm:$0xf] }
 0x1f8   :  { %4606 = vmatpush.bf16.msrb.mxu0 %v5992_v40  ;;  %v7513_v40 = vld [vmem:[%s11530_s3 + $0x388] sm:$0xf0]  ;;  %v6172_v30 = vor.u32 %v7453_v18, %v6171_v63  ;;  %v11248_v18 = vpop.f32.mrf.mxu0 }
 0x1f9   :  { %4620 = vmatpush.bf16.msrb.mxu1 %v6088_v34  ;;  %v6507_v34 = vld [vmem:[%s11530_s3 + $0x440] sm:$0xf]  ;;  %4594 = vmatpush.bf16.msra.mxu3 %v7020_v55  ;;  %v7609_v63 = vld [vmem:[%s11530_s3 + $0x688] sm:$0xf0] }
 0x1fa   :  { %v6508_v36 = vor.u32 %v7537_v35, %v6507_v34  ;;  %v6459_v55 = vld [vmem:[%s11530_s3 + $0x3e0] sm:$0xf]  ;;  %v7480_v34 = vld [vmem:[%s11530_s3 + $0x280] sm:$0xf0]  ;;  %v7567_v35 = vld [vmem:[%s11530_s3 + $0x538] sm:$0xf0] }
 0x1fb   :  { %4631 = vmatpush.bf16.msrb.mxu2 %v6220_v24  ;;  %v6159_v24 = vld [vmem:[%s11530_s3 + $0x188] sm:$0xf] }
 0x1fc   :  { %4607 = vmatpush.bf16.msrb.mxu0 %v5980_v39  ;;  %4595 = vmatmul.bf16.vlgmr.msra.gmra.mxu3 %v10662_v61 }
 0x1fd   :  { %4621 = vmatpush.bf16.msrb.mxu1 %v6076_v58  ;;  %4643 = vmatpush.bf16.msrb.mxu3 %v6340_v42  ;;  %v7459_v58 = vld [vmem:[%s11530_s3 + $0x1d8] sm:$0xf0]  ;;  %v6627_v42 = vld [vmem:[%s11530_s3 + $0x530] sm:$0xf] }
 0x1fe   :  { %v6196_v1 = vor.u32 %v7459_v58, %v6195_v2  ;;  %v6628_v45 = vor.u32 %v7567_v35, %v6627_v42  ;;  %v7477_v2 = vld [vmem:[%s11530_s3 + $0x268] sm:$0xf0]  ;;  %v6915_v58 = vld [vmem:[%s11530_s3 + $0x770] sm:$0xf]  ;;  %v6879_v42 = vld [vmem:[%s11530_s3 + $0x728] sm:$0xf] }
 0x1ff   :  { %4632 = vmatpush.bf16.msrb.mxu2 %v6208_v41  ;;  %v7522_v41 = vld [vmem:[%s11530_s3 + $0x3d0] sm:$0xf0]  ;;  %v6268_v20 = vor.u32 %v7477_v2, %v6267_v50  ;;  %v6567_v2 = vld [vmem:[%s11530_s3 + $0x4b8] sm:$0xf] }
 0x200   :  { %4608 = vmatpush.bf16.msrb.mxu0 %v5968_v27  ;;  %v6303_v27 = vld [vmem:[%s11530_s3 + $0x2a8] sm:$0xf]  ;;  %v7630_v35 = vld [vmem:[%s11530_s3 + $0x730] sm:$0xf0] }
 0x201   :  { %4622 = vmatpush.bf16.msrb.mxu1 %v6064_v60  ;;  %v6184_v60 = vor.u32 %v7456_v11, %v6183_v52  ;;  %v6304_v9 = vor.u32 %v7486_v5, %v6303_v27  ;;  %v6807_v52 = vld [vmem:[%s11530_s3 + $0x698] sm:$0xf]  ;;  %v7612_v11 = vld [vmem:[%s11530_s3 + $0x6a0] sm:$0xf0] }
 0x202   :  { %v6903_v5 = vld [vmem:[%s11530_s3 + $0x758] sm:$0xf] }
 0x203   :  { %4609 = vmatmul.bf16.vlgmr.msrb.gmra.mxu0 %v9889_v26  ;;  %v7492_v26 = vld [vmem:[%s11530_s3 + $0x2e0] sm:$0xf0]  ;;  %4633 = vmatpush.bf16.msrb.mxu2 %v6196_v1 }
 0x204   :  { %4657 = vmatpush.bf16.msra.mxu0 %v6436_v7  ;;  %4623 = vmatmul.bf16.vlgmr.msrb.gmra.mxu1 %v9891_v31  ;;  %v6412_v31 = vor.u32 %v7513_v40, %v6411_v0  ;;  %v6328_v39 = vor.u32 %v7492_v26, %v6327_v10  ;;  %v7504_v7 = vld [vmem:[%s11530_s3 + $0x340] sm:$0xf0]  ;;  %v7450_v0 = vld [vmem:[%s11530_s3 + $0x190] sm:$0xf0]  ;;  %v6279_v40 = vld [vmem:[%s11530_s3 + $0x278] sm:$0xf] }
 0x205   :  { %4671 = vmatpush.bf16.msra.mxu1 %v6532_v48  ;;  %v7528_v48 = vld [vmem:[%s11530_s3 + $0x400] sm:$0xf0]  ;;  %v6376_v22 = vor.u32 %v7504_v7, %v6375_v3  ;;  %v6160_v26 = vor.u32 %v7450_v0, %v6159_v24  ;;  %v6280_v44 = vor.u32 %v7480_v34, %v6279_v40  ;;  %v6723_v3 = vld [vmem:[%s11530_s3 + $0x5f0] sm:$0xf]  ;;  %v7591_v7 = vld [vmem:[%s11530_s3 + $0x5f8] sm:$0xf0]  ;;  %v11278_v0 = vpop.f32.mrf.mxu2 }
 0x206   :  { %4644 = vmatpush.bf16.msrb.mxu3 %v6328_v39  ;;  %v6472_v14 = vor.u32 %v7528_v48, %v6471_v13  ;;  %v6819_v39 = vld [vmem:[%s11530_s3 + $0x6b0] sm:$0xf]  ;;  %v6808_v13 = vor.u32 %v7612_v11, %v6807_v52  ;;  %v6795_v48 = vld [vmem:[%s11530_s3 + $0x680] sm:$0xf]  ;;  %v7606_v24 = vld [vmem:[%s11530_s3 + $0x670] sm:$0xf0] }
 0x207   :  { %4634 = vmatpush.bf16.msrb.mxu2 %v6184_v60  ;;  %v6820_v28 = vor.u32 %v7615_v56, %v6819_v39  ;;  %v7561_v60 = vld [vmem:[%s11530_s3 + $0x508] sm:$0xf0]  ;;  %v6867_v39 = vld [vmem:[%s11530_s3 + $0x710] sm:$0xf]  ;;  %v7627_v56 = vld [vmem:[%s11530_s3 + $0x718] sm:$0xf0] }
 0x208   :  { %4658 = vmatpush.bf16.msra.mxu0 %v6424_v33  ;;  %v7525_v33 = vld [vmem:[%s11530_s3 + $0x3e8] sm:$0xf0] }
 0x209   :  { %4672 = vmatpush.bf16.msra.mxu1 %v6520_v37  ;;  %v6292_v37 = vor.u32 %v7483_v21, %v6291_v19  ;;  %v6460_v10 = vor.u32 %v7525_v33, %v6459_v55  ;;  %v6724_v21 = vor.u32 %v7591_v7, %v6723_v3  ;;  %v11270_v55 = vpop.f32.mrf.mxu1  ;;  %v6796_v33 = vor.u32 %v7609_v63, %v6795_v48  ;;  %v7579_v3 = vld [vmem:[%s11530_s3 + $0x598] sm:$0xf0]  ;;  %v7597_v48 = vld [vmem:[%s11530_s3 + $0x628] sm:$0xf0] }
 0x20a   :  { %4645 = vmatpush.bf16.msrb.mxu3 %v6316_v46  ;;  %v6916_v46 = vor.u32 %v7639_v6, %v6915_v58  ;;  %v7552_v58 = vld [vmem:[%s11530_s3 + $0x4c0] sm:$0xf0]  ;;  %v6687_v6 = vld [vmem:[%s11530_s3 + $0x5a8] sm:$0xf] }
 0x20b   :  { %4635 = vmatpush.bf16.msrb.mxu2 %v6172_v30  ;;  %v6711_v30 = vld [vmem:[%s11530_s3 + $0x5d8] sm:$0xf]  ;;  %v6568_v52 = vor.u32 %v7552_v58, %v6567_v2 }
 0x20c   :  { %4659 = vmatpush.bf16.msra.mxu0 %v6412_v31  ;;  %v7498_v31 = vld [vmem:[%s11530_s3 + $0x310] sm:$0xf0]  ;;  %v6712_v34 = vor.u32 %v7588_v23, %v6711_v30  ;;  %v6663_v30 = vld [vmem:[%s11530_s3 + $0x578] sm:$0xf]  ;;  %v7576_v23 = vld [vmem:[%s11530_s3 + $0x580] sm:$0xf0] }
 0x20d   :  { %4673 = vmatpush.bf16.msra.mxu1 %v6508_v36  ;;  %v6447_v36 = vld [vmem:[%s11530_s3 + $0x3c8] sm:$0xf]  ;;  %v6352_v47 = vor.u32 %v7498_v31, %v6351_v49  ;;  %v7555_v49 = vld [vmem:[%s11530_s3 + $0x4d8] sm:$0xf0]  ;;  %v11359_v7 = vpop.f32.mrf.mxu2 }
 0x20e   :  { %4646 = vmatpush.bf16.msrb.mxu3 %v6304_v9  ;;  %v6448_v1 = vor.u32 %v7522_v41, %v6447_v36  ;;  %v6256_v9 = vor.u32 %v7474_v4, %v6255_v25  ;;  %v11302_v36 = vld [vmem:[%s11531_s4] sm:$0x7]  ;;  %v6880_v41 = vor.u32 %v7630_v35, %v6879_v42  ;;  %v6868_v25 = vor.u32 %v7627_v56, %v6867_v39  ;;  %v6999_v39 = vld [vmem:[%s11530_s3 + $0x818] sm:$0xf] }
 0x20f   :  { %4636 = vmatpush.bf16.msrb.mxu2 %v6160_v26  ;;  %v7585_v26 = vld [vmem:[%s11530_s3 + $0x5c8] sm:$0xf0] }
 0x210   :  { %4660 = vmatpush.bf16.msra.mxu0 %v6400_v38  ;;  %v6615_v38 = vld [vmem:[%s11530_s3 + $0x518] sm:$0xf] }
 0x211   :  { %4674 = vmatpush.bf16.msra.mxu1 %v6496_v62  ;;  %v7564_v62 = vld [vmem:[%s11530_s3 + $0x520] sm:$0xf0]  ;;  %v11339_v4 = vpop.f32.mrf.mxu1 }
 0x212   :  { %4647 = vmatpush.bf16.msrb.mxu3 %v6292_v37  ;;  %v6616_v27 = vor.u32 %v7564_v62, %v6615_v38  ;;  %4637 = vmatmul.bf16.vlgmr.msrb.gmra.mxu2 %v9893_v32  ;;  %v11328_v38 = vpop.f32.mrf.mxu3  ;;  %v11330_v62 = vpop.f32.mrf.mxu0 }
 0x213   :  { %4685 = vmatpush.bf16.msra.mxu2 %v6628_v45  ;;  %v7603_v45 = vld [vmem:[%s11530_s3 + $0x658] sm:$0xf0] }
 0x214   :  { %4661 = vmatpush.bf16.msra.mxu0 %v6388_v8  ;;  %v7636_v8 = vld [vmem:[%s11530_s3 + $0x760] sm:$0xf0] }
 0x215   :  { %4675 = vmatpush.bf16.msra.mxu1 %v6484_v59  ;;  %v6603_v59 = vld [vmem:[%s11530_s3 + $0x500] sm:$0xf]  ;;  %v6904_v32 = vor.u32 %v7636_v8, %v6903_v5  ;;  %v7624_v5 = vld [vmem:[%s11530_s3 + $0x700] sm:$0xf0] }
 0x216   :  { %4648 = vmatpush.bf16.msrb.mxu3 %v6280_v44  ;;  %v6604_v19 = vor.u32 %v7561_v60, %v6603_v59  ;;  %v6771_v44 = vld [vmem:[%s11530_s3 + $0x650] sm:$0xf]  ;;  %v6555_v8 = vld [vmem:[%s11530_s3 + $0x4a0] sm:$0xf]  ;;  %v7549_v59 = vld [vmem:[%s11530_s3 + $0x4a8] sm:$0xf0] }
 0x217   :  { %4686 = vmatpush.bf16.msra.mxu2 %v6616_v27  ;;  %v6855_v27 = vld [vmem:[%s11530_s3 + $0x6f8] sm:$0xf]  ;;  %v6675_v60 = vld [vmem:[%s11530_s3 + $0x590] sm:$0xf]  ;;  %v6556_v63 = vor.u32 %v7549_v59, %v6555_v8 }
 0x218   :  { %4662 = vmatpush.bf16.msra.mxu0 %v6376_v22  ;;  %v6891_v22 = vld [vmem:[%s11530_s3 + $0x740] sm:$0xf] }
 0x219   :  { %4676 = vmatpush.bf16.msra.mxu1 %v6472_v14  ;;  %v6591_v14 = vld [vmem:[%s11530_s3 + $0x4e8] sm:$0xf]  ;;  %v6892_v37 = vor.u32 %v7633_v53, %v6891_v22  ;;  %v7621_v22 = vld [vmem:[%s11530_s3 + $0x6e8] sm:$0xf0]  ;;  %v4344_v35 = vpop.f32.mrf.mxu1 }
 0x21a   :  { %4649 = vmatpush.bf16.msrb.mxu3 %v6268_v20  ;;  %v6759_v20 = vld [vmem:[%s11530_s3 + $0x638] sm:$0xf]  ;;  %v6543_v53 = vld [vmem:[%s11530_s3 + $0x488] sm:$0xf]  ;;  %v4318_v42 = vpop.f32.mrf.mxu3 }
 0x21b   :  { %4687 = vmatpush.bf16.msra.mxu2 %v6604_v19  ;;  %v6676_v19 = vor.u32 %v7579_v3, %v6675_v60  ;;  %v6975_v3 = vld [vmem:[%s11530_s3 + $0x7e8] sm:$0xf] }
 0x21c   :  { %4663 = vmatpush.bf16.msra.mxu0 %v6364_v43  ;;  %v6579_v43 = vld [vmem:[%s11530_s3 + $0x4d0] sm:$0xf] }
 0x21d   :  { %4677 = vmatpush.bf16.msra.mxu1 %v6460_v10  ;;  %v6699_v10 = vld [vmem:[%s11530_s3 + $0x5c0] sm:$0xf] }
 0x21e   :  { %4650 = vmatpush.bf16.msrb.mxu3 %v6256_v9  ;;  %v6700_v50 = vor.u32 %v7585_v26, %v6699_v10  ;;  %v6856_v9 = vor.u32 %v7624_v5, %v6855_v27  ;;  %v6831_v10 = vld [vmem:[%s11530_s3 + $0x6c8] sm:$0xf]  ;;  %v7618_v26 = vld [vmem:[%s11530_s3 + $0x6d0] sm:$0xf0] }
 0x21f   :  { %v6832_v2 = vor.u32 %v7618_v26, %v6831_v10  ;;  %v6939_v10 = vld [vmem:[%s11530_s3 + $0x7a0] sm:$0xf]  ;;  %v7645_v26 = vld [vmem:[%s11530_s3 + $0x7a8] sm:$0xf0] }
 0x220   :  { %4664 = vmatpush.bf16.msra.mxu0 %v6352_v47  ;;  %v7582_v47 = vld [vmem:[%s11530_s3 + $0x5b0] sm:$0xf0] }
 0x221   :  { %4678 = vmatpush.bf16.msra.mxu1 %v6448_v1  ;;  %4651 = vmatmul.bf16.vlgmr.msrb.gmra.mxu3 %v9901_v12  ;;  %v6580_v12 = vor.u32 %v7555_v49, %v6579_v43  ;;  %v6772_v1 = vor.u32 %v7603_v45, %v6771_v44  ;;  %v6688_v11 = vor.u32 %v7582_v47, %v6687_v6  ;;  %v6651_v44 = vld [vmem:[%s11530_s3 + $0x560] sm:$0xf]  ;;  %v7573_v45 = vld [vmem:[%s11530_s3 + $0x568] sm:$0xf0] }
 0x222   :  { %4699 = vmatpush.bf16.msra.mxu3 %v6724_v21  ;;  %v6843_v21 = vld [vmem:[%s11530_s3 + $0x6e0] sm:$0xf]  ;;  %v6664_v49 = vor.u32 %v7576_v23, %v6663_v30  ;;  %v6652_v6 = vor.u32 %v7573_v45, %v6651_v44  ;;  %v4372_v27 = vpop.f32.mrf.mxu3 }
 0x223   :  { %4665 = vmatmul.bf16.vlgmr.msra.gmra.mxu0 %v10126_v29  ;;  %v7558_v29 = vld [vmem:[%s11530_s3 + $0x4f0] sm:$0xf0] }
 0x224   :  { %4713 = vmatpush.bf16.msrb.mxu0 %v6820_v28  ;;  %4679 = vmatmul.bf16.vlgmr.msra.gmra.mxu1 %v10128_v54  ;;  %v6783_v54 = vld [vmem:[%s11530_s3 + $0x668] sm:$0xf]  ;;  %v6592_v40 = vor.u32 %v7558_v29, %v6591_v14  ;;  %v2723_v28 = vperm.slane %v11302_v36, 0  ;;  %v7546_v29 = vld [vmem:[%s11530_s3 + $0x490] sm:$0xf0] }
 0x225   :  { %4727 = vmatpush.bf16.msrb.mxu1 %v6916_v46  ;;  %v6784_v31 = vor.u32 %v7606_v24, %v6783_v54  ;;  %v7600_v46 = vld [vmem:[%s11530_s3 + $0x640] sm:$0xf0]  ;;  %v7011_v54 = vld [vmem:[%s11530_s3 + $0x830] sm:$0xf]  ;;  %v6844_v24 = vor.u32 %v7621_v22, %v6843_v21  ;;  %v6544_v43 = vor.u32 %v7546_v29, %v6543_v53  ;;  %v7083_v21 = vld [vmem:[%s11530_s3 + $0x8c0] sm:$0xf] }
 0x226   :  { %4688 = vmatpush.bf16.msra.mxu2 %v6592_v40  ;;  %4700 = vmatpush.bf16.msra.mxu3 %v6712_v34  ;;  %v4275_v14 = vadd.f32 %v11248_v18, %v2723_v28  ;;  %v7663_v18 = vld [vmem:[%s11530_s3 + $0x838] sm:$0xf0]  ;;  %v6735_v40 = vld [vmem:[%s11530_s3 + $0x608] sm:$0xf]  ;;  %v7594_v34 = vld [vmem:[%s11530_s3 + $0x610] sm:$0xf0]  ;;  %v4277_v58 = vadd.f32 %v11330_v62, %v2723_v28 }
 0x227   :  { %v7657_v62 = vld [vmem:[%s11530_s3 + $0x808] sm:$0xf0]  ;;  %v7107_v28 = vld [vmem:[%s11530_s3 + $0x8f0] sm:$0xf] }
 0x228   :  { %4714 = vmatpush.bf16.msrb.mxu0 %v6808_v13  ;;  %v6760_v13 = vor.u32 %v7600_v46, %v6759_v20  ;;  %v7687_v20 = vld [vmem:[%s11530_s3 + $0x8f8] sm:$0xf0]  ;;  %v7681_v22 = vld [vmem:[%s11530_s3 + $0x8c8] sm:$0xf0] }
 0x229   :  { %4728 = vmatpush.bf16.msrb.mxu1 %v6904_v32  ;;  %v6747_v32 = vld [vmem:[%s11530_s3 + $0x620] sm:$0xf]  ;;  %v7108_v60 = vor.u32 %v7687_v20, %v7107_v28  ;;  %v7084_v23 = vor.u32 %v7681_v22, %v7083_v21 }
 0x22a   :  { %4689 = vmatpush.bf16.msra.mxu2 %v6580_v12  ;;  %4701 = vmatpush.bf16.msra.mxu3 %v6700_v50  ;;  %v4358_v12 = vpop.f32.mrf.mxu2  ;;  %v6736_v50 = vor.u32 %v7594_v34, %v6735_v40 }
 0x22c   :  { %4715 = vmatpush.bf16.msrb.mxu0 %v6796_v33  ;;  %v4330_v33 = vpop.f32.mrf.mxu0 }
 0x22d   :  { %4729 = vmatpush.bf16.msrb.mxu1 %v6892_v37  ;;  %v6748_v37 = vor.u32 %v7597_v48, %v6747_v32 }
 0x22e   :  { %4690 = vmatpush.bf16.msra.mxu2 %v6568_v52  ;;  %4702 = vmatpush.bf16.msra.mxu3 %v6688_v11  ;;  %v4291_v52 = vadd.f32 %v11339_v4, %v4277_v58  ;;  %v7654_v4 = vld [vmem:[%s11530_s3 + $0x7f0] sm:$0xf0] }
 0x22f   :  { %v7642_v58 = vld [vmem:[%s11530_s3 + $0x790] sm:$0xf0] }
 0x230   :  { %4716 = vmatpush.bf16.msrb.mxu0 %v6784_v31  ;;  %v4289_v31 = vadd.f32 %v11270_v55, %v4275_v14  ;;  %v7660_v55 = vld [vmem:[%s11530_s3 + $0x820] sm:$0xf0] }
 0x231   :  { %4730 = vmatpush.bf16.msrb.mxu1 %v6880_v41  ;;  %v7012_v41 = vor.u32 %v7663_v18, %v7011_v54  ;;  %v7000_v47 = vor.u32 %v7660_v55, %v6999_v39  ;;  %v7648_v18 = vld [vmem:[%s11530_s3 + $0x7c0] sm:$0xf0]  ;;  %v6927_v55 = vld [vmem:[%s11530_s3 + $0x788] sm:$0xf] }
 0x232   :  { %4691 = vmatpush.bf16.msra.mxu2 %v6556_v63  ;;  %4703 = vmatpush.bf16.msra.mxu3 %v6676_v19  ;;  %v4303_v56 = vadd.f32 %v11278_v0, %v4289_v31  ;;  %v6987_v0 = vld [vmem:[%s11530_s3 + $0x800] sm:$0xf]  ;;  %v7651_v19 = vld [vmem:[%s11530_s3 + $0x7d8] sm:$0xf0]  ;;  %v7059_v31 = vld [vmem:[%s11530_s3 + $0x890] sm:$0xf]  ;;  %v6928_v28 = vor.u32 %v7642_v58, %v6927_v55 }
 0x233   :  { %v6988_v59 = vor.u32 %v7657_v62, %v6987_v0 }
 0x234   :  { %4717 = vmatpush.bf16.msrb.mxu0 %v6772_v1  ;;  %v6639_v1 = vld [vmem:[%s11530_s3 + $0x548] sm:$0xf]  ;;  %v4317_v46 = vadd.f32 %v11328_v38, %v4303_v56  ;;  %v4332_v11 = vpop.f32.mrf.mxu0  ;;  %v4305_v38 = vadd.f32 %v11359_v7, %v4291_v52  ;;  %v6976_v7 = vor.u32 %v7654_v4, %v6975_v3  ;;  %v7035_v52 = vld [vmem:[%s11530_s3 + $0x860] sm:$0xf]  ;;  %v7666_v3 = vld [vmem:[%s11530_s3 + $0x850] sm:$0xf0] }
 0x235   :  { %4731 = vmatpush.bf16.msrb.mxu1 %v6868_v25  ;;  %v7570_v25 = vld [vmem:[%s11530_s3 + $0x550] sm:$0xf0] }
 0x236   :  { %4692 = vmatpush.bf16.msra.mxu2 %v6544_v43  ;;  %4704 = vmatpush.bf16.msra.mxu3 %v6664_v49  ;;  %v6640_v5 = vor.u32 %v7570_v25, %v6639_v1  ;;  %v4331_v8 = vadd.f32 %v4330_v33, %v4317_v46  ;;  %v4319_v63 = vadd.f32 %v4318_v42, %v4305_v38  ;;  %v6951_v33 = vld [vmem:[%s11530_s3 + $0x7b8] sm:$0xf] }
 0x237   :  { %v6952_v43 = vor.u32 %v7648_v18, %v6951_v33 }
 0x238   :  { %4718 = vmatpush.bf16.msrb.mxu0 %v6760_v13  ;;  %v7095_v13 = vld [vmem:[%s11530_s3 + $0x8d8] sm:$0xf]  ;;  %v4345_v32 = vadd.f32 %v4344_v35, %v4331_v8  ;;  %v4333_v14 = vadd.f32 %v4332_v11, %v4319_v63  ;;  %v7669_v11 = vld [vmem:[%s11530_s3 + $0x868] sm:$0xf0] }
 0x239   :  { %4732 = vmatpush.bf16.msrb.mxu1 %v6856_v9  ;;  %4693 = vmatmul.bf16.vlgmr.msra.gmra.mxu2 %v10130_v57  ;;  %v4346_v57 = vpop.f32.mrf.mxu1  ;;  %v4360_v9 = vpop.f32.mrf.mxu2  ;;  %v7036_v8 = vor.u32 %v7669_v11, %v7035_v52  ;;  %v2725_v11 = vperm.slane %v11302_v36, 2 }
 0x23a   :  { %4741 = vmatpush.bf16.msrb.mxu2 %v7012_v41  ;;  %4705 = vmatpush.bf16.msra.mxu3 %v6652_v6  ;;  %v4359_v53 = vadd.f32 %v4358_v12, %v4345_v32  ;;  %v4347_v34 = vadd.f32 %v4346_v57, %v4333_v14  ;;  %v7675_v41 = vld [vmem:[%s11530_s3 + $0x898] sm:$0xf0]  ;;  %v7047_v6 = vld [vmem:[%s11530_s3 + $0x878] sm:$0xf] }
 0x23b   :  { %v7060_v39 = vor.u32 %v7675_v41, %v7059_v31 }
 0x23c   :  { %4719 = vmatpush.bf16.msrb.mxu0 %v6748_v37  ;;  %v4386_v29 = vpop.f32.mrf.mxu0  ;;  %v4374_v37 = vpop.f32.mrf.mxu3  ;;  %v4373_v40 = vadd.f32 %v4372_v27, %v4359_v53  ;;  %v4361_v44 = vadd.f32 %v4360_v9, %v4347_v34 }
 0x23d   :  { %4733 = vmatpush.bf16.msrb.mxu1 %v6844_v24  ;;  %v7678_v24 = vld [vmem:[%s11530_s3 + $0x8b0] sm:$0xf0] }
 0x23e   :  { %4742 = vmatpush.bf16.msrb.mxu2 %v7000_v47  ;;  %4706 = vmatpush.bf16.msra.mxu3 %v6640_v5  ;;  %v4387_v35 = vadd.f32 %v4386_v29, %v4373_v40  ;;  %v7672_v47 = vld [vmem:[%s11530_s3 + $0x880] sm:$0xf0]  ;;  %v4375_v1 = vadd.f32 %v4374_v37, %v4361_v44 }
 0x23f   :  { %v7048_v20 = vor.u32 %v7672_v47, %v7047_v6 }
 0x240   :  { %4720 = vmatpush.bf16.msrb.mxu0 %v6736_v50  ;;  %v6940_v50 = vor.u32 %v7645_v26, %v6939_v10 }
 0x241   :  { %4734 = vmatpush.bf16.msrb.mxu1 %v6832_v2  ;;  %4707 = vmatmul.bf16.vlgmr.msra.gmra.mxu3 %v10151_v16  ;;  %v4400_v54 = vpop.f32.mrf.mxu1  ;;  %v7071_v16 = vld [vmem:[%s11530_s3 + $0x8a8] sm:$0xf]  ;;  %v4414_v42 = vpop.f32.mrf.mxu2 }
 0x242   :  { %4743 = vmatpush.bf16.msrb.mxu2 %v6988_v59  ;;  %4755 = vmatpush.bf16.msrb.mxu3 %v7108_v60  ;;  %v7072_v49 = vor.u32 %v7678_v24, %v7071_v16  ;;  %v4401_v45 = vadd.f32 %v4400_v54, %v4387_v35  ;;  %v7023_v60 = vld [vmem:[%s11530_s3 + $0x848] sm:$0xf] }
 0x243   :  { %4721 = vmatmul.bf16.vlgmr.msrb.gmra.mxu0 %v10324_v17  ;;  %v7684_v17 = vld [vmem:[%s11530_s3 + $0x8e0] sm:$0xf0]  ;;  %v7024_v57 = vor.u32 %v7666_v3, %v7023_v60 }
 0x244   :  { %4735 = vmatmul.bf16.vlgmr.msrb.gmra.mxu1 %v10490_v51  ;;  %v7096_v48 = vor.u32 %v7684_v17, %v7095_v13  ;;  %v6963_v51 = vld [vmem:[%s11530_s3 + $0x7d0] sm:$0xf]  ;;  %v4415_v12 = vadd.f32 %v4414_v42, %v4401_v45  ;;  %v4388_v56 = vpop.f32.mrf.mxu0  ;;  %v4428_v2 = vpop.f32.mrf.mxu3  ;;  %s7717_s3 = smov [#allocation2]  }
 0x245   :  { %v6964_v30 = vor.u32 %v7651_v19, %v6963_v51  ;;  %v4389_v62 = vadd.f32 %v4388_v56, %v4375_v1  ;;  %v2724_v51 = vperm.slane %v11302_v36, 1  ;;  %s4779_s8 = sshll.u32 %s7717_s3, 4  ;;  %s4780_s8 = int_to_ptr.vmem [resolvable:$true] %s4779_s8 }
 0x246   :  { %4744 = vmatpush.bf16.msrb.mxu2 %v6976_v7  ;;  %4756 = vmatpush.bf16.msrb.mxu3 %v7096_v48  ;;  %v4429_v25 = vadd.f32 %v4428_v2, %v4415_v12 }
 0x248   :  { %4769 = vst [vmem:[#allocation2] sm:$0xff] %v4429_v25 }
 0x249   :  { %v4402_v0 = vpop.f32.mrf.mxu1  ;;  %v4416_v46 = vpop.f32.mrf.mxu2 }
 0x24a   :  { %4745 = vmatpush.bf16.msrb.mxu2 %v6964_v30  ;;  %4757 = vmatpush.bf16.msrb.mxu3 %v7084_v23  ;;  %v4403_v27 = vadd.f32 %v4402_v0, %v4389_v62 }
 0x24c   :  { %v4417_v5 = vadd.f32 %v4416_v46, %v4403_v27  ;;  %v4430_v59 = vpop.f32.mrf.mxu3  ;;  %v4442_v4 = vpop.f32.mrf.mxu0 }
 0x24d   :  { %v4443_v63 = vadd.f32 %v4442_v4, %v2724_v51 }
 0x24e   :  { %4746 = vmatpush.bf16.msrb.mxu2 %v6952_v43  ;;  %4758 = vmatpush.bf16.msrb.mxu3 %v7072_v49  ;;  %v4431_v38 = vadd.f32 %v4430_v59, %v4417_v5 }
 0x250   :  { %4772 = vst [vmem:[#allocation2 + $0x18] sm:$0xff] %v4431_v38 }
 0x251   :  { %v4456_v13 = vpop.f32.mrf.mxu1  ;;  %v4470_v17 = vpop.f32.mrf.mxu2 }
 0x252   :  { %4747 = vmatpush.bf16.msrb.mxu2 %v6940_v50  ;;  %4759 = vmatpush.bf16.msrb.mxu3 %v7060_v39  ;;  %v4457_v22 = vadd.f32 %v4456_v13, %v4443_v63 }
 0x254   :  { %v4484_v9 = vpop.f32.mrf.mxu3  ;;  %v4444_v32 = vpop.f32.mrf.mxu0 }
 0x255   :  { %v4445_v30 = vadd.f32 %v4444_v32, %v2724_v51 }
 0x256   :  { %4748 = vmatpush.bf16.msrb.mxu2 %v6928_v28  ;;  %4760 = vmatpush.bf16.msrb.mxu3 %v7048_v20 }
 0x259   :  { %4749 = vmatmul.bf16.vlgmr.msrb.gmra.mxu2 %v10608_v15  ;;  %v4458_v7 = vpop.f32.mrf.mxu1  ;;  %v4472_v48 = vpop.f32.mrf.mxu2  ;;  %v4471_v15 = vadd.f32 %v4470_v17, %v4457_v22 }
 0x25a   :  { %4761 = vmatpush.bf16.msrb.mxu3 %v7036_v8  ;;  %v4459_v23 = vadd.f32 %v4458_v7, %v4445_v30 }
 0x25b   :  { %v4485_v29 = vadd.f32 %v4484_v9, %v4471_v15 }
 0x25c   :  { %v4498_v19 = vpop.f32.mrf.mxu0  ;;  %v4486_v21 = vpop.f32.mrf.mxu3 }
 0x25d   :  { %v4499_v33 = vadd.f32 %v4498_v19, %v4485_v29 }
 0x25e   :  { %4762 = vmatpush.bf16.msrb.mxu3 %v7024_v57 }
 0x261   :  { %4763 = vmatmul.bf16.vlgmr.msrb.gmra.mxu3 %v10662_v61  ;;  %v4512_v53 = vpop.f32.mrf.mxu1  ;;  %v4526_v14 = vpop.f32.mrf.mxu2  ;;  %v4473_v61 = vadd.f32 %v4472_v48, %v4459_v23 }
 0x262   :  { %v4513_v16 = vadd.f32 %v4512_v53, %v4499_v33 }
 0x263   :  { %v4487_v18 = vadd.f32 %v4486_v21, %v4473_v61 }
 0x264   :  { %v4500_v37 = vpop.f32.mrf.mxu0  ;;  %v4540_v54 = vpop.f32.mrf.mxu3  ;;  %v4527_v34 = vadd.f32 %v4526_v14, %v4513_v16 }
 0x265   :  { %v4501_v42 = vadd.f32 %v4500_v37, %v4487_v18 }
 0x266   :  { %v4541_v35 = vadd.f32 %v4540_v54, %v4527_v34 }
 0x269   :  { %v4514_v24 = vpop.f32.mrf.mxu1  ;;  %v4528_v40 = vpop.f32.mrf.mxu2 }
 0x26a   :  { %v4515_v10 = vadd.f32 %v4514_v24, %v4501_v42 }
 0x26c   :  { %v4554_v43 = vpop.f32.mrf.mxu0  ;;  %v4542_v49 = vpop.f32.mrf.mxu3  ;;  %v4529_v44 = vadd.f32 %v4528_v40, %v4515_v10 }
 0x26d   :  { %v4555_v26 = vadd.f32 %v4554_v43, %v4541_v35 }
 0x26e   :  { %v4543_v45 = vadd.f32 %v4542_v49, %v4529_v44 }
 0x271   :  { %v4568_v31 = vpop.f32.mrf.mxu1 }
 0x272   :  { %v4569_v12 = vadd.f32 %v4568_v31, %v4555_v26 }
 0x274   :  { %v4556_v39 = vpop.f32.mrf.mxu0 }
 0x275   :  { %v4582_v41 = vpop.f32.mrf.mxu2  ;;  %v4557_v56 = vadd.f32 %v4556_v39, %v4543_v45 }
 0x276   :  { %v4583_v50 = vadd.f32 %v4582_v41, %v4569_v12 }
 0x279   :  { %v4570_v58 = vpop.f32.mrf.mxu1 }
 0x27a   :  { %v4571_v47 = vadd.f32 %v4570_v58, %v4557_v56 }
 0x27d   :  { %v4584_v6 = vpop.f32.mrf.mxu2 }
 0x27e   :  { %v4585_v1 = vadd.f32 %v4584_v6, %v4571_v47 }
 0x27f   :  { %v4596_v55 = vpop.f32.mrf.mxu3 }
 0x280   :  { %v4597_v2 = vadd.f32 %v4596_v55, %v4583_v50  ;;  %v4610_v62 = vpop.f32.mrf.mxu0 }
 0x281   :  { %v4624_v28 = vpop.f32.mrf.mxu1  ;;  %v4611_v8 = vadd.f32 %v4610_v62, %v2725_v11 }
 0x282   :  { %4770 = vst [vmem:[#allocation2 + $0x8] sm:$0xff] %v4597_v2 }
 0x283   :  { %v4625_v60 = vadd.f32 %v4624_v28, %v4611_v8 }
 0x287   :  { %v4598_v25 = vpop.f32.mrf.mxu3 }
 0x288   :  { %v4599_v0 = vadd.f32 %v4598_v25, %v4585_v1  ;;  %v4612_v46 = vpop.f32.mrf.mxu0 }
 0x289   :  { %v4626_v27 = vpop.f32.mrf.mxu1  ;;  %v4613_v13 = vadd.f32 %v4612_v46, %v2725_v11 }
 0x28a   :  { %4773 = vst [vmem:[#allocation2 + $0x20] sm:$0xff] %v4599_v0 }
 0x28b   :  { %v4627_v9 = vadd.f32 %v4626_v27, %v4613_v13 }
 0x295   :  { %v4638_v20 = vpop.f32.mrf.mxu2 }
 0x296   :  { %v4639_v38 = vadd.f32 %v4638_v20, %v4625_v60 }
 0x29d   :  { %v4640_v5 = vpop.f32.mrf.mxu2 }
 0x29e   :  { %v4641_v51 = vadd.f32 %v4640_v5, %v4627_v9 }
 0x2a0   :  { %v4666_v59 = vpop.f32.mrf.mxu0 }
 0x2a1   :  { %v4680_v57 = vpop.f32.mrf.mxu1 }
 0x2a4   :  { %v4652_v52 = vpop.f32.mrf.mxu3 }
 0x2a5   :  { %v4653_v17 = vadd.f32 %v4652_v52, %v4639_v38 }
 0x2a7   :  { %v4667_v32 = vadd.f32 %v4666_v59, %v4653_v17 }
 0x2a8   :  { %v4668_v7 = vpop.f32.mrf.mxu0 }
 0x2a9   :  { %v4681_v19 = vadd.f32 %v4680_v57, %v4667_v32  ;;  %v4682_v21 = vpop.f32.mrf.mxu1 }
 0x2ac   :  { %v4654_v3 = vpop.f32.mrf.mxu3 }
 0x2ad   :  { %v4655_v63 = vadd.f32 %v4654_v3, %v4641_v51 }
 0x2af   :  { %v4669_v15 = vadd.f32 %v4668_v7, %v4655_v63 }
 0x2b1   :  { %v4683_v30 = vadd.f32 %v4682_v21, %v4669_v15 }
 0x2bc   :  { %v4694_v4 = vpop.f32.mrf.mxu2 }
 0x2bd   :  { %v4695_v22 = vadd.f32 %v4694_v4, %v4681_v19 }
 0x2c0   :  { %v4722_v14 = vpop.f32.mrf.mxu0 }
 0x2c1   :  { %v4736_v33 = vpop.f32.mrf.mxu1 }
 0x2c4   :  { %v4708_v48 = vpop.f32.mrf.mxu3  ;;  %v4696_v36 = vpop.f32.mrf.mxu2 }
 0x2c5   :  { %v4709_v53 = vadd.f32 %v4708_v48, %v4695_v22  ;;  %v4697_v54 = vadd.f32 %v4696_v36, %v4683_v30 }
 0x2c7   :  { %v4723_v23 = vadd.f32 %v4722_v14, %v4709_v53 }
 0x2c8   :  { %v4724_v24 = vpop.f32.mrf.mxu0 }
 0x2c9   :  { %v4737_v18 = vadd.f32 %v4736_v33, %v4723_v23  ;;  %v4738_v35 = vpop.f32.mrf.mxu1 }
 0x2cc   :  { %v4710_v29 = vpop.f32.mrf.mxu3 }
 0x2cd   :  { %v4711_v61 = vadd.f32 %v4710_v29, %v4697_v54 }
 0x2cf   :  { %v4725_v34 = vadd.f32 %v4724_v24, %v4711_v61 }
 0x2d1   :  { %v4739_v49 = vadd.f32 %v4738_v35, %v4725_v34 }
 0x2dc   :  { %v4750_v37 = vpop.f32.mrf.mxu2 }
 0x2dd   :  { %v4751_v16 = vadd.f32 %v4750_v37, %v4737_v18 }
 0x2e4   :  { %v4764_v40 = vpop.f32.mrf.mxu3  ;;  %v4752_v43 = vpop.f32.mrf.mxu2 }
 0x2e5   :  { %v4765_v42 = vadd.f32 %v4764_v40, %v4751_v16  ;;  %v4753_v10 = vadd.f32 %v4752_v43, %v4739_v49 }
 0x2e7   :  { %4771 = vst [vmem:[#allocation2 + $0x10] sm:$0xff] %v4765_v42 }
 0x2ec   :  { %v4766_v26 = vpop.f32.mrf.mxu3 }
 0x2ed   :  { %v4767_v31 = vadd.f32 %v4766_v26, %v4753_v10 }
 0x2ef   :  { %4774 = vst [vmem:[#allocation2 + $0x28] sm:$0xff] %v4767_v31 }
 0x2f0   :  { %4787 = dma.vmem_to_hbm [thread:$0]  %s4780_s8, 768, %s4782_s11, [#allocation3], %s7718_s12, %s7718_s12, %s7719_s13  }
 0x2f1   :  { %7715 = dma.done.wait [#allocation3], 768  }
 0x2f2   :  { %7716 = vsyncadd [#allocation3], 4294966528 }
 0x2f3   :  { %4792 = vsyncpa [#allocation3], 1 }

</bundles_post_ra>
